<compile_context>
chip_gen: v6e
topology: v6e:2x2x1
jax: 0.10.0
libtpu: 0.0.40
codegen_flags: <defaults>
</compile_context>

<pallas_src>
import jax
import jax.numpy as jnp
from jax.experimental import pallas as pl
from jax.experimental.pallas import tpu as pltpu

LANES = 128          # batches per inner compute chunk (one vreg lane width)
TARGET_CHUNKS = 8    # up to 8 * 128 = 1024 batches (~1 MiB f32 in + 1 MiB out) per grid step


def _qat_matmul_net_kernel(x_ref, w_ref, b_ref, o_ref):
    """One grid step processes a block of BTC batches, laid out batch-in-lanes.

    x_ref : (16, 16, BTC)  -- x[b, m, k] stored as x_t[m, k, b]
    w_ref : (16, 16)       -- torch Linear weight, (out=n, in=k) layout
    b_ref : (16, 1)        -- bias as a column (adds along the n/sublane axis)
    o_ref : (16, 16, BTC)  -- out[b, m, n] stored as o_t[m, n, b]
    """
    w = w_ref[...]            # (16, 16), resident across the whole grid
    bias = b_ref[...]         # (16, 1) -> broadcasts along lanes (batch)
    n_chunks = x_ref.shape[2] // LANES   # static

    def chunk_body(c, carry):
        off = pl.multiple_of(c * LANES, LANES)

        # ---- fc: y[m][n, b] = sum_k W[n, k] * x[m, k, b] + bias[n] ---------
        # 16 lane-dense MXU matmuls; W stays in torch (out, in) layout so no
        # transpose/relayout happens anywhere.  Each y[m] is (16, 128) f32.
        y = [
            jnp.dot(w, x_ref[m, :, pl.ds(off, LANES)],
                    preferred_element_type=jnp.float32) + bias
            for m in range(16)
        ]

        # ---- matmul: out[m][n, b] = sum_k y[m][k, b] * y[k][n, b] ----------
        # Batched 16x16x16 matmul done on the VPU with batch in the lane axis:
        # y[m][k:k+1, :] is a (1, 128) row broadcast across the 16 sublanes,
        # so each batch costs only a handful of VALU cycles and the store of
        # each out row is a full, unmasked lane-dense vst.
        for m in range(16):
            acc = y[m][0:1, :] * y[0]
            for k in range(1, 16):
                acc = acc + y[m][k:k + 1, :] * y[k]
            o_ref[m, :, pl.ds(off, LANES)] = acc.astype(o_ref.dtype)
        return carry

    jax.lax.fori_loop(0, n_chunks, chunk_body, 0)


def qat_matmul_net(x, w, b):
    """x: (B, 16, 16) f32, w: (16, 16) f32 torch (out, in) layout, b: (16,) f32."""
    B, M, K = x.shape
    assert (M, K) == (16, 16) and w.shape == (16, 16) and b.shape == (16,)

    # ---- block / grid sizing -------------------------------------------------
    n_chunks = -(-B // LANES)                           # 128-batch chunks
    if n_chunks >= 2:
        # keep >= 2 grid steps so v7x's two TensorCores both get work
        chunks_per_block = min(TARGET_CHUNKS, max(1, n_chunks // 2))
    else:
        chunks_per_block = 1
    n_blocks = -(-n_chunks // chunks_per_block)         # grid size
    btc = chunks_per_block * LANES                      # batches per grid step
    b_pad = n_blocks * btc

    # ---- batch-in-lanes layout + tail padding (one HBM pass, done by XLA) ----
    x_p = jnp.pad(x, ((0, b_pad - B), (0, 0), (0, 0)))
    x_t = jnp.transpose(x_p, (1, 2, 0))                 # (16, 16, B_pad): (m, k, b)
    b_col = b.reshape(16, 1)

    cost = pl.CostEstimate(
        flops=4 * b_pad * 16 ** 3,                      # two 16x16x16 matmuls per batch
        transcendentals=0,
        bytes_accessed=2 * b_pad * 16 * 16 * 4 + (16 * 16 + 16) * 4,
    )

    out_t = pl.pallas_call(
        _qat_matmul_net_kernel,
        out_shape=jax.ShapeDtypeStruct((16, 16, b_pad), x.dtype),
        grid_spec=pl.GridSpec(
            grid=(n_blocks,),
            in_specs=[
                pl.BlockSpec((16, 16, btc), lambda i: (0, 0, i)),   # x block (lane-dense)
                pl.BlockSpec((16, 16), lambda i: (0, 0)),           # weight, resident
                pl.BlockSpec((16, 1), lambda i: (0, 0)),            # bias, resident
            ],
            out_specs=pl.BlockSpec((16, 16, btc), lambda i: (0, 0, i)),
        ),
        compiler_params=pltpu.CompilerParams(
            dimension_semantics=("parallel",),          # shard batch blocks across TCs
        ),
        cost_estimate=cost,
    )(x_t, w, b_col)

    return jnp.transpose(out_t, (2, 0, 1))[:B]          # back to (B, 16, 16)


def _reference(x, w, b):
    y = jnp.einsum("bmk,nk->bmn", x, w) + b[None, None, :]
    return jnp.einsum("bmk,bkn->bmn", y, y)


if __name__ == "__main__":
    key = jax.random.PRNGKey(0)
    kx, kw, kb = jax.random.split(key, 3)

    # Small demo batch; 200 is not a multiple of 128, so it also exercises the
    # padded-tail path and produces a 2-step ("parallel") grid.
    B = 200
    x = jax.random.normal(kx, (B, 16, 16), dtype=jnp.float32)
    bound = 1.0 / jnp.sqrt(16.0)       # torch Linear default init range
    w = jax.random.uniform(kw, (16, 16), jnp.float32, -bound, bound)
    b = jax.random.uniform(kb, (16,), jnp.float32, -bound, bound)

    out = jax.block_until_ready(qat_matmul_net(x, w, b))

    ref = _reference(x, w, b)
    assert out.shape == (B, 16, 16)
    err = float(jnp.max(jnp.abs(out - ref)))
    assert err < 1e-3, f"max abs error {err}"

    print("KERNEL_OK")
</pallas_src>

<mosaic_0001>
module attributes {stable_mosaic.version = 11 : i64} {
  func.func @_qat_matmul_net_kernel(%arg0: i32, %arg1: memref<16x16x128xf32, #tpu.memory_space<vmem>>, %arg2: memref<16x16xf32, #tpu.memory_space<vmem>>, %arg3: memref<16x1xf32, #tpu.memory_space<vmem>>, %arg4: memref<16x16x128xf32, #tpu.memory_space<vmem>>) attributes {dimension_semantics = [#tpu.dimension_semantics<parallel>], iteration_bounds = array<i64: 2>, scalar_prefetch = 0 : i64, scratch_operands = 0 : i64, tpu.core_type = #tpu.core_type<tc>, window_params = [{transform_indices = @transform_0, window_bounds = array<i64: 16, 16, 128>}, {pipeline_mode = #tpu.pipeline_mode<synchronous>, transform_indices = @transform_1, window_bounds = array<i64: 16, 16>}, {pipeline_mode = #tpu.pipeline_mode<synchronous>, transform_indices = @transform_2, window_bounds = array<i64: 16, 1>}, {transform_indices = @transform_3, window_bounds = array<i64: 16, 16, 128>}]} {
    %c0 = arith.constant 0 : index
    %c0_0 = arith.constant 0 : index
    %0 = vector.load %arg2[%c0, %c0_0] : memref<16x16xf32, #tpu.memory_space<vmem>>, vector<16x16xf32>
    %c0_1 = arith.constant 0 : index
    %c0_2 = arith.constant 0 : index
    %1 = vector.load %arg3[%c0_1, %c0_2] : memref<16x1xf32, #tpu.memory_space<vmem>>, vector<16x1xf32>
    %c0_i32 = arith.constant 0 : i32
    %c128_i32 = arith.constant 128 : i32
    %2 = arith.muli %c0_i32, %c128_i32 : i32
    %3 = tpu.assume_multiple %2, 128 : i32
    %c0_3 = arith.constant 0 : index
    %c0_4 = arith.constant 0 : index
    %4 = arith.index_cast %3 : i32 to index
    %5 = vector.load %arg1[%c0_3, %c0_4, %4] : memref<16x16x128xf32, #tpu.memory_space<vmem>>, vector<1x16x128xf32>
    %6 = vector.shape_cast %5 : vector<1x16x128xf32> to vector<16x128xf32>
    %cst = arith.constant dense<0.000000e+00> : vector<16x128xf32>
    %7 = tpu.matmul %0, %6, %cst {dimension_numbers = #tpu.dot_dimension_numbers<[1], [0], [0], [1], [0, 0, 1, 1], [], []>} : vector<16x16xf32>, vector<16x128xf32>, vector<16x128xf32> -> vector<16x128xf32>
    %8 = vector.broadcast %1 : vector<16x1xf32> to vector<16x128xf32>
    %9 = arith.addf %7, %8 : vector<16x128xf32>
    %c1 = arith.constant 1 : index
    %c0_5 = arith.constant 0 : index
    %10 = arith.index_cast %3 : i32 to index
    %11 = vector.load %arg1[%c1, %c0_5, %10] : memref<16x16x128xf32, #tpu.memory_space<vmem>>, vector<1x16x128xf32>
    %12 = vector.shape_cast %11 : vector<1x16x128xf32> to vector<16x128xf32>
    %cst_6 = arith.constant dense<0.000000e+00> : vector<16x128xf32>
    %13 = tpu.matmul %0, %12, %cst_6 {dimension_numbers = #tpu.dot_dimension_numbers<[1], [0], [0], [1], [0, 0, 1, 1], [], []>} : vector<16x16xf32>, vector<16x128xf32>, vector<16x128xf32> -> vector<16x128xf32>
    %14 = vector.broadcast %1 : vector<16x1xf32> to vector<16x128xf32>
    %15 = arith.addf %13, %14 : vector<16x128xf32>
    %c2 = arith.constant 2 : index
    %c0_7 = arith.constant 0 : index
    %16 = arith.index_cast %3 : i32 to index
    %17 = vector.load %arg1[%c2, %c0_7, %16] : memref<16x16x128xf32, #tpu.memory_space<vmem>>, vector<1x16x128xf32>
    %18 = vector.shape_cast %17 : vector<1x16x128xf32> to vector<16x128xf32>
    %cst_8 = arith.constant dense<0.000000e+00> : vector<16x128xf32>
    %19 = tpu.matmul %0, %18, %cst_8 {dimension_numbers = #tpu.dot_dimension_numbers<[1], [0], [0], [1], [0, 0, 1, 1], [], []>} : vector<16x16xf32>, vector<16x128xf32>, vector<16x128xf32> -> vector<16x128xf32>
    %20 = vector.broadcast %1 : vector<16x1xf32> to vector<16x128xf32>
    %21 = arith.addf %19, %20 : vector<16x128xf32>
    %c3 = arith.constant 3 : index
    %c0_9 = arith.constant 0 : index
    %22 = arith.index_cast %3 : i32 to index
    %23 = vector.load %arg1[%c3, %c0_9, %22] : memref<16x16x128xf32, #tpu.memory_space<vmem>>, vector<1x16x128xf32>
    %24 = vector.shape_cast %23 : vector<1x16x128xf32> to vector<16x128xf32>
    %cst_10 = arith.constant dense<0.000000e+00> : vector<16x128xf32>
    %25 = tpu.matmul %0, %24, %cst_10 {dimension_numbers = #tpu.dot_dimension_numbers<[1], [0], [0], [1], [0, 0, 1, 1], [], []>} : vector<16x16xf32>, vector<16x128xf32>, vector<16x128xf32> -> vector<16x128xf32>
    %26 = vector.broadcast %1 : vector<16x1xf32> to vector<16x128xf32>
    %27 = arith.addf %25, %26 : vector<16x128xf32>
    %c4 = arith.constant 4 : index
    %c0_11 = arith.constant 0 : index
    %28 = arith.index_cast %3 : i32 to index
    %29 = vector.load %arg1[%c4, %c0_11, %28] : memref<16x16x128xf32, #tpu.memory_space<vmem>>, vector<1x16x128xf32>
    %30 = vector.shape_cast %29 : vector<1x16x128xf32> to vector<16x128xf32>
    %cst_12 = arith.constant dense<0.000000e+00> : vector<16x128xf32>
    %31 = tpu.matmul %0, %30, %cst_12 {dimension_numbers = #tpu.dot_dimension_numbers<[1], [0], [0], [1], [0, 0, 1, 1], [], []>} : vector<16x16xf32>, vector<16x128xf32>, vector<16x128xf32> -> vector<16x128xf32>
    %32 = vector.broadcast %1 : vector<16x1xf32> to vector<16x128xf32>
    %33 = arith.addf %31, %32 : vector<16x128xf32>
    %c5 = arith.constant 5 : index
    %c0_13 = arith.constant 0 : index
    %34 = arith.index_cast %3 : i32 to index
    %35 = vector.load %arg1[%c5, %c0_13, %34] : memref<16x16x128xf32, #tpu.memory_space<vmem>>, vector<1x16x128xf32>
    %36 = vector.shape_cast %35 : vector<1x16x128xf32> to vector<16x128xf32>
    %cst_14 = arith.constant dense<0.000000e+00> : vector<16x128xf32>
    %37 = tpu.matmul %0, %36, %cst_14 {dimension_numbers = #tpu.dot_dimension_numbers<[1], [0], [0], [1], [0, 0, 1, 1], [], []>} : vector<16x16xf32>, vector<16x128xf32>, vector<16x128xf32> -> vector<16x128xf32>
    %38 = vector.broadcast %1 : vector<16x1xf32> to vector<16x128xf32>
    %39 = arith.addf %37, %38 : vector<16x128xf32>
    %c6 = arith.constant 6 : index
    %c0_15 = arith.constant 0 : index
    %40 = arith.index_cast %3 : i32 to index
    %41 = vector.load %arg1[%c6, %c0_15, %40] : memref<16x16x128xf32, #tpu.memory_space<vmem>>, vector<1x16x128xf32>
    %42 = vector.shape_cast %41 : vector<1x16x128xf32> to vector<16x128xf32>
    %cst_16 = arith.constant dense<0.000000e+00> : vector<16x128xf32>
    %43 = tpu.matmul %0, %42, %cst_16 {dimension_numbers = #tpu.dot_dimension_numbers<[1], [0], [0], [1], [0, 0, 1, 1], [], []>} : vector<16x16xf32>, vector<16x128xf32>, vector<16x128xf32> -> vector<16x128xf32>
    %44 = vector.broadcast %1 : vector<16x1xf32> to vector<16x128xf32>
    %45 = arith.addf %43, %44 : vector<16x128xf32>
    %c7 = arith.constant 7 : index
    %c0_17 = arith.constant 0 : index
    %46 = arith.index_cast %3 : i32 to index
    %47 = vector.load %arg1[%c7, %c0_17, %46] : memref<16x16x128xf32, #tpu.memory_space<vmem>>, vector<1x16x128xf32>
    %48 = vector.shape_cast %47 : vector<1x16x128xf32> to vector<16x128xf32>
    %cst_18 = arith.constant dense<0.000000e+00> : vector<16x128xf32>
    %49 = tpu.matmul %0, %48, %cst_18 {dimension_numbers = #tpu.dot_dimension_numbers<[1], [0], [0], [1], [0, 0, 1, 1], [], []>} : vector<16x16xf32>, vector<16x128xf32>, vector<16x128xf32> -> vector<16x128xf32>
    %50 = vector.broadcast %1 : vector<16x1xf32> to vector<16x128xf32>
    %51 = arith.addf %49, %50 : vector<16x128xf32>
    %c8 = arith.constant 8 : index
    %c0_19 = arith.constant 0 : index
    %52 = arith.index_cast %3 : i32 to index
    %53 = vector.load %arg1[%c8, %c0_19, %52] : memref<16x16x128xf32, #tpu.memory_space<vmem>>, vector<1x16x128xf32>
    %54 = vector.shape_cast %53 : vector<1x16x128xf32> to vector<16x128xf32>
    %cst_20 = arith.constant dense<0.000000e+00> : vector<16x128xf32>
    %55 = tpu.matmul %0, %54, %cst_20 {dimension_numbers = #tpu.dot_dimension_numbers<[1], [0], [0], [1], [0, 0, 1, 1], [], []>} : vector<16x16xf32>, vector<16x128xf32>, vector<16x128xf32> -> vector<16x128xf32>
    %56 = vector.broadcast %1 : vector<16x1xf32> to vector<16x128xf32>
    %57 = arith.addf %55, %56 : vector<16x128xf32>
    %c9 = arith.constant 9 : index
    %c0_21 = arith.constant 0 : index
    %58 = arith.index_cast %3 : i32 to index
    %59 = vector.load %arg1[%c9, %c0_21, %58] : memref<16x16x128xf32, #tpu.memory_space<vmem>>, vector<1x16x128xf32>
    %60 = vector.shape_cast %59 : vector<1x16x128xf32> to vector<16x128xf32>
    %cst_22 = arith.constant dense<0.000000e+00> : vector<16x128xf32>
    %61 = tpu.matmul %0, %60, %cst_22 {dimension_numbers = #tpu.dot_dimension_numbers<[1], [0], [0], [1], [0, 0, 1, 1], [], []>} : vector<16x16xf32>, vector<16x128xf32>, vector<16x128xf32> -> vector<16x128xf32>
    %62 = vector.broadcast %1 : vector<16x1xf32> to vector<16x128xf32>
    %63 = arith.addf %61, %62 : vector<16x128xf32>
    %c10 = arith.constant 10 : index
    %c0_23 = arith.constant 0 : index
    %64 = arith.index_cast %3 : i32 to index
    %65 = vector.load %arg1[%c10, %c0_23, %64] : memref<16x16x128xf32, #tpu.memory_space<vmem>>, vector<1x16x128xf32>
    %66 = vector.shape_cast %65 : vector<1x16x128xf32> to vector<16x128xf32>
    %cst_24 = arith.constant dense<0.000000e+00> : vector<16x128xf32>
    %67 = tpu.matmul %0, %66, %cst_24 {dimension_numbers = #tpu.dot_dimension_numbers<[1], [0], [0], [1], [0, 0, 1, 1], [], []>} : vector<16x16xf32>, vector<16x128xf32>, vector<16x128xf32> -> vector<16x128xf32>
    %68 = vector.broadcast %1 : vector<16x1xf32> to vector<16x128xf32>
    %69 = arith.addf %67, %68 : vector<16x128xf32>
    %c11 = arith.constant 11 : index
    %c0_25 = arith.constant 0 : index
    %70 = arith.index_cast %3 : i32 to index
    %71 = vector.load %arg1[%c11, %c0_25, %70] : memref<16x16x128xf32, #tpu.memory_space<vmem>>, vector<1x16x128xf32>
    %72 = vector.shape_cast %71 : vector<1x16x128xf32> to vector<16x128xf32>
    %cst_26 = arith.constant dense<0.000000e+00> : vector<16x128xf32>
    %73 = tpu.matmul %0, %72, %cst_26 {dimension_numbers = #tpu.dot_dimension_numbers<[1], [0], [0], [1], [0, 0, 1, 1], [], []>} : vector<16x16xf32>, vector<16x128xf32>, vector<16x128xf32> -> vector<16x128xf32>
    %74 = vector.broadcast %1 : vector<16x1xf32> to vector<16x128xf32>
    %75 = arith.addf %73, %74 : vector<16x128xf32>
    %c12 = arith.constant 12 : index
    %c0_27 = arith.constant 0 : index
    %76 = arith.index_cast %3 : i32 to index
    %77 = vector.load %arg1[%c12, %c0_27, %76] : memref<16x16x128xf32, #tpu.memory_space<vmem>>, vector<1x16x128xf32>
    %78 = vector.shape_cast %77 : vector<1x16x128xf32> to vector<16x128xf32>
    %cst_28 = arith.constant dense<0.000000e+00> : vector<16x128xf32>
    %79 = tpu.matmul %0, %78, %cst_28 {dimension_numbers = #tpu.dot_dimension_numbers<[1], [0], [0], [1], [0, 0, 1, 1], [], []>} : vector<16x16xf32>, vector<16x128xf32>, vector<16x128xf32> -> vector<16x128xf32>
    %80 = vector.broadcast %1 : vector<16x1xf32> to vector<16x128xf32>
    %81 = arith.addf %79, %80 : vector<16x128xf32>
    %c13 = arith.constant 13 : index
    %c0_29 = arith.constant 0 : index
    %82 = arith.index_cast %3 : i32 to index
    %83 = vector.load %arg1[%c13, %c0_29, %82] : memref<16x16x128xf32, #tpu.memory_space<vmem>>, vector<1x16x128xf32>
    %84 = vector.shape_cast %83 : vector<1x16x128xf32> to vector<16x128xf32>
    %cst_30 = arith.constant dense<0.000000e+00> : vector<16x128xf32>
    %85 = tpu.matmul %0, %84, %cst_30 {dimension_numbers = #tpu.dot_dimension_numbers<[1], [0], [0], [1], [0, 0, 1, 1], [], []>} : vector<16x16xf32>, vector<16x128xf32>, vector<16x128xf32> -> vector<16x128xf32>
    %86 = vector.broadcast %1 : vector<16x1xf32> to vector<16x128xf32>
    %87 = arith.addf %85, %86 : vector<16x128xf32>
    %c14 = arith.constant 14 : index
    %c0_31 = arith.constant 0 : index
    %88 = arith.index_cast %3 : i32 to index
    %89 = vector.load %arg1[%c14, %c0_31, %88] : memref<16x16x128xf32, #tpu.memory_space<vmem>>, vector<1x16x128xf32>
    %90 = vector.shape_cast %89 : vector<1x16x128xf32> to vector<16x128xf32>
    %cst_32 = arith.constant dense<0.000000e+00> : vector<16x128xf32>
    %91 = tpu.matmul %0, %90, %cst_32 {dimension_numbers = #tpu.dot_dimension_numbers<[1], [0], [0], [1], [0, 0, 1, 1], [], []>} : vector<16x16xf32>, vector<16x128xf32>, vector<16x128xf32> -> vector<16x128xf32>
    %92 = vector.broadcast %1 : vector<16x1xf32> to vector<16x128xf32>
    %93 = arith.addf %91, %92 : vector<16x128xf32>
    %c15 = arith.constant 15 : index
    %c0_33 = arith.constant 0 : index
    %94 = arith.index_cast %3 : i32 to index
    %95 = vector.load %arg1[%c15, %c0_33, %94] : memref<16x16x128xf32, #tpu.memory_space<vmem>>, vector<1x16x128xf32>
    %96 = vector.shape_cast %95 : vector<1x16x128xf32> to vector<16x128xf32>
    %cst_34 = arith.constant dense<0.000000e+00> : vector<16x128xf32>
    %97 = tpu.matmul %0, %96, %cst_34 {dimension_numbers = #tpu.dot_dimension_numbers<[1], [0], [0], [1], [0, 0, 1, 1], [], []>} : vector<16x16xf32>, vector<16x128xf32>, vector<16x128xf32> -> vector<16x128xf32>
    %98 = vector.broadcast %1 : vector<16x1xf32> to vector<16x128xf32>
    %99 = arith.addf %97, %98 : vector<16x128xf32>
    %100 = vector.extract_strided_slice %9 {offsets = [0, 0], sizes = [1, 128], strides = [1, 1]} : vector<16x128xf32> to vector<1x128xf32>
    %101 = vector.broadcast %100 : vector<1x128xf32> to vector<16x128xf32>
    %102 = arith.mulf %101, %9 : vector<16x128xf32>
    %103 = vector.extract_strided_slice %9 {offsets = [1, 0], sizes = [1, 128], strides = [1, 1]} : vector<16x128xf32> to vector<1x128xf32>
    %104 = vector.broadcast %103 : vector<1x128xf32> to vector<16x128xf32>
    %105 = arith.mulf %104, %15 : vector<16x128xf32>
    %106 = arith.addf %102, %105 : vector<16x128xf32>
    %107 = vector.extract_strided_slice %9 {offsets = [2, 0], sizes = [1, 128], strides = [1, 1]} : vector<16x128xf32> to vector<1x128xf32>
    %108 = vector.broadcast %107 : vector<1x128xf32> to vector<16x128xf32>
    %109 = arith.mulf %108, %21 : vector<16x128xf32>
    %110 = arith.addf %106, %109 : vector<16x128xf32>
    %111 = vector.extract_strided_slice %9 {offsets = [3, 0], sizes = [1, 128], strides = [1, 1]} : vector<16x128xf32> to vector<1x128xf32>
    %112 = vector.broadcast %111 : vector<1x128xf32> to vector<16x128xf32>
    %113 = arith.mulf %112, %27 : vector<16x128xf32>
    %114 = arith.addf %110, %113 : vector<16x128xf32>
    %115 = vector.extract_strided_slice %9 {offsets = [4, 0], sizes = [1, 128], strides = [1, 1]} : vector<16x128xf32> to vector<1x128xf32>
    %116 = vector.broadcast %115 : vector<1x128xf32> to vector<16x128xf32>
    %117 = arith.mulf %116, %33 : vector<16x128xf32>
    %118 = arith.addf %114, %117 : vector<16x128xf32>
    %119 = vector.extract_strided_slice %9 {offsets = [5, 0], sizes = [1, 128], strides = [1, 1]} : vector<16x128xf32> to vector<1x128xf32>
    %120 = vector.broadcast %119 : vector<1x128xf32> to vector<16x128xf32>
    %121 = arith.mulf %120, %39 : vector<16x128xf32>
    %122 = arith.addf %118, %121 : vector<16x128xf32>
    %123 = vector.extract_strided_slice %9 {offsets = [6, 0], sizes = [1, 128], strides = [1, 1]} : vector<16x128xf32> to vector<1x128xf32>
    %124 = vector.broadcast %123 : vector<1x128xf32> to vector<16x128xf32>
    %125 = arith.mulf %124, %45 : vector<16x128xf32>
    %126 = arith.addf %122, %125 : vector<16x128xf32>
    %127 = vector.extract_strided_slice %9 {offsets = [7, 0], sizes = [1, 128], strides = [1, 1]} : vector<16x128xf32> to vector<1x128xf32>
    %128 = vector.broadcast %127 : vector<1x128xf32> to vector<16x128xf32>
    %129 = arith.mulf %128, %51 : vector<16x128xf32>
    %130 = arith.addf %126, %129 : vector<16x128xf32>
    %131 = vector.extract_strided_slice %9 {offsets = [8, 0], sizes = [1, 128], strides = [1, 1]} : vector<16x128xf32> to vector<1x128xf32>
    %132 = vector.broadcast %131 : vector<1x128xf32> to vector<16x128xf32>
    %133 = arith.mulf %132, %57 : vector<16x128xf32>
    %134 = arith.addf %130, %133 : vector<16x128xf32>
    %135 = vector.extract_strided_slice %9 {offsets = [9, 0], sizes = [1, 128], strides = [1, 1]} : vector<16x128xf32> to vector<1x128xf32>
    %136 = vector.broadcast %135 : vector<1x128xf32> to vector<16x128xf32>
    %137 = arith.mulf %136, %63 : vector<16x128xf32>
    %138 = arith.addf %134, %137 : vector<16x128xf32>
    %139 = vector.extract_strided_slice %9 {offsets = [10, 0], sizes = [1, 128], strides = [1, 1]} : vector<16x128xf32> to vector<1x128xf32>
    %140 = vector.broadcast %139 : vector<1x128xf32> to vector<16x128xf32>
    %141 = arith.mulf %140, %69 : vector<16x128xf32>
    %142 = arith.addf %138, %141 : vector<16x128xf32>
    %143 = vector.extract_strided_slice %9 {offsets = [11, 0], sizes = [1, 128], strides = [1, 1]} : vector<16x128xf32> to vector<1x128xf32>
    %144 = vector.broadcast %143 : vector<1x128xf32> to vector<16x128xf32>
    %145 = arith.mulf %144, %75 : vector<16x128xf32>
    %146 = arith.addf %142, %145 : vector<16x128xf32>
    %147 = vector.extract_strided_slice %9 {offsets = [12, 0], sizes = [1, 128], strides = [1, 1]} : vector<16x128xf32> to vector<1x128xf32>
    %148 = vector.broadcast %147 : vector<1x128xf32> to vector<16x128xf32>
    %149 = arith.mulf %148, %81 : vector<16x128xf32>
    %150 = arith.addf %146, %149 : vector<16x128xf32>
    %151 = vector.extract_strided_slice %9 {offsets = [13, 0], sizes = [1, 128], strides = [1, 1]} : vector<16x128xf32> to vector<1x128xf32>
    %152 = vector.broadcast %151 : vector<1x128xf32> to vector<16x128xf32>
    %153 = arith.mulf %152, %87 : vector<16x128xf32>
    %154 = arith.addf %150, %153 : vector<16x128xf32>
    %155 = vector.extract_strided_slice %9 {offsets = [14, 0], sizes = [1, 128], strides = [1, 1]} : vector<16x128xf32> to vector<1x128xf32>
    %156 = vector.broadcast %155 : vector<1x128xf32> to vector<16x128xf32>
    %157 = arith.mulf %156, %93 : vector<16x128xf32>
    %158 = arith.addf %154, %157 : vector<16x128xf32>
    %159 = vector.extract_strided_slice %9 {offsets = [15, 0], sizes = [1, 128], strides = [1, 1]} : vector<16x128xf32> to vector<1x128xf32>
    %160 = vector.broadcast %159 : vector<1x128xf32> to vector<16x128xf32>
    %161 = arith.mulf %160, %99 : vector<16x128xf32>
    %162 = arith.addf %158, %161 : vector<16x128xf32>
    %c0_35 = arith.constant 0 : index
    %c0_36 = arith.constant 0 : index
    %163 = arith.index_cast %3 : i32 to index
    %164 = vector.load %arg4[%c0_35, %c0_36, %163] : memref<16x16x128xf32, #tpu.memory_space<vmem>>, vector<1x16x128xf32>
    %165 = vector.shape_cast %164 : vector<1x16x128xf32> to vector<16x128xf32>
    %166 = vector.shape_cast %162 : vector<16x128xf32> to vector<1x16x128xf32>
    tpu.vector_store %arg4[%c0_35, %c0_36, %163], %166 {strides = array<i32>} : memref<16x16x128xf32, #tpu.memory_space<vmem>>, vector<1x16x128xf32>,
    %167 = vector.extract_strided_slice %15 {offsets = [0, 0], sizes = [1, 128], strides = [1, 1]} : vector<16x128xf32> to vector<1x128xf32>
    %168 = vector.broadcast %167 : vector<1x128xf32> to vector<16x128xf32>
    %169 = arith.mulf %168, %9 : vector<16x128xf32>
    %170 = vector.extract_strided_slice %15 {offsets = [1, 0], sizes = [1, 128], strides = [1, 1]} : vector<16x128xf32> to vector<1x128xf32>
    %171 = vector.broadcast %170 : vector<1x128xf32> to vector<16x128xf32>
    %172 = arith.mulf %171, %15 : vector<16x128xf32>
    %173 = arith.addf %169, %172 : vector<16x128xf32>
    %174 = vector.extract_strided_slice %15 {offsets = [2, 0], sizes = [1, 128], strides = [1, 1]} : vector<16x128xf32> to vector<1x128xf32>
    %175 = vector.broadcast %174 : vector<1x128xf32> to vector<16x128xf32>
    %176 = arith.mulf %175, %21 : vector<16x128xf32>
    %177 = arith.addf %173, %176 : vector<16x128xf32>
    %178 = vector.extract_strided_slice %15 {offsets = [3, 0], sizes = [1, 128], strides = [1, 1]} : vector<16x128xf32> to vector<1x128xf32>
    %179 = vector.broadcast %178 : vector<1x128xf32> to vector<16x128xf32>
    %180 = arith.mulf %179, %27 : vector<16x128xf32>
    %181 = arith.addf %177, %180 : vector<16x128xf32>
    %182 = vector.extract_strided_slice %15 {offsets = [4, 0], sizes = [1, 128], strides = [1, 1]} : vector<16x128xf32> to vector<1x128xf32>
    %183 = vector.broadcast %182 : vector<1x128xf32> to vector<16x128xf32>
    %184 = arith.mulf %183, %33 : vector<16x128xf32>
    %185 = arith.addf %181, %184 : vector<16x128xf32>
    %186 = vector.extract_strided_slice %15 {offsets = [5, 0], sizes = [1, 128], strides = [1, 1]} : vector<16x128xf32> to vector<1x128xf32>
    %187 = vector.broadcast %186 : vector<1x128xf32> to vector<16x128xf32>
    %188 = arith.mulf %187, %39 : vector<16x128xf32>
    %189 = arith.addf %185, %188 : vector<16x128xf32>
    %190 = vector.extract_strided_slice %15 {offsets = [6, 0], sizes = [1, 128], strides = [1, 1]} : vector<16x128xf32> to vector<1x128xf32>
    %191 = vector.broadcast %190 : vector<1x128xf32> to vector<16x128xf32>
    %192 = arith.mulf %191, %45 : vector<16x128xf32>
    %193 = arith.addf %189, %192 : vector<16x128xf32>
    %194 = vector.extract_strided_slice %15 {offsets = [7, 0], sizes = [1, 128], strides = [1, 1]} : vector<16x128xf32> to vector<1x128xf32>
    %195 = vector.broadcast %194 : vector<1x128xf32> to vector<16x128xf32>
    %196 = arith.mulf %195, %51 : vector<16x128xf32>
    %197 = arith.addf %193, %196 : vector<16x128xf32>
    %198 = vector.extract_strided_slice %15 {offsets = [8, 0], sizes = [1, 128], strides = [1, 1]} : vector<16x128xf32> to vector<1x128xf32>
    %199 = vector.broadcast %198 : vector<1x128xf32> to vector<16x128xf32>
    %200 = arith.mulf %199, %57 : vector<16x128xf32>
    %201 = arith.addf %197, %200 : vector<16x128xf32>
    %202 = vector.extract_strided_slice %15 {offsets = [9, 0], sizes = [1, 128], strides = [1, 1]} : vector<16x128xf32> to vector<1x128xf32>
    %203 = vector.broadcast %202 : vector<1x128xf32> to vector<16x128xf32>
    %204 = arith.mulf %203, %63 : vector<16x128xf32>
    %205 = arith.addf %201, %204 : vector<16x128xf32>
    %206 = vector.extract_strided_slice %15 {offsets = [10, 0], sizes = [1, 128], strides = [1, 1]} : vector<16x128xf32> to vector<1x128xf32>
    %207 = vector.broadcast %206 : vector<1x128xf32> to vector<16x128xf32>
    %208 = arith.mulf %207, %69 : vector<16x128xf32>
    %209 = arith.addf %205, %208 : vector<16x128xf32>
    %210 = vector.extract_strided_slice %15 {offsets = [11, 0], sizes = [1, 128], strides = [1, 1]} : vector<16x128xf32> to vector<1x128xf32>
    %211 = vector.broadcast %210 : vector<1x128xf32> to vector<16x128xf32>
    %212 = arith.mulf %211, %75 : vector<16x128xf32>
    %213 = arith.addf %209, %212 : vector<16x128xf32>
    %214 = vector.extract_strided_slice %15 {offsets = [12, 0], sizes = [1, 128], strides = [1, 1]} : vector<16x128xf32> to vector<1x128xf32>
    %215 = vector.broadcast %214 : vector<1x128xf32> to vector<16x128xf32>
    %216 = arith.mulf %215, %81 : vector<16x128xf32>
    %217 = arith.addf %213, %216 : vector<16x128xf32>
    %218 = vector.extract_strided_slice %15 {offsets = [13, 0], sizes = [1, 128], strides = [1, 1]} : vector<16x128xf32> to vector<1x128xf32>
    %219 = vector.broadcast %218 : vector<1x128xf32> to vector<16x128xf32>
    %220 = arith.mulf %219, %87 : vector<16x128xf32>
    %221 = arith.addf %217, %220 : vector<16x128xf32>
    %222 = vector.extract_strided_slice %15 {offsets = [14, 0], sizes = [1, 128], strides = [1, 1]} : vector<16x128xf32> to vector<1x128xf32>
    %223 = vector.broadcast %222 : vector<1x128xf32> to vector<16x128xf32>
    %224 = arith.mulf %223, %93 : vector<16x128xf32>
    %225 = arith.addf %221, %224 : vector<16x128xf32>
    %226 = vector.extract_strided_slice %15 {offsets = [15, 0], sizes = [1, 128], strides = [1, 1]} : vector<16x128xf32> to vector<1x128xf32>
    %227 = vector.broadcast %226 : vector<1x128xf32> to vector<16x128xf32>
    %228 = arith.mulf %227, %99 : vector<16x128xf32>
    %229 = arith.addf %225, %228 : vector<16x128xf32>
    %c1_37 = arith.constant 1 : index
    %c0_38 = arith.constant 0 : index
    %230 = arith.index_cast %3 : i32 to index
    %231 = vector.load %arg4[%c1_37, %c0_38, %230] : memref<16x16x128xf32, #tpu.memory_space<vmem>>, vector<1x16x128xf32>
    %232 = vector.shape_cast %231 : vector<1x16x128xf32> to vector<16x128xf32>
    %233 = vector.shape_cast %229 : vector<16x128xf32> to vector<1x16x128xf32>
    tpu.vector_store %arg4[%c1_37, %c0_38, %230], %233 {strides = array<i32>} : memref<16x16x128xf32, #tpu.memory_space<vmem>>, vector<1x16x128xf32>,
    %234 = vector.extract_strided_slice %21 {offsets = [0, 0], sizes = [1, 128], strides = [1, 1]} : vector<16x128xf32> to vector<1x128xf32>
    %235 = vector.broadcast %234 : vector<1x128xf32> to vector<16x128xf32>
    %236 = arith.mulf %235, %9 : vector<16x128xf32>
    %237 = vector.extract_strided_slice %21 {offsets = [1, 0], sizes = [1, 128], strides = [1, 1]} : vector<16x128xf32> to vector<1x128xf32>
    %238 = vector.broadcast %237 : vector<1x128xf32> to vector<16x128xf32>
    %239 = arith.mulf %238, %15 : vector<16x128xf32>
    %240 = arith.addf %236, %239 : vector<16x128xf32>
    %241 = vector.extract_strided_slice %21 {offsets = [2, 0], sizes = [1, 128], strides = [1, 1]} : vector<16x128xf32> to vector<1x128xf32>
    %242 = vector.broadcast %241 : vector<1x128xf32> to vector<16x128xf32>
    %243 = arith.mulf %242, %21 : vector<16x128xf32>
    %244 = arith.addf %240, %243 : vector<16x128xf32>
    %245 = vector.extract_strided_slice %21 {offsets = [3, 0], sizes = [1, 128], strides = [1, 1]} : vector<16x128xf32> to vector<1x128xf32>
    %246 = vector.broadcast %245 : vector<1x128xf32> to vector<16x128xf32>
    %247 = arith.mulf %246, %27 : vector<16x128xf32>
    %248 = arith.addf %244, %247 : vector<16x128xf32>
    %249 = vector.extract_strided_slice %21 {offsets = [4, 0], sizes = [1, 128], strides = [1, 1]} : vector<16x128xf32> to vector<1x128xf32>
    %250 = vector.broadcast %249 : vector<1x128xf32> to vector<16x128xf32>
    %251 = arith.mulf %250, %33 : vector<16x128xf32>
    %252 = arith.addf %248, %251 : vector<16x128xf32>
    %253 = vector.extract_strided_slice %21 {offsets = [5, 0], sizes = [1, 128], strides = [1, 1]} : vector<16x128xf32> to vector<1x128xf32>
    %254 = vector.broadcast %253 : vector<1x128xf32> to vector<16x128xf32>
    %255 = arith.mulf %254, %39 : vector<16x128xf32>
    %256 = arith.addf %252, %255 : vector<16x128xf32>
    %257 = vector.extract_strided_slice %21 {offsets = [6, 0], sizes = [1, 128], strides = [1, 1]} : vector<16x128xf32> to vector<1x128xf32>
    %258 = vector.broadcast %257 : vector<1x128xf32> to vector<16x128xf32>
    %259 = arith.mulf %258, %45 : vector<16x128xf32>
    %260 = arith.addf %256, %259 : vector<16x128xf32>
    %261 = vector.extract_strided_slice %21 {offsets = [7, 0], sizes = [1, 128], strides = [1, 1]} : vector<16x128xf32> to vector<1x128xf32>
    %262 = vector.broadcast %261 : vector<1x128xf32> to vector<16x128xf32>
    %263 = arith.mulf %262, %51 : vector<16x128xf32>
    %264 = arith.addf %260, %263 : vector<16x128xf32>
    %265 = vector.extract_strided_slice %21 {offsets = [8, 0], sizes = [1, 128], strides = [1, 1]} : vector<16x128xf32> to vector<1x128xf32>
    %266 = vector.broadcast %265 : vector<1x128xf32> to vector<16x128xf32>
    %267 = arith.mulf %266, %57 : vector<16x128xf32>
    %268 = arith.addf %264, %267 : vector<16x128xf32>
    %269 = vector.extract_strided_slice %21 {offsets = [9, 0], sizes = [1, 128], strides = [1, 1]} : vector<16x128xf32> to vector<1x128xf32>
    %270 = vector.broadcast %269 : vector<1x128xf32> to vector<16x128xf32>
    %271 = arith.mulf %270, %63 : vector<16x128xf32>
    %272 = arith.addf %268, %271 : vector<16x128xf32>
    %273 = vector.extract_strided_slice %21 {offsets = [10, 0], sizes = [1, 128], strides = [1, 1]} : vector<16x128xf32> to vector<1x128xf32>
    %274 = vector.broadcast %273 : vector<1x128xf32> to vector<16x128xf32>
    %275 = arith.mulf %274, %69 : vector<16x128xf32>
    %276 = arith.addf %272, %275 : vector<16x128xf32>
    %277 = vector.extract_strided_slice %21 {offsets = [11, 0], sizes = [1, 128], strides = [1, 1]} : vector<16x128xf32> to vector<1x128xf32>
    %278 = vector.broadcast %277 : vector<1x128xf32> to vector<16x128xf32>
    %279 = arith.mulf %278, %75 : vector<16x128xf32>
    %280 = arith.addf %276, %279 : vector<16x128xf32>
    %281 = vector.extract_strided_slice %21 {offsets = [12, 0], sizes = [1, 128], strides = [1, 1]} : vector<16x128xf32> to vector<1x128xf32>
    %282 = vector.broadcast %281 : vector<1x128xf32> to vector<16x128xf32>
    %283 = arith.mulf %282, %81 : vector<16x128xf32>
    %284 = arith.addf %280, %283 : vector<16x128xf32>
    %285 = vector.extract_strided_slice %21 {offsets = [13, 0], sizes = [1, 128], strides = [1, 1]} : vector<16x128xf32> to vector<1x128xf32>
    %286 = vector.broadcast %285 : vector<1x128xf32> to vector<16x128xf32>
    %287 = arith.mulf %286, %87 : vector<16x128xf32>
    %288 = arith.addf %284, %287 : vector<16x128xf32>
    %289 = vector.extract_strided_slice %21 {offsets = [14, 0], sizes = [1, 128], strides = [1, 1]} : vector<16x128xf32> to vector<1x128xf32>
    %290 = vector.broadcast %289 : vector<1x128xf32> to vector<16x128xf32>
    %291 = arith.mulf %290, %93 : vector<16x128xf32>
    %292 = arith.addf %288, %291 : vector<16x128xf32>
    %293 = vector.extract_strided_slice %21 {offsets = [15, 0], sizes = [1, 128], strides = [1, 1]} : vector<16x128xf32> to vector<1x128xf32>
    %294 = vector.broadcast %293 : vector<1x128xf32> to vector<16x128xf32>
    %295 = arith.mulf %294, %99 : vector<16x128xf32>
    %296 = arith.addf %292, %295 : vector<16x128xf32>
    %c2_39 = arith.constant 2 : index
    %c0_40 = arith.constant 0 : index
    %297 = arith.index_cast %3 : i32 to index
    %298 = vector.load %arg4[%c2_39, %c0_40, %297] : memref<16x16x128xf32, #tpu.memory_space<vmem>>, vector<1x16x128xf32>
    %299 = vector.shape_cast %298 : vector<1x16x128xf32> to vector<16x128xf32>
    %300 = vector.shape_cast %296 : vector<16x128xf32> to vector<1x16x128xf32>
    tpu.vector_store %arg4[%c2_39, %c0_40, %297], %300 {strides = array<i32>} : memref<16x16x128xf32, #tpu.memory_space<vmem>>, vector<1x16x128xf32>,
    %301 = vector.extract_strided_slice %27 {offsets = [0, 0], sizes = [1, 128], strides = [1, 1]} : vector<16x128xf32> to vector<1x128xf32>
    %302 = vector.broadcast %301 : vector<1x128xf32> to vector<16x128xf32>
    %303 = arith.mulf %302, %9 : vector<16x128xf32>
    %304 = vector.extract_strided_slice %27 {offsets = [1, 0], sizes = [1, 128], strides = [1, 1]} : vector<16x128xf32> to vector<1x128xf32>
    %305 = vector.broadcast %304 : vector<1x128xf32> to vector<16x128xf32>
    %306 = arith.mulf %305, %15 : vector<16x128xf32>
    %307 = arith.addf %303, %306 : vector<16x128xf32>
    %308 = vector.extract_strided_slice %27 {offsets = [2, 0], sizes = [1, 128], strides = [1, 1]} : vector<16x128xf32> to vector<1x128xf32>
    %309 = vector.broadcast %308 : vector<1x128xf32> to vector<16x128xf32>
    %310 = arith.mulf %309, %21 : vector<16x128xf32>
    %311 = arith.addf %307, %310 : vector<16x128xf32>
    %312 = vector.extract_strided_slice %27 {offsets = [3, 0], sizes = [1, 128], strides = [1, 1]} : vector<16x128xf32> to vector<1x128xf32>
    %313 = vector.broadcast %312 : vector<1x128xf32> to vector<16x128xf32>
    %314 = arith.mulf %313, %27 : vector<16x128xf32>
    %315 = arith.addf %311, %314 : vector<16x128xf32>
    %316 = vector.extract_strided_slice %27 {offsets = [4, 0], sizes = [1, 128], strides = [1, 1]} : vector<16x128xf32> to vector<1x128xf32>
    %317 = vector.broadcast %316 : vector<1x128xf32> to vector<16x128xf32>
    %318 = arith.mulf %317, %33 : vector<16x128xf32>
    %319 = arith.addf %315, %318 : vector<16x128xf32>
    %320 = vector.extract_strided_slice %27 {offsets = [5, 0], sizes = [1, 128], strides = [1, 1]} : vector<16x128xf32> to vector<1x128xf32>
    %321 = vector.broadcast %320 : vector<1x128xf32> to vector<16x128xf32>
    %322 = arith.mulf %321, %39 : vector<16x128xf32>
    %323 = arith.addf %319, %322 : vector<16x128xf32>
    %324 = vector.extract_strided_slice %27 {offsets = [6, 0], sizes = [1, 128], strides = [1, 1]} : vector<16x128xf32> to vector<1x128xf32>
    %325 = vector.broadcast %324 : vector<1x128xf32> to vector<16x128xf32>
    %326 = arith.mulf %325, %45 : vector<16x128xf32>
    %327 = arith.addf %323, %326 : vector<16x128xf32>
    %328 = vector.extract_strided_slice %27 {offsets = [7, 0], sizes = [1, 128], strides = [1, 1]} : vector<16x128xf32> to vector<1x128xf32>
    %329 = vector.broadcast %328 : vector<1x128xf32> to vector<16x128xf32>
    %330 = arith.mulf %329, %51 : vector<16x128xf32>
    %331 = arith.addf %327, %330 : vector<16x128xf32>
    %332 = vector.extract_strided_slice %27 {offsets = [8, 0], sizes = [1, 128], strides = [1, 1]} : vector<16x128xf32> to vector<1x128xf32>
    %333 = vector.broadcast %332 : vector<1x128xf32> to vector<16x128xf32>
    %334 = arith.mulf %333, %57 : vector<16x128xf32>
    %335 = arith.addf %331, %334 : vector<16x128xf32>
    %336 = vector.extract_strided_slice %27 {offsets = [9, 0], sizes = [1, 128], strides = [1, 1]} : vector<16x128xf32> to vector<1x128xf32>
    %337 = vector.broadcast %336 : vector<1x128xf32> to vector<16x128xf32>
    %338 = arith.mulf %337, %63 : vector<16x128xf32>
    %339 = arith.addf %335, %338 : vector<16x128xf32>
    %340 = vector.extract_strided_slice %27 {offsets = [10, 0], sizes = [1, 128], strides = [1, 1]} : vector<16x128xf32> to vector<1x128xf32>
    %341 = vector.broadcast %340 : vector<1x128xf32> to vector<16x128xf32>
    %342 = arith.mulf %341, %69 : vector<16x128xf32>
    %343 = arith.addf %339, %342 : vector<16x128xf32>
    %344 = vector.extract_strided_slice %27 {offsets = [11, 0], sizes = [1, 128], strides = [1, 1]} : vector<16x128xf32> to vector<1x128xf32>
    %345 = vector.broadcast %344 : vector<1x128xf32> to vector<16x128xf32>
    %346 = arith.mulf %345, %75 : vector<16x128xf32>
    %347 = arith.addf %343, %346 : vector<16x128xf32>
    %348 = vector.extract_strided_slice %27 {offsets = [12, 0], sizes = [1, 128], strides = [1, 1]} : vector<16x128xf32> to vector<1x128xf32>
    %349 = vector.broadcast %348 : vector<1x128xf32> to vector<16x128xf32>
    %350 = arith.mulf %349, %81 : vector<16x128xf32>
    %351 = arith.addf %347, %350 : vector<16x128xf32>
    %352 = vector.extract_strided_slice %27 {offsets = [13, 0], sizes = [1, 128], strides = [1, 1]} : vector<16x128xf32> to vector<1x128xf32>
    %353 = vector.broadcast %352 : vector<1x128xf32> to vector<16x128xf32>
    %354 = arith.mulf %353, %87 : vector<16x128xf32>
    %355 = arith.addf %351, %354 : vector<16x128xf32>
    %356 = vector.extract_strided_slice %27 {offsets = [14, 0], sizes = [1, 128], strides = [1, 1]} : vector<16x128xf32> to vector<1x128xf32>
    %357 = vector.broadcast %356 : vector<1x128xf32> to vector<16x128xf32>
    %358 = arith.mulf %357, %93 : vector<16x128xf32>
    %359 = arith.addf %355, %358 : vector<16x128xf32>
    %360 = vector.extract_strided_slice %27 {offsets = [15, 0], sizes = [1, 128], strides = [1, 1]} : vector<16x128xf32> to vector<1x128xf32>
    %361 = vector.broadcast %360 : vector<1x128xf32> to vector<16x128xf32>
    %362 = arith.mulf %361, %99 : vector<16x128xf32>
    %363 = arith.addf %359, %362 : vector<16x128xf32>
    %c3_41 = arith.constant 3 : index
    %c0_42 = arith.constant 0 : index
    %364 = arith.index_cast %3 : i32 to index
    %365 = vector.load %arg4[%c3_41, %c0_42, %364] : memref<16x16x128xf32, #tpu.memory_space<vmem>>, vector<1x16x128xf32>
    %366 = vector.shape_cast %365 : vector<1x16x128xf32> to vector<16x128xf32>
    %367 = vector.shape_cast %363 : vector<16x128xf32> to vector<1x16x128xf32>
    tpu.vector_store %arg4[%c3_41, %c0_42, %364], %367 {strides = array<i32>} : memref<16x16x128xf32, #tpu.memory_space<vmem>>, vector<1x16x128xf32>,
    %368 = vector.extract_strided_slice %33 {offsets = [0, 0], sizes = [1, 128], strides = [1, 1]} : vector<16x128xf32> to vector<1x128xf32>
    %369 = vector.broadcast %368 : vector<1x128xf32> to vector<16x128xf32>
    %370 = arith.mulf %369, %9 : vector<16x128xf32>
    %371 = vector.extract_strided_slice %33 {offsets = [1, 0], sizes = [1, 128], strides = [1, 1]} : vector<16x128xf32> to vector<1x128xf32>
    %372 = vector.broadcast %371 : vector<1x128xf32> to vector<16x128xf32>
    %373 = arith.mulf %372, %15 : vector<16x128xf32>
    %374 = arith.addf %370, %373 : vector<16x128xf32>
    %375 = vector.extract_strided_slice %33 {offsets = [2, 0], sizes = [1, 128], strides = [1, 1]} : vector<16x128xf32> to vector<1x128xf32>
    %376 = vector.broadcast %375 : vector<1x128xf32> to vector<16x128xf32>
    %377 = arith.mulf %376, %21 : vector<16x128xf32>
    %378 = arith.addf %374, %377 : vector<16x128xf32>
    %379 = vector.extract_strided_slice %33 {offsets = [3, 0], sizes = [1, 128], strides = [1, 1]} : vector<16x128xf32> to vector<1x128xf32>
    %380 = vector.broadcast %379 : vector<1x128xf32> to vector<16x128xf32>
    %381 = arith.mulf %380, %27 : vector<16x128xf32>
    %382 = arith.addf %378, %381 : vector<16x128xf32>
    %383 = vector.extract_strided_slice %33 {offsets = [4, 0], sizes = [1, 128], strides = [1, 1]} : vector<16x128xf32> to vector<1x128xf32>
    %384 = vector.broadcast %383 : vector<1x128xf32> to vector<16x128xf32>
    %385 = arith.mulf %384, %33 : vector<16x128xf32>
    %386 = arith.addf %382, %385 : vector<16x128xf32>
    %387 = vector.extract_strided_slice %33 {offsets = [5, 0], sizes = [1, 128], strides = [1, 1]} : vector<16x128xf32> to vector<1x128xf32>
    %388 = vector.broadcast %387 : vector<1x128xf32> to vector<16x128xf32>
    %389 = arith.mulf %388, %39 : vector<16x128xf32>
    %390 = arith.addf %386, %389 : vector<16x128xf32>
    %391 = vector.extract_strided_slice %33 {offsets = [6, 0], sizes = [1, 128], strides = [1, 1]} : vector<16x128xf32> to vector<1x128xf32>
    %392 = vector.broadcast %391 : vector<1x128xf32> to vector<16x128xf32>
    %393 = arith.mulf %392, %45 : vector<16x128xf32>
    %394 = arith.addf %390, %393 : vector<16x128xf32>
    %395 = vector.extract_strided_slice %33 {offsets = [7, 0], sizes = [1, 128], strides = [1, 1]} : vector<16x128xf32> to vector<1x128xf32>
    %396 = vector.broadcast %395 : vector<1x128xf32> to vector<16x128xf32>
    %397 = arith.mulf %396, %51 : vector<16x128xf32>
    %398 = arith.addf %394, %397 : vector<16x128xf32>
    %399 = vector.extract_strided_slice %33 {offsets = [8, 0], sizes = [1, 128], strides = [1, 1]} : vector<16x128xf32> to vector<1x128xf32>
    %400 = vector.broadcast %399 : vector<1x128xf32> to vector<16x128xf32>
    %401 = arith.mulf %400, %57 : vector<16x128xf32>
    %402 = arith.addf %398, %401 : vector<16x128xf32>
    %403 = vector.extract_strided_slice %33 {offsets = [9, 0], sizes = [1, 128], strides = [1, 1]} : vector<16x128xf32> to vector<1x128xf32>
    %404 = vector.broadcast %403 : vector<1x128xf32> to vector<16x128xf32>
    %405 = arith.mulf %404, %63 : vector<16x128xf32>
    %406 = arith.addf %402, %405 : vector<16x128xf32>
    %407 = vector.extract_strided_slice %33 {offsets = [10, 0], sizes = [1, 128], strides = [1, 1]} : vector<16x128xf32> to vector<1x128xf32>
    %408 = vector.broadcast %407 : vector<1x128xf32> to vector<16x128xf32>
    %409 = arith.mulf %408, %69 : vector<16x128xf32>
    %410 = arith.addf %406, %409 : vector<16x128xf32>
    %411 = vector.extract_strided_slice %33 {offsets = [11, 0], sizes = [1, 128], strides = [1, 1]} : vector<16x128xf32> to vector<1x128xf32>
    %412 = vector.broadcast %411 : vector<1x128xf32> to vector<16x128xf32>
    %413 = arith.mulf %412, %75 : vector<16x128xf32>
    %414 = arith.addf %410, %413 : vector<16x128xf32>
    %415 = vector.extract_strided_slice %33 {offsets = [12, 0], sizes = [1, 128], strides = [1, 1]} : vector<16x128xf32> to vector<1x128xf32>
    %416 = vector.broadcast %415 : vector<1x128xf32> to vector<16x128xf32>
    %417 = arith.mulf %416, %81 : vector<16x128xf32>
    %418 = arith.addf %414, %417 : vector<16x128xf32>
    %419 = vector.extract_strided_slice %33 {offsets = [13, 0], sizes = [1, 128], strides = [1, 1]} : vector<16x128xf32> to vector<1x128xf32>
    %420 = vector.broadcast %419 : vector<1x128xf32> to vector<16x128xf32>
    %421 = arith.mulf %420, %87 : vector<16x128xf32>
    %422 = arith.addf %418, %421 : vector<16x128xf32>
    %423 = vector.extract_strided_slice %33 {offsets = [14, 0], sizes = [1, 128], strides = [1, 1]} : vector<16x128xf32> to vector<1x128xf32>
    %424 = vector.broadcast %423 : vector<1x128xf32> to vector<16x128xf32>
    %425 = arith.mulf %424, %93 : vector<16x128xf32>
    %426 = arith.addf %422, %425 : vector<16x128xf32>
    %427 = vector.extract_strided_slice %33 {offsets = [15, 0], sizes = [1, 128], strides = [1, 1]} : vector<16x128xf32> to vector<1x128xf32>
    %428 = vector.broadcast %427 : vector<1x128xf32> to vector<16x128xf32>
    %429 = arith.mulf %428, %99 : vector<16x128xf32>
    %430 = arith.addf %426, %429 : vector<16x128xf32>
    %c4_43 = arith.constant 4 : index
    %c0_44 = arith.constant 0 : index
    %431 = arith.index_cast %3 : i32 to index
    %432 = vector.load %arg4[%c4_43, %c0_44, %431] : memref<16x16x128xf32, #tpu.memory_space<vmem>>, vector<1x16x128xf32>
    %433 = vector.shape_cast %432 : vector<1x16x128xf32> to vector<16x128xf32>
    %434 = vector.shape_cast %430 : vector<16x128xf32> to vector<1x16x128xf32>
    tpu.vector_store %arg4[%c4_43, %c0_44, %431], %434 {strides = array<i32>} : memref<16x16x128xf32, #tpu.memory_space<vmem>>, vector<1x16x128xf32>,
    %435 = vector.extract_strided_slice %39 {offsets = [0, 0], sizes = [1, 128], strides = [1, 1]} : vector<16x128xf32> to vector<1x128xf32>
    %436 = vector.broadcast %435 : vector<1x128xf32> to vector<16x128xf32>
    %437 = arith.mulf %436, %9 : vector<16x128xf32>
    %438 = vector.extract_strided_slice %39 {offsets = [1, 0], sizes = [1, 128], strides = [1, 1]} : vector<16x128xf32> to vector<1x128xf32>
    %439 = vector.broadcast %438 : vector<1x128xf32> to vector<16x128xf32>
    %440 = arith.mulf %439, %15 : vector<16x128xf32>
    %441 = arith.addf %437, %440 : vector<16x128xf32>
    %442 = vector.extract_strided_slice %39 {offsets = [2, 0], sizes = [1, 128], strides = [1, 1]} : vector<16x128xf32> to vector<1x128xf32>
    %443 = vector.broadcast %442 : vector<1x128xf32> to vector<16x128xf32>
    %444 = arith.mulf %443, %21 : vector<16x128xf32>
    %445 = arith.addf %441, %444 : vector<16x128xf32>
    %446 = vector.extract_strided_slice %39 {offsets = [3, 0], sizes = [1, 128], strides = [1, 1]} : vector<16x128xf32> to vector<1x128xf32>
    %447 = vector.broadcast %446 : vector<1x128xf32> to vector<16x128xf32>
    %448 = arith.mulf %447, %27 : vector<16x128xf32>
    %449 = arith.addf %445, %448 : vector<16x128xf32>
    %450 = vector.extract_strided_slice %39 {offsets = [4, 0], sizes = [1, 128], strides = [1, 1]} : vector<16x128xf32> to vector<1x128xf32>
    %451 = vector.broadcast %450 : vector<1x128xf32> to vector<16x128xf32>
    %452 = arith.mulf %451, %33 : vector<16x128xf32>
    %453 = arith.addf %449, %452 : vector<16x128xf32>
    %454 = vector.extract_strided_slice %39 {offsets = [5, 0], sizes = [1, 128], strides = [1, 1]} : vector<16x128xf32> to vector<1x128xf32>
    %455 = vector.broadcast %454 : vector<1x128xf32> to vector<16x128xf32>
    %456 = arith.mulf %455, %39 : vector<16x128xf32>
    %457 = arith.addf %453, %456 : vector<16x128xf32>
    %458 = vector.extract_strided_slice %39 {offsets = [6, 0], sizes = [1, 128], strides = [1, 1]} : vector<16x128xf32> to vector<1x128xf32>
    %459 = vector.broadcast %458 : vector<1x128xf32> to vector<16x128xf32>
    %460 = arith.mulf %459, %45 : vector<16x128xf32>
    %461 = arith.addf %457, %460 : vector<16x128xf32>
    %462 = vector.extract_strided_slice %39 {offsets = [7, 0], sizes = [1, 128], strides = [1, 1]} : vector<16x128xf32> to vector<1x128xf32>
    %463 = vector.broadcast %462 : vector<1x128xf32> to vector<16x128xf32>
    %464 = arith.mulf %463, %51 : vector<16x128xf32>
    %465 = arith.addf %461, %464 : vector<16x128xf32>
    %466 = vector.extract_strided_slice %39 {offsets = [8, 0], sizes = [1, 128], strides = [1, 1]} : vector<16x128xf32> to vector<1x128xf32>
    %467 = vector.broadcast %466 : vector<1x128xf32> to vector<16x128xf32>
    %468 = arith.mulf %467, %57 : vector<16x128xf32>
    %469 = arith.addf %465, %468 : vector<16x128xf32>
    %470 = vector.extract_strided_slice %39 {offsets = [9, 0], sizes = [1, 128], strides = [1, 1]} : vector<16x128xf32> to vector<1x128xf32>
    %471 = vector.broadcast %470 : vector<1x128xf32> to vector<16x128xf32>
    %472 = arith.mulf %471, %63 : vector<16x128xf32>
    %473 = arith.addf %469, %472 : vector<16x128xf32>
    %474 = vector.extract_strided_slice %39 {offsets = [10, 0], sizes = [1, 128], strides = [1, 1]} : vector<16x128xf32> to vector<1x128xf32>
    %475 = vector.broadcast %474 : vector<1x128xf32> to vector<16x128xf32>
    %476 = arith.mulf %475, %69 : vector<16x128xf32>
    %477 = arith.addf %473, %476 : vector<16x128xf32>
    %478 = vector.extract_strided_slice %39 {offsets = [11, 0], sizes = [1, 128], strides = [1, 1]} : vector<16x128xf32> to vector<1x128xf32>
    %479 = vector.broadcast %478 : vector<1x128xf32> to vector<16x128xf32>
    %480 = arith.mulf %479, %75 : vector<16x128xf32>
    %481 = arith.addf %477, %480 : vector<16x128xf32>
    %482 = vector.extract_strided_slice %39 {offsets = [12, 0], sizes = [1, 128], strides = [1, 1]} : vector<16x128xf32> to vector<1x128xf32>
    %483 = vector.broadcast %482 : vector<1x128xf32> to vector<16x128xf32>
    %484 = arith.mulf %483, %81 : vector<16x128xf32>
    %485 = arith.addf %481, %484 : vector<16x128xf32>
    %486 = vector.extract_strided_slice %39 {offsets = [13, 0], sizes = [1, 128], strides = [1, 1]} : vector<16x128xf32> to vector<1x128xf32>
    %487 = vector.broadcast %486 : vector<1x128xf32> to vector<16x128xf32>
    %488 = arith.mulf %487, %87 : vector<16x128xf32>
    %489 = arith.addf %485, %488 : vector<16x128xf32>
    %490 = vector.extract_strided_slice %39 {offsets = [14, 0], sizes = [1, 128], strides = [1, 1]} : vector<16x128xf32> to vector<1x128xf32>
    %491 = vector.broadcast %490 : vector<1x128xf32> to vector<16x128xf32>
    %492 = arith.mulf %491, %93 : vector<16x128xf32>
    %493 = arith.addf %489, %492 : vector<16x128xf32>
    %494 = vector.extract_strided_slice %39 {offsets = [15, 0], sizes = [1, 128], strides = [1, 1]} : vector<16x128xf32> to vector<1x128xf32>
    %495 = vector.broadcast %494 : vector<1x128xf32> to vector<16x128xf32>
    %496 = arith.mulf %495, %99 : vector<16x128xf32>
    %497 = arith.addf %493, %496 : vector<16x128xf32>
    %c5_45 = arith.constant 5 : index
    %c0_46 = arith.constant 0 : index
    %498 = arith.index_cast %3 : i32 to index
    %499 = vector.load %arg4[%c5_45, %c0_46, %498] : memref<16x16x128xf32, #tpu.memory_space<vmem>>, vector<1x16x128xf32>
    %500 = vector.shape_cast %499 : vector<1x16x128xf32> to vector<16x128xf32>
    %501 = vector.shape_cast %497 : vector<16x128xf32> to vector<1x16x128xf32>
    tpu.vector_store %arg4[%c5_45, %c0_46, %498], %501 {strides = array<i32>} : memref<16x16x128xf32, #tpu.memory_space<vmem>>, vector<1x16x128xf32>,
    %502 = vector.extract_strided_slice %45 {offsets = [0, 0], sizes = [1, 128], strides = [1, 1]} : vector<16x128xf32> to vector<1x128xf32>
    %503 = vector.broadcast %502 : vector<1x128xf32> to vector<16x128xf32>
    %504 = arith.mulf %503, %9 : vector<16x128xf32>
    %505 = vector.extract_strided_slice %45 {offsets = [1, 0], sizes = [1, 128], strides = [1, 1]} : vector<16x128xf32> to vector<1x128xf32>
    %506 = vector.broadcast %505 : vector<1x128xf32> to vector<16x128xf32>
    %507 = arith.mulf %506, %15 : vector<16x128xf32>
    %508 = arith.addf %504, %507 : vector<16x128xf32>
    %509 = vector.extract_strided_slice %45 {offsets = [2, 0], sizes = [1, 128], strides = [1, 1]} : vector<16x128xf32> to vector<1x128xf32>
    %510 = vector.broadcast %509 : vector<1x128xf32> to vector<16x128xf32>
    %511 = arith.mulf %510, %21 : vector<16x128xf32>
    %512 = arith.addf %508, %511 : vector<16x128xf32>
    %513 = vector.extract_strided_slice %45 {offsets = [3, 0], sizes = [1, 128], strides = [1, 1]} : vector<16x128xf32> to vector<1x128xf32>
    %514 = vector.broadcast %513 : vector<1x128xf32> to vector<16x128xf32>
    %515 = arith.mulf %514, %27 : vector<16x128xf32>
    %516 = arith.addf %512, %515 : vector<16x128xf32>
    %517 = vector.extract_strided_slice %45 {offsets = [4, 0], sizes = [1, 128], strides = [1, 1]} : vector<16x128xf32> to vector<1x128xf32>
    %518 = vector.broadcast %517 : vector<1x128xf32> to vector<16x128xf32>
    %519 = arith.mulf %518, %33 : vector<16x128xf32>
    %520 = arith.addf %516, %519 : vector<16x128xf32>
    %521 = vector.extract_strided_slice %45 {offsets = [5, 0], sizes = [1, 128], strides = [1, 1]} : vector<16x128xf32> to vector<1x128xf32>
    %522 = vector.broadcast %521 : vector<1x128xf32> to vector<16x128xf32>
    %523 = arith.mulf %522, %39 : vector<16x128xf32>
    %524 = arith.addf %520, %523 : vector<16x128xf32>
    %525 = vector.extract_strided_slice %45 {offsets = [6, 0], sizes = [1, 128], strides = [1, 1]} : vector<16x128xf32> to vector<1x128xf32>
    %526 = vector.broadcast %525 : vector<1x128xf32> to vector<16x128xf32>
    %527 = arith.mulf %526, %45 : vector<16x128xf32>
    %528 = arith.addf %524, %527 : vector<16x128xf32>
    %529 = vector.extract_strided_slice %45 {offsets = [7, 0], sizes = [1, 128], strides = [1, 1]} : vector<16x128xf32> to vector<1x128xf32>
    %530 = vector.broadcast %529 : vector<1x128xf32> to vector<16x128xf32>
    %531 = arith.mulf %530, %51 : vector<16x128xf32>
    %532 = arith.addf %528, %531 : vector<16x128xf32>
    %533 = vector.extract_strided_slice %45 {offsets = [8, 0], sizes = [1, 128], strides = [1, 1]} : vector<16x128xf32> to vector<1x128xf32>
    %534 = vector.broadcast %533 : vector<1x128xf32> to vector<16x128xf32>
    %535 = arith.mulf %534, %57 : vector<16x128xf32>
    %536 = arith.addf %532, %535 : vector<16x128xf32>
    %537 = vector.extract_strided_slice %45 {offsets = [9, 0], sizes = [1, 128], strides = [1, 1]} : vector<16x128xf32> to vector<1x128xf32>
    %538 = vector.broadcast %537 : vector<1x128xf32> to vector<16x128xf32>
    %539 = arith.mulf %538, %63 : vector<16x128xf32>
    %540 = arith.addf %536, %539 : vector<16x128xf32>
    %541 = vector.extract_strided_slice %45 {offsets = [10, 0], sizes = [1, 128], strides = [1, 1]} : vector<16x128xf32> to vector<1x128xf32>
    %542 = vector.broadcast %541 : vector<1x128xf32> to vector<16x128xf32>
    %543 = arith.mulf %542, %69 : vector<16x128xf32>
    %544 = arith.addf %540, %543 : vector<16x128xf32>
    %545 = vector.extract_strided_slice %45 {offsets = [11, 0], sizes = [1, 128], strides = [1, 1]} : vector<16x128xf32> to vector<1x128xf32>
    %546 = vector.broadcast %545 : vector<1x128xf32> to vector<16x128xf32>
    %547 = arith.mulf %546, %75 : vector<16x128xf32>
    %548 = arith.addf %544, %547 : vector<16x128xf32>
    %549 = vector.extract_strided_slice %45 {offsets = [12, 0], sizes = [1, 128], strides = [1, 1]} : vector<16x128xf32> to vector<1x128xf32>
    %550 = vector.broadcast %549 : vector<1x128xf32> to vector<16x128xf32>
    %551 = arith.mulf %550, %81 : vector<16x128xf32>
    %552 = arith.addf %548, %551 : vector<16x128xf32>
    %553 = vector.extract_strided_slice %45 {offsets = [13, 0], sizes = [1, 128], strides = [1, 1]} : vector<16x128xf32> to vector<1x128xf32>
    %554 = vector.broadcast %553 : vector<1x128xf32> to vector<16x128xf32>
    %555 = arith.mulf %554, %87 : vector<16x128xf32>
    %556 = arith.addf %552, %555 : vector<16x128xf32>
    %557 = vector.extract_strided_slice %45 {offsets = [14, 0], sizes = [1, 128], strides = [1, 1]} : vector<16x128xf32> to vector<1x128xf32>
    %558 = vector.broadcast %557 : vector<1x128xf32> to vector<16x128xf32>
    %559 = arith.mulf %558, %93 : vector<16x128xf32>
    %560 = arith.addf %556, %559 : vector<16x128xf32>
    %561 = vector.extract_strided_slice %45 {offsets = [15, 0], sizes = [1, 128], strides = [1, 1]} : vector<16x128xf32> to vector<1x128xf32>
    %562 = vector.broadcast %561 : vector<1x128xf32> to vector<16x128xf32>
    %563 = arith.mulf %562, %99 : vector<16x128xf32>
    %564 = arith.addf %560, %563 : vector<16x128xf32>
    %c6_47 = arith.constant 6 : index
    %c0_48 = arith.constant 0 : index
    %565 = arith.index_cast %3 : i32 to index
    %566 = vector.load %arg4[%c6_47, %c0_48, %565] : memref<16x16x128xf32, #tpu.memory_space<vmem>>, vector<1x16x128xf32>
    %567 = vector.shape_cast %566 : vector<1x16x128xf32> to vector<16x128xf32>
    %568 = vector.shape_cast %564 : vector<16x128xf32> to vector<1x16x128xf32>
    tpu.vector_store %arg4[%c6_47, %c0_48, %565], %568 {strides = array<i32>} : memref<16x16x128xf32, #tpu.memory_space<vmem>>, vector<1x16x128xf32>,
    %569 = vector.extract_strided_slice %51 {offsets = [0, 0], sizes = [1, 128], strides = [1, 1]} : vector<16x128xf32> to vector<1x128xf32>
    %570 = vector.broadcast %569 : vector<1x128xf32> to vector<16x128xf32>
    %571 = arith.mulf %570, %9 : vector<16x128xf32>
    %572 = vector.extract_strided_slice %51 {offsets = [1, 0], sizes = [1, 128], strides = [1, 1]} : vector<16x128xf32> to vector<1x128xf32>
    %573 = vector.broadcast %572 : vector<1x128xf32> to vector<16x128xf32>
    %574 = arith.mulf %573, %15 : vector<16x128xf32>
    %575 = arith.addf %571, %574 : vector<16x128xf32>
    %576 = vector.extract_strided_slice %51 {offsets = [2, 0], sizes = [1, 128], strides = [1, 1]} : vector<16x128xf32> to vector<1x128xf32>
    %577 = vector.broadcast %576 : vector<1x128xf32> to vector<16x128xf32>
    %578 = arith.mulf %577, %21 : vector<16x128xf32>
    %579 = arith.addf %575, %578 : vector<16x128xf32>
    %580 = vector.extract_strided_slice %51 {offsets = [3, 0], sizes = [1, 128], strides = [1, 1]} : vector<16x128xf32> to vector<1x128xf32>
    %581 = vector.broadcast %580 : vector<1x128xf32> to vector<16x128xf32>
    %582 = arith.mulf %581, %27 : vector<16x128xf32>
    %583 = arith.addf %579, %582 : vector<16x128xf32>
    %584 = vector.extract_strided_slice %51 {offsets = [4, 0], sizes = [1, 128], strides = [1, 1]} : vector<16x128xf32> to vector<1x128xf32>
    %585 = vector.broadcast %584 : vector<1x128xf32> to vector<16x128xf32>
    %586 = arith.mulf %585, %33 : vector<16x128xf32>
    %587 = arith.addf %583, %586 : vector<16x128xf32>
    %588 = vector.extract_strided_slice %51 {offsets = [5, 0], sizes = [1, 128], strides = [1, 1]} : vector<16x128xf32> to vector<1x128xf32>
    %589 = vector.broadcast %588 : vector<1x128xf32> to vector<16x128xf32>
    %590 = arith.mulf %589, %39 : vector<16x128xf32>
    %591 = arith.addf %587, %590 : vector<16x128xf32>
    %592 = vector.extract_strided_slice %51 {offsets = [6, 0], sizes = [1, 128], strides = [1, 1]} : vector<16x128xf32> to vector<1x128xf32>
    %593 = vector.broadcast %592 : vector<1x128xf32> to vector<16x128xf32>
    %594 = arith.mulf %593, %45 : vector<16x128xf32>
    %595 = arith.addf %591, %594 : vector<16x128xf32>
    %596 = vector.extract_strided_slice %51 {offsets = [7, 0], sizes = [1, 128], strides = [1, 1]} : vector<16x128xf32> to vector<1x128xf32>
    %597 = vector.broadcast %596 : vector<1x128xf32> to vector<16x128xf32>
    %598 = arith.mulf %597, %51 : vector<16x128xf32>
    %599 = arith.addf %595, %598 : vector<16x128xf32>
    %600 = vector.extract_strided_slice %51 {offsets = [8, 0], sizes = [1, 128], strides = [1, 1]} : vector<16x128xf32> to vector<1x128xf32>
    %601 = vector.broadcast %600 : vector<1x128xf32> to vector<16x128xf32>
    %602 = arith.mulf %601, %57 : vector<16x128xf32>
    %603 = arith.addf %599, %602 : vector<16x128xf32>
    %604 = vector.extract_strided_slice %51 {offsets = [9, 0], sizes = [1, 128], strides = [1, 1]} : vector<16x128xf32> to vector<1x128xf32>
    %605 = vector.broadcast %604 : vector<1x128xf32> to vector<16x128xf32>
    %606 = arith.mulf %605, %63 : vector<16x128xf32>
    %607 = arith.addf %603, %606 : vector<16x128xf32>
    %608 = vector.extract_strided_slice %51 {offsets = [10, 0], sizes = [1, 128], strides = [1, 1]} : vector<16x128xf32> to vector<1x128xf32>
    %609 = vector.broadcast %608 : vector<1x128xf32> to vector<16x128xf32>
    %610 = arith.mulf %609, %69 : vector<16x128xf32>
    %611 = arith.addf %607, %610 : vector<16x128xf32>
    %612 = vector.extract_strided_slice %51 {offsets = [11, 0], sizes = [1, 128], strides = [1, 1]} : vector<16x128xf32> to vector<1x128xf32>
    %613 = vector.broadcast %612 : vector<1x128xf32> to vector<16x128xf32>
    %614 = arith.mulf %613, %75 : vector<16x128xf32>
    %615 = arith.addf %611, %614 : vector<16x128xf32>
    %616 = vector.extract_strided_slice %51 {offsets = [12, 0], sizes = [1, 128], strides = [1, 1]} : vector<16x128xf32> to vector<1x128xf32>
    %617 = vector.broadcast %616 : vector<1x128xf32> to vector<16x128xf32>
    %618 = arith.mulf %617, %81 : vector<16x128xf32>
    %619 = arith.addf %615, %618 : vector<16x128xf32>
    %620 = vector.extract_strided_slice %51 {offsets = [13, 0], sizes = [1, 128], strides = [1, 1]} : vector<16x128xf32> to vector<1x128xf32>
    %621 = vector.broadcast %620 : vector<1x128xf32> to vector<16x128xf32>
    %622 = arith.mulf %621, %87 : vector<16x128xf32>
    %623 = arith.addf %619, %622 : vector<16x128xf32>
    %624 = vector.extract_strided_slice %51 {offsets = [14, 0], sizes = [1, 128], strides = [1, 1]} : vector<16x128xf32> to vector<1x128xf32>
    %625 = vector.broadcast %624 : vector<1x128xf32> to vector<16x128xf32>
    %626 = arith.mulf %625, %93 : vector<16x128xf32>
    %627 = arith.addf %623, %626 : vector<16x128xf32>
    %628 = vector.extract_strided_slice %51 {offsets = [15, 0], sizes = [1, 128], strides = [1, 1]} : vector<16x128xf32> to vector<1x128xf32>
    %629 = vector.broadcast %628 : vector<1x128xf32> to vector<16x128xf32>
    %630 = arith.mulf %629, %99 : vector<16x128xf32>
    %631 = arith.addf %627, %630 : vector<16x128xf32>
    %c7_49 = arith.constant 7 : index
    %c0_50 = arith.constant 0 : index
    %632 = arith.index_cast %3 : i32 to index
    %633 = vector.load %arg4[%c7_49, %c0_50, %632] : memref<16x16x128xf32, #tpu.memory_space<vmem>>, vector<1x16x128xf32>
    %634 = vector.shape_cast %633 : vector<1x16x128xf32> to vector<16x128xf32>
    %635 = vector.shape_cast %631 : vector<16x128xf32> to vector<1x16x128xf32>
    tpu.vector_store %arg4[%c7_49, %c0_50, %632], %635 {strides = array<i32>} : memref<16x16x128xf32, #tpu.memory_space<vmem>>, vector<1x16x128xf32>,
    %636 = vector.extract_strided_slice %57 {offsets = [0, 0], sizes = [1, 128], strides = [1, 1]} : vector<16x128xf32> to vector<1x128xf32>
    %637 = vector.broadcast %636 : vector<1x128xf32> to vector<16x128xf32>
    %638 = arith.mulf %637, %9 : vector<16x128xf32>
    %639 = vector.extract_strided_slice %57 {offsets = [1, 0], sizes = [1, 128], strides = [1, 1]} : vector<16x128xf32> to vector<1x128xf32>
    %640 = vector.broadcast %639 : vector<1x128xf32> to vector<16x128xf32>
    %641 = arith.mulf %640, %15 : vector<16x128xf32>
    %642 = arith.addf %638, %641 : vector<16x128xf32>
    %643 = vector.extract_strided_slice %57 {offsets = [2, 0], sizes = [1, 128], strides = [1, 1]} : vector<16x128xf32> to vector<1x128xf32>
    %644 = vector.broadcast %643 : vector<1x128xf32> to vector<16x128xf32>
    %645 = arith.mulf %644, %21 : vector<16x128xf32>
    %646 = arith.addf %642, %645 : vector<16x128xf32>
    %647 = vector.extract_strided_slice %57 {offsets = [3, 0], sizes = [1, 128], strides = [1, 1]} : vector<16x128xf32> to vector<1x128xf32>
    %648 = vector.broadcast %647 : vector<1x128xf32> to vector<16x128xf32>
    %649 = arith.mulf %648, %27 : vector<16x128xf32>
    %650 = arith.addf %646, %649 : vector<16x128xf32>
    %651 = vector.extract_strided_slice %57 {offsets = [4, 0], sizes = [1, 128], strides = [1, 1]} : vector<16x128xf32> to vector<1x128xf32>
    %652 = vector.broadcast %651 : vector<1x128xf32> to vector<16x128xf32>
    %653 = arith.mulf %652, %33 : vector<16x128xf32>
    %654 = arith.addf %650, %653 : vector<16x128xf32>
    %655 = vector.extract_strided_slice %57 {offsets = [5, 0], sizes = [1, 128], strides = [1, 1]} : vector<16x128xf32> to vector<1x128xf32>
    %656 = vector.broadcast %655 : vector<1x128xf32> to vector<16x128xf32>
    %657 = arith.mulf %656, %39 : vector<16x128xf32>
    %658 = arith.addf %654, %657 : vector<16x128xf32>
    %659 = vector.extract_strided_slice %57 {offsets = [6, 0], sizes = [1, 128], strides = [1, 1]} : vector<16x128xf32> to vector<1x128xf32>
    %660 = vector.broadcast %659 : vector<1x128xf32> to vector<16x128xf32>
    %661 = arith.mulf %660, %45 : vector<16x128xf32>
    %662 = arith.addf %658, %661 : vector<16x128xf32>
    %663 = vector.extract_strided_slice %57 {offsets = [7, 0], sizes = [1, 128], strides = [1, 1]} : vector<16x128xf32> to vector<1x128xf32>
    %664 = vector.broadcast %663 : vector<1x128xf32> to vector<16x128xf32>
    %665 = arith.mulf %664, %51 : vector<16x128xf32>
    %666 = arith.addf %662, %665 : vector<16x128xf32>
    %667 = vector.extract_strided_slice %57 {offsets = [8, 0], sizes = [1, 128], strides = [1, 1]} : vector<16x128xf32> to vector<1x128xf32>
    %668 = vector.broadcast %667 : vector<1x128xf32> to vector<16x128xf32>
    %669 = arith.mulf %668, %57 : vector<16x128xf32>
    %670 = arith.addf %666, %669 : vector<16x128xf32>
    %671 = vector.extract_strided_slice %57 {offsets = [9, 0], sizes = [1, 128], strides = [1, 1]} : vector<16x128xf32> to vector<1x128xf32>
    %672 = vector.broadcast %671 : vector<1x128xf32> to vector<16x128xf32>
    %673 = arith.mulf %672, %63 : vector<16x128xf32>
    %674 = arith.addf %670, %673 : vector<16x128xf32>
    %675 = vector.extract_strided_slice %57 {offsets = [10, 0], sizes = [1, 128], strides = [1, 1]} : vector<16x128xf32> to vector<1x128xf32>
    %676 = vector.broadcast %675 : vector<1x128xf32> to vector<16x128xf32>
    %677 = arith.mulf %676, %69 : vector<16x128xf32>
    %678 = arith.addf %674, %677 : vector<16x128xf32>
    %679 = vector.extract_strided_slice %57 {offsets = [11, 0], sizes = [1, 128], strides = [1, 1]} : vector<16x128xf32> to vector<1x128xf32>
    %680 = vector.broadcast %679 : vector<1x128xf32> to vector<16x128xf32>
    %681 = arith.mulf %680, %75 : vector<16x128xf32>
    %682 = arith.addf %678, %681 : vector<16x128xf32>
    %683 = vector.extract_strided_slice %57 {offsets = [12, 0], sizes = [1, 128], strides = [1, 1]} : vector<16x128xf32> to vector<1x128xf32>
    %684 = vector.broadcast %683 : vector<1x128xf32> to vector<16x128xf32>
    %685 = arith.mulf %684, %81 : vector<16x128xf32>
    %686 = arith.addf %682, %685 : vector<16x128xf32>
    %687 = vector.extract_strided_slice %57 {offsets = [13, 0], sizes = [1, 128], strides = [1, 1]} : vector<16x128xf32> to vector<1x128xf32>
    %688 = vector.broadcast %687 : vector<1x128xf32> to vector<16x128xf32>
    %689 = arith.mulf %688, %87 : vector<16x128xf32>
    %690 = arith.addf %686, %689 : vector<16x128xf32>
    %691 = vector.extract_strided_slice %57 {offsets = [14, 0], sizes = [1, 128], strides = [1, 1]} : vector<16x128xf32> to vector<1x128xf32>
    %692 = vector.broadcast %691 : vector<1x128xf32> to vector<16x128xf32>
    %693 = arith.mulf %692, %93 : vector<16x128xf32>
    %694 = arith.addf %690, %693 : vector<16x128xf32>
    %695 = vector.extract_strided_slice %57 {offsets = [15, 0], sizes = [1, 128], strides = [1, 1]} : vector<16x128xf32> to vector<1x128xf32>
    %696 = vector.broadcast %695 : vector<1x128xf32> to vector<16x128xf32>
    %697 = arith.mulf %696, %99 : vector<16x128xf32>
    %698 = arith.addf %694, %697 : vector<16x128xf32>
    %c8_51 = arith.constant 8 : index
    %c0_52 = arith.constant 0 : index
    %699 = arith.index_cast %3 : i32 to index
    %700 = vector.load %arg4[%c8_51, %c0_52, %699] : memref<16x16x128xf32, #tpu.memory_space<vmem>>, vector<1x16x128xf32>
    %701 = vector.shape_cast %700 : vector<1x16x128xf32> to vector<16x128xf32>
    %702 = vector.shape_cast %698 : vector<16x128xf32> to vector<1x16x128xf32>
    tpu.vector_store %arg4[%c8_51, %c0_52, %699], %702 {strides = array<i32>} : memref<16x16x128xf32, #tpu.memory_space<vmem>>, vector<1x16x128xf32>,
    %703 = vector.extract_strided_slice %63 {offsets = [0, 0], sizes = [1, 128], strides = [1, 1]} : vector<16x128xf32> to vector<1x128xf32>
    %704 = vector.broadcast %703 : vector<1x128xf32> to vector<16x128xf32>
    %705 = arith.mulf %704, %9 : vector<16x128xf32>
    %706 = vector.extract_strided_slice %63 {offsets = [1, 0], sizes = [1, 128], strides = [1, 1]} : vector<16x128xf32> to vector<1x128xf32>
    %707 = vector.broadcast %706 : vector<1x128xf32> to vector<16x128xf32>
    %708 = arith.mulf %707, %15 : vector<16x128xf32>
    %709 = arith.addf %705, %708 : vector<16x128xf32>
    %710 = vector.extract_strided_slice %63 {offsets = [2, 0], sizes = [1, 128], strides = [1, 1]} : vector<16x128xf32> to vector<1x128xf32>
    %711 = vector.broadcast %710 : vector<1x128xf32> to vector<16x128xf32>
    %712 = arith.mulf %711, %21 : vector<16x128xf32>
    %713 = arith.addf %709, %712 : vector<16x128xf32>
    %714 = vector.extract_strided_slice %63 {offsets = [3, 0], sizes = [1, 128], strides = [1, 1]} : vector<16x128xf32> to vector<1x128xf32>
    %715 = vector.broadcast %714 : vector<1x128xf32> to vector<16x128xf32>
    %716 = arith.mulf %715, %27 : vector<16x128xf32>
    %717 = arith.addf %713, %716 : vector<16x128xf32>
    %718 = vector.extract_strided_slice %63 {offsets = [4, 0], sizes = [1, 128], strides = [1, 1]} : vector<16x128xf32> to vector<1x128xf32>
    %719 = vector.broadcast %718 : vector<1x128xf32> to vector<16x128xf32>
    %720 = arith.mulf %719, %33 : vector<16x128xf32>
    %721 = arith.addf %717, %720 : vector<16x128xf32>
    %722 = vector.extract_strided_slice %63 {offsets = [5, 0], sizes = [1, 128], strides = [1, 1]} : vector<16x128xf32> to vector<1x128xf32>
    %723 = vector.broadcast %722 : vector<1x128xf32> to vector<16x128xf32>
    %724 = arith.mulf %723, %39 : vector<16x128xf32>
    %725 = arith.addf %721, %724 : vector<16x128xf32>
    %726 = vector.extract_strided_slice %63 {offsets = [6, 0], sizes = [1, 128], strides = [1, 1]} : vector<16x128xf32> to vector<1x128xf32>
    %727 = vector.broadcast %726 : vector<1x128xf32> to vector<16x128xf32>
    %728 = arith.mulf %727, %45 : vector<16x128xf32>
    %729 = arith.addf %725, %728 : vector<16x128xf32>
    %730 = vector.extract_strided_slice %63 {offsets = [7, 0], sizes = [1, 128], strides = [1, 1]} : vector<16x128xf32> to vector<1x128xf32>
    %731 = vector.broadcast %730 : vector<1x128xf32> to vector<16x128xf32>
    %732 = arith.mulf %731, %51 : vector<16x128xf32>
    %733 = arith.addf %729, %732 : vector<16x128xf32>
    %734 = vector.extract_strided_slice %63 {offsets = [8, 0], sizes = [1, 128], strides = [1, 1]} : vector<16x128xf32> to vector<1x128xf32>
    %735 = vector.broadcast %734 : vector<1x128xf32> to vector<16x128xf32>
    %736 = arith.mulf %735, %57 : vector<16x128xf32>
    %737 = arith.addf %733, %736 : vector<16x128xf32>
    %738 = vector.extract_strided_slice %63 {offsets = [9, 0], sizes = [1, 128], strides = [1, 1]} : vector<16x128xf32> to vector<1x128xf32>
    %739 = vector.broadcast %738 : vector<1x128xf32> to vector<16x128xf32>
    %740 = arith.mulf %739, %63 : vector<16x128xf32>
    %741 = arith.addf %737, %740 : vector<16x128xf32>
    %742 = vector.extract_strided_slice %63 {offsets = [10, 0], sizes = [1, 128], strides = [1, 1]} : vector<16x128xf32> to vector<1x128xf32>
    %743 = vector.broadcast %742 : vector<1x128xf32> to vector<16x128xf32>
    %744 = arith.mulf %743, %69 : vector<16x128xf32>
    %745 = arith.addf %741, %744 : vector<16x128xf32>
    %746 = vector.extract_strided_slice %63 {offsets = [11, 0], sizes = [1, 128], strides = [1, 1]} : vector<16x128xf32> to vector<1x128xf32>
    %747 = vector.broadcast %746 : vector<1x128xf32> to vector<16x128xf32>
    %748 = arith.mulf %747, %75 : vector<16x128xf32>
    %749 = arith.addf %745, %748 : vector<16x128xf32>
    %750 = vector.extract_strided_slice %63 {offsets = [12, 0], sizes = [1, 128], strides = [1, 1]} : vector<16x128xf32> to vector<1x128xf32>
    %751 = vector.broadcast %750 : vector<1x128xf32> to vector<16x128xf32>
    %752 = arith.mulf %751, %81 : vector<16x128xf32>
    %753 = arith.addf %749, %752 : vector<16x128xf32>
    %754 = vector.extract_strided_slice %63 {offsets = [13, 0], sizes = [1, 128], strides = [1, 1]} : vector<16x128xf32> to vector<1x128xf32>
    %755 = vector.broadcast %754 : vector<1x128xf32> to vector<16x128xf32>
    %756 = arith.mulf %755, %87 : vector<16x128xf32>
    %757 = arith.addf %753, %756 : vector<16x128xf32>
    %758 = vector.extract_strided_slice %63 {offsets = [14, 0], sizes = [1, 128], strides = [1, 1]} : vector<16x128xf32> to vector<1x128xf32>
    %759 = vector.broadcast %758 : vector<1x128xf32> to vector<16x128xf32>
    %760 = arith.mulf %759, %93 : vector<16x128xf32>
    %761 = arith.addf %757, %760 : vector<16x128xf32>
    %762 = vector.extract_strided_slice %63 {offsets = [15, 0], sizes = [1, 128], strides = [1, 1]} : vector<16x128xf32> to vector<1x128xf32>
    %763 = vector.broadcast %762 : vector<1x128xf32> to vector<16x128xf32>
    %764 = arith.mulf %763, %99 : vector<16x128xf32>
    %765 = arith.addf %761, %764 : vector<16x128xf32>
    %c9_53 = arith.constant 9 : index
    %c0_54 = arith.constant 0 : index
    %766 = arith.index_cast %3 : i32 to index
    %767 = vector.load %arg4[%c9_53, %c0_54, %766] : memref<16x16x128xf32, #tpu.memory_space<vmem>>, vector<1x16x128xf32>
    %768 = vector.shape_cast %767 : vector<1x16x128xf32> to vector<16x128xf32>
    %769 = vector.shape_cast %765 : vector<16x128xf32> to vector<1x16x128xf32>
    tpu.vector_store %arg4[%c9_53, %c0_54, %766], %769 {strides = array<i32>} : memref<16x16x128xf32, #tpu.memory_space<vmem>>, vector<1x16x128xf32>,
    %770 = vector.extract_strided_slice %69 {offsets = [0, 0], sizes = [1, 128], strides = [1, 1]} : vector<16x128xf32> to vector<1x128xf32>
    %771 = vector.broadcast %770 : vector<1x128xf32> to vector<16x128xf32>
    %772 = arith.mulf %771, %9 : vector<16x128xf32>
    %773 = vector.extract_strided_slice %69 {offsets = [1, 0], sizes = [1, 128], strides = [1, 1]} : vector<16x128xf32> to vector<1x128xf32>
    %774 = vector.broadcast %773 : vector<1x128xf32> to vector<16x128xf32>
    %775 = arith.mulf %774, %15 : vector<16x128xf32>
    %776 = arith.addf %772, %775 : vector<16x128xf32>
    %777 = vector.extract_strided_slice %69 {offsets = [2, 0], sizes = [1, 128], strides = [1, 1]} : vector<16x128xf32> to vector<1x128xf32>
    %778 = vector.broadcast %777 : vector<1x128xf32> to vector<16x128xf32>
    %779 = arith.mulf %778, %21 : vector<16x128xf32>
    %780 = arith.addf %776, %779 : vector<16x128xf32>
    %781 = vector.extract_strided_slice %69 {offsets = [3, 0], sizes = [1, 128], strides = [1, 1]} : vector<16x128xf32> to vector<1x128xf32>
    %782 = vector.broadcast %781 : vector<1x128xf32> to vector<16x128xf32>
    %783 = arith.mulf %782, %27 : vector<16x128xf32>
    %784 = arith.addf %780, %783 : vector<16x128xf32>
    %785 = vector.extract_strided_slice %69 {offsets = [4, 0], sizes = [1, 128], strides = [1, 1]} : vector<16x128xf32> to vector<1x128xf32>
    %786 = vector.broadcast %785 : vector<1x128xf32> to vector<16x128xf32>
    %787 = arith.mulf %786, %33 : vector<16x128xf32>
    %788 = arith.addf %784, %787 : vector<16x128xf32>
    %789 = vector.extract_strided_slice %69 {offsets = [5, 0], sizes = [1, 128], strides = [1, 1]} : vector<16x128xf32> to vector<1x128xf32>
    %790 = vector.broadcast %789 : vector<1x128xf32> to vector<16x128xf32>
    %791 = arith.mulf %790, %39 : vector<16x128xf32>
    %792 = arith.addf %788, %791 : vector<16x128xf32>
    %793 = vector.extract_strided_slice %69 {offsets = [6, 0], sizes = [1, 128], strides = [1, 1]} : vector<16x128xf32> to vector<1x128xf32>
    %794 = vector.broadcast %793 : vector<1x128xf32> to vector<16x128xf32>
    %795 = arith.mulf %794, %45 : vector<16x128xf32>
    %796 = arith.addf %792, %795 : vector<16x128xf32>
    %797 = vector.extract_strided_slice %69 {offsets = [7, 0], sizes = [1, 128], strides = [1, 1]} : vector<16x128xf32> to vector<1x128xf32>
    %798 = vector.broadcast %797 : vector<1x128xf32> to vector<16x128xf32>
    %799 = arith.mulf %798, %51 : vector<16x128xf32>
    %800 = arith.addf %796, %799 : vector<16x128xf32>
    %801 = vector.extract_strided_slice %69 {offsets = [8, 0], sizes = [1, 128], strides = [1, 1]} : vector<16x128xf32> to vector<1x128xf32>
    %802 = vector.broadcast %801 : vector<1x128xf32> to vector<16x128xf32>
    %803 = arith.mulf %802, %57 : vector<16x128xf32>
    %804 = arith.addf %800, %803 : vector<16x128xf32>
    %805 = vector.extract_strided_slice %69 {offsets = [9, 0], sizes = [1, 128], strides = [1, 1]} : vector<16x128xf32> to vector<1x128xf32>
    %806 = vector.broadcast %805 : vector<1x128xf32> to vector<16x128xf32>
    %807 = arith.mulf %806, %63 : vector<16x128xf32>
    %808 = arith.addf %804, %807 : vector<16x128xf32>
    %809 = vector.extract_strided_slice %69 {offsets = [10, 0], sizes = [1, 128], strides = [1, 1]} : vector<16x128xf32> to vector<1x128xf32>
    %810 = vector.broadcast %809 : vector<1x128xf32> to vector<16x128xf32>
    %811 = arith.mulf %810, %69 : vector<16x128xf32>
    %812 = arith.addf %808, %811 : vector<16x128xf32>
    %813 = vector.extract_strided_slice %69 {offsets = [11, 0], sizes = [1, 128], strides = [1, 1]} : vector<16x128xf32> to vector<1x128xf32>
    %814 = vector.broadcast %813 : vector<1x128xf32> to vector<16x128xf32>
    %815 = arith.mulf %814, %75 : vector<16x128xf32>
    %816 = arith.addf %812, %815 : vector<16x128xf32>
    %817 = vector.extract_strided_slice %69 {offsets = [12, 0], sizes = [1, 128], strides = [1, 1]} : vector<16x128xf32> to vector<1x128xf32>
    %818 = vector.broadcast %817 : vector<1x128xf32> to vector<16x128xf32>
    %819 = arith.mulf %818, %81 : vector<16x128xf32>
    %820 = arith.addf %816, %819 : vector<16x128xf32>
    %821 = vector.extract_strided_slice %69 {offsets = [13, 0], sizes = [1, 128], strides = [1, 1]} : vector<16x128xf32> to vector<1x128xf32>
    %822 = vector.broadcast %821 : vector<1x128xf32> to vector<16x128xf32>
    %823 = arith.mulf %822, %87 : vector<16x128xf32>
    %824 = arith.addf %820, %823 : vector<16x128xf32>
    %825 = vector.extract_strided_slice %69 {offsets = [14, 0], sizes = [1, 128], strides = [1, 1]} : vector<16x128xf32> to vector<1x128xf32>
    %826 = vector.broadcast %825 : vector<1x128xf32> to vector<16x128xf32>
    %827 = arith.mulf %826, %93 : vector<16x128xf32>
    %828 = arith.addf %824, %827 : vector<16x128xf32>
    %829 = vector.extract_strided_slice %69 {offsets = [15, 0], sizes = [1, 128], strides = [1, 1]} : vector<16x128xf32> to vector<1x128xf32>
    %830 = vector.broadcast %829 : vector<1x128xf32> to vector<16x128xf32>
    %831 = arith.mulf %830, %99 : vector<16x128xf32>
    %832 = arith.addf %828, %831 : vector<16x128xf32>
    %c10_55 = arith.constant 10 : index
    %c0_56 = arith.constant 0 : index
    %833 = arith.index_cast %3 : i32 to index
    %834 = vector.load %arg4[%c10_55, %c0_56, %833] : memref<16x16x128xf32, #tpu.memory_space<vmem>>, vector<1x16x128xf32>
    %835 = vector.shape_cast %834 : vector<1x16x128xf32> to vector<16x128xf32>
    %836 = vector.shape_cast %832 : vector<16x128xf32> to vector<1x16x128xf32>
    tpu.vector_store %arg4[%c10_55, %c0_56, %833], %836 {strides = array<i32>} : memref<16x16x128xf32, #tpu.memory_space<vmem>>, vector<1x16x128xf32>,
    %837 = vector.extract_strided_slice %75 {offsets = [0, 0], sizes = [1, 128], strides = [1, 1]} : vector<16x128xf32> to vector<1x128xf32>
    %838 = vector.broadcast %837 : vector<1x128xf32> to vector<16x128xf32>
    %839 = arith.mulf %838, %9 : vector<16x128xf32>
    %840 = vector.extract_strided_slice %75 {offsets = [1, 0], sizes = [1, 128], strides = [1, 1]} : vector<16x128xf32> to vector<1x128xf32>
    %841 = vector.broadcast %840 : vector<1x128xf32> to vector<16x128xf32>
    %842 = arith.mulf %841, %15 : vector<16x128xf32>
    %843 = arith.addf %839, %842 : vector<16x128xf32>
    %844 = vector.extract_strided_slice %75 {offsets = [2, 0], sizes = [1, 128], strides = [1, 1]} : vector<16x128xf32> to vector<1x128xf32>
    %845 = vector.broadcast %844 : vector<1x128xf32> to vector<16x128xf32>
    %846 = arith.mulf %845, %21 : vector<16x128xf32>
    %847 = arith.addf %843, %846 : vector<16x128xf32>
    %848 = vector.extract_strided_slice %75 {offsets = [3, 0], sizes = [1, 128], strides = [1, 1]} : vector<16x128xf32> to vector<1x128xf32>
    %849 = vector.broadcast %848 : vector<1x128xf32> to vector<16x128xf32>
    %850 = arith.mulf %849, %27 : vector<16x128xf32>
    %851 = arith.addf %847, %850 : vector<16x128xf32>
    %852 = vector.extract_strided_slice %75 {offsets = [4, 0], sizes = [1, 128], strides = [1, 1]} : vector<16x128xf32> to vector<1x128xf32>
    %853 = vector.broadcast %852 : vector<1x128xf32> to vector<16x128xf32>
    %854 = arith.mulf %853, %33 : vector<16x128xf32>
    %855 = arith.addf %851, %854 : vector<16x128xf32>
    %856 = vector.extract_strided_slice %75 {offsets = [5, 0], sizes = [1, 128], strides = [1, 1]} : vector<16x128xf32> to vector<1x128xf32>
    %857 = vector.broadcast %856 : vector<1x128xf32> to vector<16x128xf32>
    %858 = arith.mulf %857, %39 : vector<16x128xf32>
    %859 = arith.addf %855, %858 : vector<16x128xf32>
    %860 = vector.extract_strided_slice %75 {offsets = [6, 0], sizes = [1, 128], strides = [1, 1]} : vector<16x128xf32> to vector<1x128xf32>
    %861 = vector.broadcast %860 : vector<1x128xf32> to vector<16x128xf32>
    %862 = arith.mulf %861, %45 : vector<16x128xf32>
    %863 = arith.addf %859, %862 : vector<16x128xf32>
    %864 = vector.extract_strided_slice %75 {offsets = [7, 0], sizes = [1, 128], strides = [1, 1]} : vector<16x128xf32> to vector<1x128xf32>
    %865 = vector.broadcast %864 : vector<1x128xf32> to vector<16x128xf32>
    %866 = arith.mulf %865, %51 : vector<16x128xf32>
    %867 = arith.addf %863, %866 : vector<16x128xf32>
    %868 = vector.extract_strided_slice %75 {offsets = [8, 0], sizes = [1, 128], strides = [1, 1]} : vector<16x128xf32> to vector<1x128xf32>
    %869 = vector.broadcast %868 : vector<1x128xf32> to vector<16x128xf32>
    %870 = arith.mulf %869, %57 : vector<16x128xf32>
    %871 = arith.addf %867, %870 : vector<16x128xf32>
    %872 = vector.extract_strided_slice %75 {offsets = [9, 0], sizes = [1, 128], strides = [1, 1]} : vector<16x128xf32> to vector<1x128xf32>
    %873 = vector.broadcast %872 : vector<1x128xf32> to vector<16x128xf32>
    %874 = arith.mulf %873, %63 : vector<16x128xf32>
    %875 = arith.addf %871, %874 : vector<16x128xf32>
    %876 = vector.extract_strided_slice %75 {offsets = [10, 0], sizes = [1, 128], strides = [1, 1]} : vector<16x128xf32> to vector<1x128xf32>
    %877 = vector.broadcast %876 : vector<1x128xf32> to vector<16x128xf32>
    %878 = arith.mulf %877, %69 : vector<16x128xf32>
    %879 = arith.addf %875, %878 : vector<16x128xf32>
    %880 = vector.extract_strided_slice %75 {offsets = [11, 0], sizes = [1, 128], strides = [1, 1]} : vector<16x128xf32> to vector<1x128xf32>
    %881 = vector.broadcast %880 : vector<1x128xf32> to vector<16x128xf32>
    %882 = arith.mulf %881, %75 : vector<16x128xf32>
    %883 = arith.addf %879, %882 : vector<16x128xf32>
    %884 = vector.extract_strided_slice %75 {offsets = [12, 0], sizes = [1, 128], strides = [1, 1]} : vector<16x128xf32> to vector<1x128xf32>
    %885 = vector.broadcast %884 : vector<1x128xf32> to vector<16x128xf32>
    %886 = arith.mulf %885, %81 : vector<16x128xf32>
    %887 = arith.addf %883, %886 : vector<16x128xf32>
    %888 = vector.extract_strided_slice %75 {offsets = [13, 0], sizes = [1, 128], strides = [1, 1]} : vector<16x128xf32> to vector<1x128xf32>
    %889 = vector.broadcast %888 : vector<1x128xf32> to vector<16x128xf32>
    %890 = arith.mulf %889, %87 : vector<16x128xf32>
    %891 = arith.addf %887, %890 : vector<16x128xf32>
    %892 = vector.extract_strided_slice %75 {offsets = [14, 0], sizes = [1, 128], strides = [1, 1]} : vector<16x128xf32> to vector<1x128xf32>
    %893 = vector.broadcast %892 : vector<1x128xf32> to vector<16x128xf32>
    %894 = arith.mulf %893, %93 : vector<16x128xf32>
    %895 = arith.addf %891, %894 : vector<16x128xf32>
    %896 = vector.extract_strided_slice %75 {offsets = [15, 0], sizes = [1, 128], strides = [1, 1]} : vector<16x128xf32> to vector<1x128xf32>
    %897 = vector.broadcast %896 : vector<1x128xf32> to vector<16x128xf32>
    %898 = arith.mulf %897, %99 : vector<16x128xf32>
    %899 = arith.addf %895, %898 : vector<16x128xf32>
    %c11_57 = arith.constant 11 : index
    %c0_58 = arith.constant 0 : index
    %900 = arith.index_cast %3 : i32 to index
    %901 = vector.load %arg4[%c11_57, %c0_58, %900] : memref<16x16x128xf32, #tpu.memory_space<vmem>>, vector<1x16x128xf32>
    %902 = vector.shape_cast %901 : vector<1x16x128xf32> to vector<16x128xf32>
    %903 = vector.shape_cast %899 : vector<16x128xf32> to vector<1x16x128xf32>
    tpu.vector_store %arg4[%c11_57, %c0_58, %900], %903 {strides = array<i32>} : memref<16x16x128xf32, #tpu.memory_space<vmem>>, vector<1x16x128xf32>,
    %904 = vector.extract_strided_slice %81 {offsets = [0, 0], sizes = [1, 128], strides = [1, 1]} : vector<16x128xf32> to vector<1x128xf32>
    %905 = vector.broadcast %904 : vector<1x128xf32> to vector<16x128xf32>
    %906 = arith.mulf %905, %9 : vector<16x128xf32>
    %907 = vector.extract_strided_slice %81 {offsets = [1, 0], sizes = [1, 128], strides = [1, 1]} : vector<16x128xf32> to vector<1x128xf32>
    %908 = vector.broadcast %907 : vector<1x128xf32> to vector<16x128xf32>
    %909 = arith.mulf %908, %15 : vector<16x128xf32>
    %910 = arith.addf %906, %909 : vector<16x128xf32>
    %911 = vector.extract_strided_slice %81 {offsets = [2, 0], sizes = [1, 128], strides = [1, 1]} : vector<16x128xf32> to vector<1x128xf32>
    %912 = vector.broadcast %911 : vector<1x128xf32> to vector<16x128xf32>
    %913 = arith.mulf %912, %21 : vector<16x128xf32>
    %914 = arith.addf %910, %913 : vector<16x128xf32>
    %915 = vector.extract_strided_slice %81 {offsets = [3, 0], sizes = [1, 128], strides = [1, 1]} : vector<16x128xf32> to vector<1x128xf32>
    %916 = vector.broadcast %915 : vector<1x128xf32> to vector<16x128xf32>
    %917 = arith.mulf %916, %27 : vector<16x128xf32>
    %918 = arith.addf %914, %917 : vector<16x128xf32>
    %919 = vector.extract_strided_slice %81 {offsets = [4, 0], sizes = [1, 128], strides = [1, 1]} : vector<16x128xf32> to vector<1x128xf32>
    %920 = vector.broadcast %919 : vector<1x128xf32> to vector<16x128xf32>
    %921 = arith.mulf %920, %33 : vector<16x128xf32>
    %922 = arith.addf %918, %921 : vector<16x128xf32>
    %923 = vector.extract_strided_slice %81 {offsets = [5, 0], sizes = [1, 128], strides = [1, 1]} : vector<16x128xf32> to vector<1x128xf32>
    %924 = vector.broadcast %923 : vector<1x128xf32> to vector<16x128xf32>
    %925 = arith.mulf %924, %39 : vector<16x128xf32>
    %926 = arith.addf %922, %925 : vector<16x128xf32>
    %927 = vector.extract_strided_slice %81 {offsets = [6, 0], sizes = [1, 128], strides = [1, 1]} : vector<16x128xf32> to vector<1x128xf32>
    %928 = vector.broadcast %927 : vector<1x128xf32> to vector<16x128xf32>
    %929 = arith.mulf %928, %45 : vector<16x128xf32>
    %930 = arith.addf %926, %929 : vector<16x128xf32>
    %931 = vector.extract_strided_slice %81 {offsets = [7, 0], sizes = [1, 128], strides = [1, 1]} : vector<16x128xf32> to vector<1x128xf32>
    %932 = vector.broadcast %931 : vector<1x128xf32> to vector<16x128xf32>
    %933 = arith.mulf %932, %51 : vector<16x128xf32>
    %934 = arith.addf %930, %933 : vector<16x128xf32>
    %935 = vector.extract_strided_slice %81 {offsets = [8, 0], sizes = [1, 128], strides = [1, 1]} : vector<16x128xf32> to vector<1x128xf32>
    %936 = vector.broadcast %935 : vector<1x128xf32> to vector<16x128xf32>
    %937 = arith.mulf %936, %57 : vector<16x128xf32>
    %938 = arith.addf %934, %937 : vector<16x128xf32>
    %939 = vector.extract_strided_slice %81 {offsets = [9, 0], sizes = [1, 128], strides = [1, 1]} : vector<16x128xf32> to vector<1x128xf32>
    %940 = vector.broadcast %939 : vector<1x128xf32> to vector<16x128xf32>
    %941 = arith.mulf %940, %63 : vector<16x128xf32>
    %942 = arith.addf %938, %941 : vector<16x128xf32>
    %943 = vector.extract_strided_slice %81 {offsets = [10, 0], sizes = [1, 128], strides = [1, 1]} : vector<16x128xf32> to vector<1x128xf32>
    %944 = vector.broadcast %943 : vector<1x128xf32> to vector<16x128xf32>
    %945 = arith.mulf %944, %69 : vector<16x128xf32>
    %946 = arith.addf %942, %945 : vector<16x128xf32>
    %947 = vector.extract_strided_slice %81 {offsets = [11, 0], sizes = [1, 128], strides = [1, 1]} : vector<16x128xf32> to vector<1x128xf32>
    %948 = vector.broadcast %947 : vector<1x128xf32> to vector<16x128xf32>
    %949 = arith.mulf %948, %75 : vector<16x128xf32>
    %950 = arith.addf %946, %949 : vector<16x128xf32>
    %951 = vector.extract_strided_slice %81 {offsets = [12, 0], sizes = [1, 128], strides = [1, 1]} : vector<16x128xf32> to vector<1x128xf32>
    %952 = vector.broadcast %951 : vector<1x128xf32> to vector<16x128xf32>
    %953 = arith.mulf %952, %81 : vector<16x128xf32>
    %954 = arith.addf %950, %953 : vector<16x128xf32>
    %955 = vector.extract_strided_slice %81 {offsets = [13, 0], sizes = [1, 128], strides = [1, 1]} : vector<16x128xf32> to vector<1x128xf32>
    %956 = vector.broadcast %955 : vector<1x128xf32> to vector<16x128xf32>
    %957 = arith.mulf %956, %87 : vector<16x128xf32>
    %958 = arith.addf %954, %957 : vector<16x128xf32>
    %959 = vector.extract_strided_slice %81 {offsets = [14, 0], sizes = [1, 128], strides = [1, 1]} : vector<16x128xf32> to vector<1x128xf32>
    %960 = vector.broadcast %959 : vector<1x128xf32> to vector<16x128xf32>
    %961 = arith.mulf %960, %93 : vector<16x128xf32>
    %962 = arith.addf %958, %961 : vector<16x128xf32>
    %963 = vector.extract_strided_slice %81 {offsets = [15, 0], sizes = [1, 128], strides = [1, 1]} : vector<16x128xf32> to vector<1x128xf32>
    %964 = vector.broadcast %963 : vector<1x128xf32> to vector<16x128xf32>
    %965 = arith.mulf %964, %99 : vector<16x128xf32>
    %966 = arith.addf %962, %965 : vector<16x128xf32>
    %c12_59 = arith.constant 12 : index
    %c0_60 = arith.constant 0 : index
    %967 = arith.index_cast %3 : i32 to index
    %968 = vector.load %arg4[%c12_59, %c0_60, %967] : memref<16x16x128xf32, #tpu.memory_space<vmem>>, vector<1x16x128xf32>
    %969 = vector.shape_cast %968 : vector<1x16x128xf32> to vector<16x128xf32>
    %970 = vector.shape_cast %966 : vector<16x128xf32> to vector<1x16x128xf32>
    tpu.vector_store %arg4[%c12_59, %c0_60, %967], %970 {strides = array<i32>} : memref<16x16x128xf32, #tpu.memory_space<vmem>>, vector<1x16x128xf32>,
    %971 = vector.extract_strided_slice %87 {offsets = [0, 0], sizes = [1, 128], strides = [1, 1]} : vector<16x128xf32> to vector<1x128xf32>
    %972 = vector.broadcast %971 : vector<1x128xf32> to vector<16x128xf32>
    %973 = arith.mulf %972, %9 : vector<16x128xf32>
    %974 = vector.extract_strided_slice %87 {offsets = [1, 0], sizes = [1, 128], strides = [1, 1]} : vector<16x128xf32> to vector<1x128xf32>
    %975 = vector.broadcast %974 : vector<1x128xf32> to vector<16x128xf32>
    %976 = arith.mulf %975, %15 : vector<16x128xf32>
    %977 = arith.addf %973, %976 : vector<16x128xf32>
    %978 = vector.extract_strided_slice %87 {offsets = [2, 0], sizes = [1, 128], strides = [1, 1]} : vector<16x128xf32> to vector<1x128xf32>
    %979 = vector.broadcast %978 : vector<1x128xf32> to vector<16x128xf32>
    %980 = arith.mulf %979, %21 : vector<16x128xf32>
    %981 = arith.addf %977, %980 : vector<16x128xf32>
    %982 = vector.extract_strided_slice %87 {offsets = [3, 0], sizes = [1, 128], strides = [1, 1]} : vector<16x128xf32> to vector<1x128xf32>
    %983 = vector.broadcast %982 : vector<1x128xf32> to vector<16x128xf32>
    %984 = arith.mulf %983, %27 : vector<16x128xf32>
    %985 = arith.addf %981, %984 : vector<16x128xf32>
    %986 = vector.extract_strided_slice %87 {offsets = [4, 0], sizes = [1, 128], strides = [1, 1]} : vector<16x128xf32> to vector<1x128xf32>
    %987 = vector.broadcast %986 : vector<1x128xf32> to vector<16x128xf32>
    %988 = arith.mulf %987, %33 : vector<16x128xf32>
    %989 = arith.addf %985, %988 : vector<16x128xf32>
    %990 = vector.extract_strided_slice %87 {offsets = [5, 0], sizes = [1, 128], strides = [1, 1]} : vector<16x128xf32> to vector<1x128xf32>
    %991 = vector.broadcast %990 : vector<1x128xf32> to vector<16x128xf32>
    %992 = arith.mulf %991, %39 : vector<16x128xf32>
    %993 = arith.addf %989, %992 : vector<16x128xf32>
    %994 = vector.extract_strided_slice %87 {offsets = [6, 0], sizes = [1, 128], strides = [1, 1]} : vector<16x128xf32> to vector<1x128xf32>
    %995 = vector.broadcast %994 : vector<1x128xf32> to vector<16x128xf32>
    %996 = arith.mulf %995, %45 : vector<16x128xf32>
    %997 = arith.addf %993, %996 : vector<16x128xf32>
    %998 = vector.extract_strided_slice %87 {offsets = [7, 0], sizes = [1, 128], strides = [1, 1]} : vector<16x128xf32> to vector<1x128xf32>
    %999 = vector.broadcast %998 : vector<1x128xf32> to vector<16x128xf32>
    %1000 = arith.mulf %999, %51 : vector<16x128xf32>
    %1001 = arith.addf %997, %1000 : vector<16x128xf32>
    %1002 = vector.extract_strided_slice %87 {offsets = [8, 0], sizes = [1, 128], strides = [1, 1]} : vector<16x128xf32> to vector<1x128xf32>
    %1003 = vector.broadcast %1002 : vector<1x128xf32> to vector<16x128xf32>
    %1004 = arith.mulf %1003, %57 : vector<16x128xf32>
    %1005 = arith.addf %1001, %1004 : vector<16x128xf32>
    %1006 = vector.extract_strided_slice %87 {offsets = [9, 0], sizes = [1, 128], strides = [1, 1]} : vector<16x128xf32> to vector<1x128xf32>
    %1007 = vector.broadcast %1006 : vector<1x128xf32> to vector<16x128xf32>
    %1008 = arith.mulf %1007, %63 : vector<16x128xf32>
    %1009 = arith.addf %1005, %1008 : vector<16x128xf32>
    %1010 = vector.extract_strided_slice %87 {offsets = [10, 0], sizes = [1, 128], strides = [1, 1]} : vector<16x128xf32> to vector<1x128xf32>
    %1011 = vector.broadcast %1010 : vector<1x128xf32> to vector<16x128xf32>
    %1012 = arith.mulf %1011, %69 : vector<16x128xf32>
    %1013 = arith.addf %1009, %1012 : vector<16x128xf32>
    %1014 = vector.extract_strided_slice %87 {offsets = [11, 0], sizes = [1, 128], strides = [1, 1]} : vector<16x128xf32> to vector<1x128xf32>
    %1015 = vector.broadcast %1014 : vector<1x128xf32> to vector<16x128xf32>
    %1016 = arith.mulf %1015, %75 : vector<16x128xf32>
    %1017 = arith.addf %1013, %1016 : vector<16x128xf32>
    %1018 = vector.extract_strided_slice %87 {offsets = [12, 0], sizes = [1, 128], strides = [1, 1]} : vector<16x128xf32> to vector<1x128xf32>
    %1019 = vector.broadcast %1018 : vector<1x128xf32> to vector<16x128xf32>
    %1020 = arith.mulf %1019, %81 : vector<16x128xf32>
    %1021 = arith.addf %1017, %1020 : vector<16x128xf32>
    %1022 = vector.extract_strided_slice %87 {offsets = [13, 0], sizes = [1, 128], strides = [1, 1]} : vector<16x128xf32> to vector<1x128xf32>
    %1023 = vector.broadcast %1022 : vector<1x128xf32> to vector<16x128xf32>
    %1024 = arith.mulf %1023, %87 : vector<16x128xf32>
    %1025 = arith.addf %1021, %1024 : vector<16x128xf32>
    %1026 = vector.extract_strided_slice %87 {offsets = [14, 0], sizes = [1, 128], strides = [1, 1]} : vector<16x128xf32> to vector<1x128xf32>
    %1027 = vector.broadcast %1026 : vector<1x128xf32> to vector<16x128xf32>
    %1028 = arith.mulf %1027, %93 : vector<16x128xf32>
    %1029 = arith.addf %1025, %1028 : vector<16x128xf32>
    %1030 = vector.extract_strided_slice %87 {offsets = [15, 0], sizes = [1, 128], strides = [1, 1]} : vector<16x128xf32> to vector<1x128xf32>
    %1031 = vector.broadcast %1030 : vector<1x128xf32> to vector<16x128xf32>
    %1032 = arith.mulf %1031, %99 : vector<16x128xf32>
    %1033 = arith.addf %1029, %1032 : vector<16x128xf32>
    %c13_61 = arith.constant 13 : index
    %c0_62 = arith.constant 0 : index
    %1034 = arith.index_cast %3 : i32 to index
    %1035 = vector.load %arg4[%c13_61, %c0_62, %1034] : memref<16x16x128xf32, #tpu.memory_space<vmem>>, vector<1x16x128xf32>
    %1036 = vector.shape_cast %1035 : vector<1x16x128xf32> to vector<16x128xf32>
    %1037 = vector.shape_cast %1033 : vector<16x128xf32> to vector<1x16x128xf32>
    tpu.vector_store %arg4[%c13_61, %c0_62, %1034], %1037 {strides = array<i32>} : memref<16x16x128xf32, #tpu.memory_space<vmem>>, vector<1x16x128xf32>,
    %1038 = vector.extract_strided_slice %93 {offsets = [0, 0], sizes = [1, 128], strides = [1, 1]} : vector<16x128xf32> to vector<1x128xf32>
    %1039 = vector.broadcast %1038 : vector<1x128xf32> to vector<16x128xf32>
    %1040 = arith.mulf %1039, %9 : vector<16x128xf32>
    %1041 = vector.extract_strided_slice %93 {offsets = [1, 0], sizes = [1, 128], strides = [1, 1]} : vector<16x128xf32> to vector<1x128xf32>
    %1042 = vector.broadcast %1041 : vector<1x128xf32> to vector<16x128xf32>
    %1043 = arith.mulf %1042, %15 : vector<16x128xf32>
    %1044 = arith.addf %1040, %1043 : vector<16x128xf32>
    %1045 = vector.extract_strided_slice %93 {offsets = [2, 0], sizes = [1, 128], strides = [1, 1]} : vector<16x128xf32> to vector<1x128xf32>
    %1046 = vector.broadcast %1045 : vector<1x128xf32> to vector<16x128xf32>
    %1047 = arith.mulf %1046, %21 : vector<16x128xf32>
    %1048 = arith.addf %1044, %1047 : vector<16x128xf32>
    %1049 = vector.extract_strided_slice %93 {offsets = [3, 0], sizes = [1, 128], strides = [1, 1]} : vector<16x128xf32> to vector<1x128xf32>
    %1050 = vector.broadcast %1049 : vector<1x128xf32> to vector<16x128xf32>
    %1051 = arith.mulf %1050, %27 : vector<16x128xf32>
    %1052 = arith.addf %1048, %1051 : vector<16x128xf32>
    %1053 = vector.extract_strided_slice %93 {offsets = [4, 0], sizes = [1, 128], strides = [1, 1]} : vector<16x128xf32> to vector<1x128xf32>
    %1054 = vector.broadcast %1053 : vector<1x128xf32> to vector<16x128xf32>
    %1055 = arith.mulf %1054, %33 : vector<16x128xf32>
    %1056 = arith.addf %1052, %1055 : vector<16x128xf32>
    %1057 = vector.extract_strided_slice %93 {offsets = [5, 0], sizes = [1, 128], strides = [1, 1]} : vector<16x128xf32> to vector<1x128xf32>
    %1058 = vector.broadcast %1057 : vector<1x128xf32> to vector<16x128xf32>
    %1059 = arith.mulf %1058, %39 : vector<16x128xf32>
    %1060 = arith.addf %1056, %1059 : vector<16x128xf32>
    %1061 = vector.extract_strided_slice %93 {offsets = [6, 0], sizes = [1, 128], strides = [1, 1]} : vector<16x128xf32> to vector<1x128xf32>
    %1062 = vector.broadcast %1061 : vector<1x128xf32> to vector<16x128xf32>
    %1063 = arith.mulf %1062, %45 : vector<16x128xf32>
    %1064 = arith.addf %1060, %1063 : vector<16x128xf32>
    %1065 = vector.extract_strided_slice %93 {offsets = [7, 0], sizes = [1, 128], strides = [1, 1]} : vector<16x128xf32> to vector<1x128xf32>
    %1066 = vector.broadcast %1065 : vector<1x128xf32> to vector<16x128xf32>
    %1067 = arith.mulf %1066, %51 : vector<16x128xf32>
    %1068 = arith.addf %1064, %1067 : vector<16x128xf32>
    %1069 = vector.extract_strided_slice %93 {offsets = [8, 0], sizes = [1, 128], strides = [1, 1]} : vector<16x128xf32> to vector<1x128xf32>
    %1070 = vector.broadcast %1069 : vector<1x128xf32> to vector<16x128xf32>
    %1071 = arith.mulf %1070, %57 : vector<16x128xf32>
    %1072 = arith.addf %1068, %1071 : vector<16x128xf32>
    %1073 = vector.extract_strided_slice %93 {offsets = [9, 0], sizes = [1, 128], strides = [1, 1]} : vector<16x128xf32> to vector<1x128xf32>
    %1074 = vector.broadcast %1073 : vector<1x128xf32> to vector<16x128xf32>
    %1075 = arith.mulf %1074, %63 : vector<16x128xf32>
    %1076 = arith.addf %1072, %1075 : vector<16x128xf32>
    %1077 = vector.extract_strided_slice %93 {offsets = [10, 0], sizes = [1, 128], strides = [1, 1]} : vector<16x128xf32> to vector<1x128xf32>
    %1078 = vector.broadcast %1077 : vector<1x128xf32> to vector<16x128xf32>
    %1079 = arith.mulf %1078, %69 : vector<16x128xf32>
    %1080 = arith.addf %1076, %1079 : vector<16x128xf32>
    %1081 = vector.extract_strided_slice %93 {offsets = [11, 0], sizes = [1, 128], strides = [1, 1]} : vector<16x128xf32> to vector<1x128xf32>
    %1082 = vector.broadcast %1081 : vector<1x128xf32> to vector<16x128xf32>
    %1083 = arith.mulf %1082, %75 : vector<16x128xf32>
    %1084 = arith.addf %1080, %1083 : vector<16x128xf32>
    %1085 = vector.extract_strided_slice %93 {offsets = [12, 0], sizes = [1, 128], strides = [1, 1]} : vector<16x128xf32> to vector<1x128xf32>
    %1086 = vector.broadcast %1085 : vector<1x128xf32> to vector<16x128xf32>
    %1087 = arith.mulf %1086, %81 : vector<16x128xf32>
    %1088 = arith.addf %1084, %1087 : vector<16x128xf32>
    %1089 = vector.extract_strided_slice %93 {offsets = [13, 0], sizes = [1, 128], strides = [1, 1]} : vector<16x128xf32> to vector<1x128xf32>
    %1090 = vector.broadcast %1089 : vector<1x128xf32> to vector<16x128xf32>
    %1091 = arith.mulf %1090, %87 : vector<16x128xf32>
    %1092 = arith.addf %1088, %1091 : vector<16x128xf32>
    %1093 = vector.extract_strided_slice %93 {offsets = [14, 0], sizes = [1, 128], strides = [1, 1]} : vector<16x128xf32> to vector<1x128xf32>
    %1094 = vector.broadcast %1093 : vector<1x128xf32> to vector<16x128xf32>
    %1095 = arith.mulf %1094, %93 : vector<16x128xf32>
    %1096 = arith.addf %1092, %1095 : vector<16x128xf32>
    %1097 = vector.extract_strided_slice %93 {offsets = [15, 0], sizes = [1, 128], strides = [1, 1]} : vector<16x128xf32> to vector<1x128xf32>
    %1098 = vector.broadcast %1097 : vector<1x128xf32> to vector<16x128xf32>
    %1099 = arith.mulf %1098, %99 : vector<16x128xf32>
    %1100 = arith.addf %1096, %1099 : vector<16x128xf32>
    %c14_63 = arith.constant 14 : index
    %c0_64 = arith.constant 0 : index
    %1101 = arith.index_cast %3 : i32 to index
    %1102 = vector.load %arg4[%c14_63, %c0_64, %1101] : memref<16x16x128xf32, #tpu.memory_space<vmem>>, vector<1x16x128xf32>
    %1103 = vector.shape_cast %1102 : vector<1x16x128xf32> to vector<16x128xf32>
    %1104 = vector.shape_cast %1100 : vector<16x128xf32> to vector<1x16x128xf32>
    tpu.vector_store %arg4[%c14_63, %c0_64, %1101], %1104 {strides = array<i32>} : memref<16x16x128xf32, #tpu.memory_space<vmem>>, vector<1x16x128xf32>,
    %1105 = vector.extract_strided_slice %99 {offsets = [0, 0], sizes = [1, 128], strides = [1, 1]} : vector<16x128xf32> to vector<1x128xf32>
    %1106 = vector.broadcast %1105 : vector<1x128xf32> to vector<16x128xf32>
    %1107 = arith.mulf %1106, %9 : vector<16x128xf32>
    %1108 = vector.extract_strided_slice %99 {offsets = [1, 0], sizes = [1, 128], strides = [1, 1]} : vector<16x128xf32> to vector<1x128xf32>
    %1109 = vector.broadcast %1108 : vector<1x128xf32> to vector<16x128xf32>
    %1110 = arith.mulf %1109, %15 : vector<16x128xf32>
    %1111 = arith.addf %1107, %1110 : vector<16x128xf32>
    %1112 = vector.extract_strided_slice %99 {offsets = [2, 0], sizes = [1, 128], strides = [1, 1]} : vector<16x128xf32> to vector<1x128xf32>
    %1113 = vector.broadcast %1112 : vector<1x128xf32> to vector<16x128xf32>
    %1114 = arith.mulf %1113, %21 : vector<16x128xf32>
    %1115 = arith.addf %1111, %1114 : vector<16x128xf32>
    %1116 = vector.extract_strided_slice %99 {offsets = [3, 0], sizes = [1, 128], strides = [1, 1]} : vector<16x128xf32> to vector<1x128xf32>
    %1117 = vector.broadcast %1116 : vector<1x128xf32> to vector<16x128xf32>
    %1118 = arith.mulf %1117, %27 : vector<16x128xf32>
    %1119 = arith.addf %1115, %1118 : vector<16x128xf32>
    %1120 = vector.extract_strided_slice %99 {offsets = [4, 0], sizes = [1, 128], strides = [1, 1]} : vector<16x128xf32> to vector<1x128xf32>
    %1121 = vector.broadcast %1120 : vector<1x128xf32> to vector<16x128xf32>
    %1122 = arith.mulf %1121, %33 : vector<16x128xf32>
    %1123 = arith.addf %1119, %1122 : vector<16x128xf32>
    %1124 = vector.extract_strided_slice %99 {offsets = [5, 0], sizes = [1, 128], strides = [1, 1]} : vector<16x128xf32> to vector<1x128xf32>
    %1125 = vector.broadcast %1124 : vector<1x128xf32> to vector<16x128xf32>
    %1126 = arith.mulf %1125, %39 : vector<16x128xf32>
    %1127 = arith.addf %1123, %1126 : vector<16x128xf32>
    %1128 = vector.extract_strided_slice %99 {offsets = [6, 0], sizes = [1, 128], strides = [1, 1]} : vector<16x128xf32> to vector<1x128xf32>
    %1129 = vector.broadcast %1128 : vector<1x128xf32> to vector<16x128xf32>
    %1130 = arith.mulf %1129, %45 : vector<16x128xf32>
    %1131 = arith.addf %1127, %1130 : vector<16x128xf32>
    %1132 = vector.extract_strided_slice %99 {offsets = [7, 0], sizes = [1, 128], strides = [1, 1]} : vector<16x128xf32> to vector<1x128xf32>
    %1133 = vector.broadcast %1132 : vector<1x128xf32> to vector<16x128xf32>
    %1134 = arith.mulf %1133, %51 : vector<16x128xf32>
    %1135 = arith.addf %1131, %1134 : vector<16x128xf32>
    %1136 = vector.extract_strided_slice %99 {offsets = [8, 0], sizes = [1, 128], strides = [1, 1]} : vector<16x128xf32> to vector<1x128xf32>
    %1137 = vector.broadcast %1136 : vector<1x128xf32> to vector<16x128xf32>
    %1138 = arith.mulf %1137, %57 : vector<16x128xf32>
    %1139 = arith.addf %1135, %1138 : vector<16x128xf32>
    %1140 = vector.extract_strided_slice %99 {offsets = [9, 0], sizes = [1, 128], strides = [1, 1]} : vector<16x128xf32> to vector<1x128xf32>
    %1141 = vector.broadcast %1140 : vector<1x128xf32> to vector<16x128xf32>
    %1142 = arith.mulf %1141, %63 : vector<16x128xf32>
    %1143 = arith.addf %1139, %1142 : vector<16x128xf32>
    %1144 = vector.extract_strided_slice %99 {offsets = [10, 0], sizes = [1, 128], strides = [1, 1]} : vector<16x128xf32> to vector<1x128xf32>
    %1145 = vector.broadcast %1144 : vector<1x128xf32> to vector<16x128xf32>
    %1146 = arith.mulf %1145, %69 : vector<16x128xf32>
    %1147 = arith.addf %1143, %1146 : vector<16x128xf32>
    %1148 = vector.extract_strided_slice %99 {offsets = [11, 0], sizes = [1, 128], strides = [1, 1]} : vector<16x128xf32> to vector<1x128xf32>
    %1149 = vector.broadcast %1148 : vector<1x128xf32> to vector<16x128xf32>
    %1150 = arith.mulf %1149, %75 : vector<16x128xf32>
    %1151 = arith.addf %1147, %1150 : vector<16x128xf32>
    %1152 = vector.extract_strided_slice %99 {offsets = [12, 0], sizes = [1, 128], strides = [1, 1]} : vector<16x128xf32> to vector<1x128xf32>
    %1153 = vector.broadcast %1152 : vector<1x128xf32> to vector<16x128xf32>
    %1154 = arith.mulf %1153, %81 : vector<16x128xf32>
    %1155 = arith.addf %1151, %1154 : vector<16x128xf32>
    %1156 = vector.extract_strided_slice %99 {offsets = [13, 0], sizes = [1, 128], strides = [1, 1]} : vector<16x128xf32> to vector<1x128xf32>
    %1157 = vector.broadcast %1156 : vector<1x128xf32> to vector<16x128xf32>
    %1158 = arith.mulf %1157, %87 : vector<16x128xf32>
    %1159 = arith.addf %1155, %1158 : vector<16x128xf32>
    %1160 = vector.extract_strided_slice %99 {offsets = [14, 0], sizes = [1, 128], strides = [1, 1]} : vector<16x128xf32> to vector<1x128xf32>
    %1161 = vector.broadcast %1160 : vector<1x128xf32> to vector<16x128xf32>
    %1162 = arith.mulf %1161, %93 : vector<16x128xf32>
    %1163 = arith.addf %1159, %1162 : vector<16x128xf32>
    %1164 = vector.extract_strided_slice %99 {offsets = [15, 0], sizes = [1, 128], strides = [1, 1]} : vector<16x128xf32> to vector<1x128xf32>
    %1165 = vector.broadcast %1164 : vector<1x128xf32> to vector<16x128xf32>
    %1166 = arith.mulf %1165, %99 : vector<16x128xf32>
    %1167 = arith.addf %1163, %1166 : vector<16x128xf32>
    %c15_65 = arith.constant 15 : index
    %c0_66 = arith.constant 0 : index
    %1168 = arith.index_cast %3 : i32 to index
    %1169 = vector.load %arg4[%c15_65, %c0_66, %1168] : memref<16x16x128xf32, #tpu.memory_space<vmem>>, vector<1x16x128xf32>
    %1170 = vector.shape_cast %1169 : vector<1x16x128xf32> to vector<16x128xf32>
    %1171 = vector.shape_cast %1167 : vector<16x128xf32> to vector<1x16x128xf32>
    tpu.vector_store %arg4[%c15_65, %c0_66, %1168], %1171 {strides = array<i32>} : memref<16x16x128xf32, #tpu.memory_space<vmem>>, vector<1x16x128xf32>,
    %c1_i32 = arith.constant 1 : i32
    return
  }
  func.func @transform_0(%arg0: i32) -> (i32, i32, i32) {
    %c0_i32 = arith.constant 0 : i32
    %c0_i32_0 = arith.constant 0 : i32
    %c0_i32_1 = arith.constant 0 : i32
    return %c0_i32, %c0_i32_0, %arg0 : i32, i32, i32
  }
  func.func @transform_1(%arg0: i32) -> (i32, i32) {
    %c0_i32 = arith.constant 0 : i32
    %c0_i32_0 = arith.constant 0 : i32
    %c0_i32_1 = arith.constant 0 : i32
    return %c0_i32, %c0_i32_0 : i32, i32
  }
  func.func @transform_2(%arg0: i32) -> (i32, i32) {
    %c0_i32 = arith.constant 0 : i32
    %c0_i32_0 = arith.constant 0 : i32
    %c0_i32_1 = arith.constant 0 : i32
    return %c0_i32, %c0_i32_0 : i32, i32
  }
  func.func @transform_3(%arg0: i32) -> (i32, i32, i32) {
    %c0_i32 = arith.constant 0 : i32
    %c0_i32_0 = arith.constant 0 : i32
    %c0_i32_1 = arith.constant 0 : i32
    return %c0_i32, %c0_i32_0, %arg0 : i32, i32, i32
  }
}

</mosaic_0001>

<bundles_post_ra>
// kernel: tpu_custom_call.1
= control target key start
LH: loop header
LB: loop body
LE: loop exit
PB: predicated region body
PF: predicated region fallthrough
CT: control target
= control target key end

     0   :  { %8 = vsyncpa [#allocation3], 0  ;;  %s6589_s0 = inlined_call_operand.hbm [shape: f32[16,16,256], index: 0, kind: input, shape index: {}]   ;;  %s6590_s1 = inlined_call_operand.vmem [shape: f32[16,16], index: 1, kind: input, shape index: {}]   ;;  %s6591_s2 = inlined_call_operand.vmem [shape: f32[16,1], index: 2, kind: input, shape index: {}]   ;;  %s6592_s3 = inlined_call_operand.hbm [shape: f32[16,16,256], index: 3, kind: output, shape index: {}]  }
   0x1   :  { %10 = vsyncpa [#allocation3 + $0x1], 0 }
   0x2   :  { %11 = vsyncpa [#allocation4], 0 }
   0x3   :  { %13 = vsyncpa [#allocation4 + $0x1], 0  ;;  %s4107_s12 = smov 0   ;;  %s4109_s13 = smov 0  }
   0x4   :  { %s4111_s14 = smov 0   ;;  %s4113_s15 = smov 0  }
   0x5 LB: > { %s4128_s16 = sadd.s32 4294967295, %s4076_s15   ;;  %s3650_s17 = sadd.s32 4294967294, %s4076_s15   ;;  %s4076_s15 = sphi %s4113_s15, %s7365_s15   ;;  %s4072_s14 = sphi %s4111_s14, %s7364_s14   ;;  %s4068_s13 = sphi %s4109_s13, %s7363_s13   ;;  %s4064_s12 = sphi %s4107_s12, %s7362_s12  }
   0x6   : > { %s4132_s18 = sadd.s32 1, %s4076_s15   ;;  %s26_s19 = sadd.s32 1, %s4072_s14 }
   0x7   : > { %s23_s20 = ssub.s32 %s4076_s15, %s4132_s18  ;;  %p33_p0 = scmp.ne.s32.totalorder %s4072_s14, %s4068_s13 }
   0x8   : > { %p24_p1 = scmp.eq.s32.totalorder %s23_s20, 0  ;;  %p34_p2 = scmp.eq.s32.totalorder %s4076_s15, 0 }
   0x9   : > { %p39_p3 = scmp.ne.s32.totalorder %s4068_s13, %s4064_s12  ;;  %p40_p4 = scmp.eq.s32.totalorder %s4128_s16, 0 }
   0xa   : > { %s4144_s21 = scalar_select %p24_p1, %s4072_s14, %s26_s19  }
   0xb   : > { %p4146_p5 = por %p34_p2, %p33_p0  ;;  %p4150_p6 = por %p40_p4, %p39_p3 }
   0xc   : > { %p105_p7 = scmp.eq.s32.totalorder %s4128_s16, 1  ;;  %p111_p8 = scmp.eq.s32.totalorder %s3650_s17, 1 }
   0xd   : > { %s6807_s23 = scalar_select %p4150_p6, 1, 0 }
   0xe   : > { %p3942_p10 = scmp.lt.s32.totalorder %s4076_s15, 2  ;;  %p4157_p11 = por %p105_p7, %p33_p0 }
   0xf   : > { %p4161_p12 = por %p111_p8, %p39_p3  ;;  %s137_s26 = sand.u32 1, %s4072_s14  }
  0x10   : > { %s6808_s24 = scalar_select %p4157_p11, 1, 0 }
  0x11   : > { %s6809_s25 = scalar_select %p4161_p12, 1, 0 }
  0x12   : > { %s3654_s27 = sshll.u32 %s4076_s15, 7  ;;  %s3653_s28 = sshll.u32 %s137_s26, 8 }
  0x13   : > { %s4170_s4 = scalar_lea.hbm %s6589_s0, %s3654_s27  ;;  %s141_s5 = scalar_lea.vmem [#allocation2], %s3653_s28 }
  0x14   : > { %s147_s6 = sshll.u32 %s141_s5, 4  ;;  %p4174_p13 = pnand %p3942_p10, %p4146_p5  ;;  %s4178_s6 = int_to_ptr.vmem [resolvable:$true] %s147_s6 }
  0x15   : > { %s4181_s8 = scalar_lea.sflag [#allocation3], %s137_s26  ;;  %s3984_s9 = scalar_lea.hbm %s4170_s4, 4096 }
  0x16   : > { %p3985_p1 = scmp.ne.s32.totalorder %s4170_s4, %s3984_s9  ;;  %p3986_p2 = pneg %p4174_p13 }
  0x17   : > { %s3989_s17 = scalar_lea.hbm %s6589_s0, 8192  ;;  %p3990_p5 = scmp.lt.s32.totalorder %s4170_s4, %s6589_s0 }
  0x18   : > { %p3987_p3 = pnand %p3986_p2, %p3985_p1  ;;  %p3991_p7 = scmp.lt.s32.totalorder %s3989_s17, %s3984_s9 }
  0x1a   : > { %p3988_p4 = pneg %p3987_p3  ;;  %p3992_p8 = por %p3991_p7, %p3990_p5 }
  0x1c   : > { %p3993_p10 = pnand %p3992_p8, %p3988_p4 }
  0x1e   : > { %3996 = shalt.err (!%p3993_p10)
}
  0x1f   : > { %s3997_s22 = scalar_lea.vmem %s4178_s6, 4096  ;;  %s4078_s26 = smov [#allocation2]  }
  0x20   : > { %p3998_p9 = scmp.ne.s32.totalorder %s4178_s6, %s3997_s22  ;;  %s4002_s27 = sshll.u32 %s4078_s26, 4  ;;  %s4003_s27 = int_to_ptr.vmem [resolvable:$false] %s4002_s27 }
  0x21   : > { %s4004_s28 = scalar_lea.vmem %s4003_s27, 8192  ;;  %p4005_p3 = scmp.lt.s32.totalorder %s4178_s6, %s4003_s27 }
  0x22   : > { %p4000_p0 = pnand %p3998_p9, %p3986_p2  ;;  %p4006_p12 = scmp.lt.s32.totalorder %s4004_s28, %s3997_s22 }
  0x24   : > { %p4001_p1 = pneg %p4000_p0  ;;  %p4007_p11 = por %p4006_p12, %p4005_p3 }
  0x26   : > { %p4008_p6 = pnand %p4007_p11, %p4001_p1 }
  0x28   : > { %4011 = shalt.err (!%p4008_p6)
}
  0x29   : > { %s4079_s29 = smov 256   ;;  %s4080_s30 = smov 128  }
  0x2a   : > { %s4081_s5 = smov 8   ;;  %p155_p9 = scmp.lt.s32.totalorder %s4076_s15, 3 }
  0x2b   : > { %3937 = dma.hbm_to_vmem [thread:$0]  (!%p4174_p13), %s4170_s4, 4096, %s4178_s6, %s4181_s8, %s4079_s29, %s4080_s30, %s4081_s5  }
  0x2c   : > { %p6811_p0 = scmp.ge.s32.totalorder %s4076_s15, 1 }
  0x2e   : > { %p156_p2 = pnand %p6811_p0, %p155_p9 }
  0x30   : > { %159 = sbr.rel (%p156_p2) target bundleno = 626 (0x272), region = 32 }
  0x35   : > { %s4206_s9 = sand.u32 1, %s4068_s13   ;;  %p6812_p6 = scmp.ne.s32.totalorder %s6807_s23, 0 }
  0x36   : > { %s3656_s10 = sshll.u32 %s4206_s9, 8  ;;  %s162_s11 = scalar_lea.sflag [#allocation3], %s4206_s9 }
  0x37   : > { %s4212_s17 = scalar_lea.vmem [#allocation2], %s3656_s10 }
  0x38   : > { %4055 = dma.done.wait (%p6812_p6), %s162_s11, 4096  }
  0x39   : > { %4057 = vsyncadd (%p6812_p6), %s162_s11, 4294963200  ;;  %v4082_v0 = vmov 0   ;;  %v193_v1 = vld [vmem:[%s4212_s17 + $0x8] sm:$0xff]  ;;  %v3661_v2 = vld [vmem:[%s4212_s17 + $0x18] sm:$0xff]  ;;  %vm204_vm0 = vcmask 130048   ;;  %v1471_v40 = vlaneseq  ;;  %s6208_s26 = scalar_lea.vmem [#allocation5], %s3656_s10 }
  0x3a   : > { %3983 = vset.pattern.permute.xlu0 %v4082_v0  ;;  %v192_v3 = vld [vmem:[%s4212_s17] sm:$0xff]  ;;  %3818 = vmatprep.subr.mxu0 %v193_v1  ;;  %v3660_v4 = vld [vmem:[%s4212_s17 + $0x10] sm:$0xff]  ;;  %v4230_v6 = vld [vmem:[%s6590_s1 + $0x8] sm:$0xff]  ;;  %s3751_s27 = sshll.u32 %s4128_s16, 7  ;;  %s3547_s28 = sshll.u32 %s6208_s26, 4  ;;  %s6544_s28 = int_to_ptr.vmem [resolvable:$true] %s3547_s28 }
  0x3b   : > { %3825 = vmatprep.subr.mxu1 %v3661_v2  ;;  %v4225_v5 = vld [vmem:[%s6590_s1] sm:$0xff]  ;;  %3819 = vmatpush3.msra.mxu0 %v193_v1  ;;  %v3665_v7 = vld [vmem:[%s4212_s17 + $0x28] sm:$0xff]  ;;  %v3669_v8 = vld [vmem:[%s4212_s17 + $0x38] sm:$0xff]  ;;  %v1472_v42 = vshrl.u32 %v1471_v40, 7  ;;  %s6542_s5 = scalar_lea.hbm %s6592_s3, %s3751_s27  ;;  %s3535_s16 = scalar_lea.sflag [#allocation4], %s4206_s9 }
  0x3c   : > { %3826 = vmatpush3.msra.mxu1 %v3661_v2  ;;  %3820 = vmatprep.subr.mxu0 %v192_v3  ;;  %v3664_v9 = vld [vmem:[%s4212_s17 + $0x20] sm:$0xff]  ;;  %v3668_v10 = vld [vmem:[%s4212_s17 + $0x30] sm:$0xff]  ;;  %v3673_v11 = vld [vmem:[%s4212_s17 + $0x48] sm:$0xff]  ;;  %s4012_s10 = scalar_lea.vmem %s6544_s28, 4096  ;;  %p7359_p12 = scmp.ne.s32.totalorder %s6808_s24, 0 }
  0x3d   : > { %3827 = vmatprep.subr.mxu1 %v3660_v4  ;;  %3821 = vmatpush3.msra.mxu0 %v192_v3  ;;  %v3677_v12 = vld [vmem:[%s4212_s17 + $0x58] sm:$0xff]  ;;  %v3672_v13 = vld [vmem:[%s4212_s17 + $0x40] sm:$0xff]  ;;  %v3676_v14 = vld [vmem:[%s4212_s17 + $0x50] sm:$0xff]  ;;  %v4346_v49 = vsub.s32 0, %v1472_v42  ;;  %v4348_v50 = vsub.s32 1, %v1472_v42  ;;  %v4350_v51 = vsub.s32 2, %v1472_v42  ;;  %p4013_p11 = scmp.ne.s32.totalorder %s6544_s28, %s4012_s10 }
  0x3e   : > { %3822 = vmatprep.mubr.msk.f32.mxu0 %vm204_vm0, %v4225_v5  ;;  %3828 = vmatpush3.msra.mxu1 %v3660_v4  ;;  %v3681_v15 = vld [vmem:[%s4212_s17 + $0x68] sm:$0xff]  ;;  %v3685_v16 = vld [vmem:[%s4212_s17 + $0x78] sm:$0xff]  ;;  %v3680_v17 = vld [vmem:[%s4212_s17 + $0x60] sm:$0xff]  ;;  %v4352_v52 = vsub.s32 3, %v1472_v42  ;;  %v4358_v55 = vsub.s32 4, %v1472_v42  ;;  %v4360_v56 = vsub.s32 5, %v1472_v42 }
  0x3f   : > { %3829 = vmatprep.mubr.msk.f32.mxu1 %vm204_vm0, %v4225_v5  ;;  %3823 = vmatmul.mubr.msk.f32.vlgmr.msra.gmra.mxu0 %vm204_vm0, %v4230_v6  ;;  %v3684_v18 = vld [vmem:[%s4212_s17 + $0x70] sm:$0xff]  ;;  %v3689_v19 = vld [vmem:[%s4212_s17 + $0x88] sm:$0xff]  ;;  %v3693_v20 = vld [vmem:[%s4212_s17 + $0x98] sm:$0xff]  ;;  %6819 = vst [vmem:[#allocation14_spill] sm:$0xff] %v4346_v49  ;;  %v4362_v58 = vsub.s32 6, %v1472_v42  ;;  %v4364_v59 = vsub.s32 7, %v1472_v42  ;;  %p4014_p13 = pnand %p4013_p11, %p7359_p12 }
  0x40   : > { %3830 = vmatmul.mubr.msk.f32.vlgmr.msra.gmra.mxu1 %vm204_vm0, %v4230_v6  ;;  %3832 = vmatprep.subr.mxu0 %v3665_v7  ;;  %v3688_v21 = vld [vmem:[%s4212_s17 + $0x80] sm:$0xff]  ;;  %v3692_v22 = vld [vmem:[%s4212_s17 + $0x90] sm:$0xff]  ;;  %v3697_v23 = vld [vmem:[%s4212_s17 + $0xa8] sm:$0xff]  ;;  %6820 = vst [vmem:[#allocation15_spill] sm:$0xff] %v4352_v52  ;;  %s4083_s11 = smov [#allocation5]  }
  0x41   : > { %3839 = vmatprep.subr.mxu1 %v3669_v8  ;;  %3833 = vmatpush3.msra.mxu0 %v3665_v7  ;;  %v3701_v24 = vld [vmem:[%s4212_s17 + $0xb8] sm:$0xff]  ;;  %v3696_v25 = vld [vmem:[%s4212_s17 + $0xa0] sm:$0xff]  ;;  %v3700_v26 = vld [vmem:[%s4212_s17 + $0xb0] sm:$0xff]  ;;  %6821 = vst [vmem:[#allocation16_spill] sm:$0xff] %v4358_v55  ;;  %p4015_p4 = pneg %p4014_p13 }
  0x42   : > { %3840 = vmatpush3.msra.mxu1 %v3669_v8  ;;  %3834 = vmatprep.subr.mxu0 %v3664_v9  ;;  %v3705_v27 = vld [vmem:[%s4212_s17 + $0xc8] sm:$0xff]  ;;  %v3709_v28 = vld [vmem:[%s4212_s17 + $0xd8] sm:$0xff]  ;;  %v3704_v29 = vld [vmem:[%s4212_s17 + $0xc0] sm:$0xff]  ;;  %6822 = vst [vmem:[#allocation17_spill] sm:$0xff] %v4360_v56 }
  0x43   : > { %3841 = vmatprep.subr.mxu1 %v3668_v10  ;;  %3835 = vmatpush3.msra.mxu0 %v3664_v9  ;;  %v3708_v30 = vld [vmem:[%s4212_s17 + $0xd0] sm:$0xff]  ;;  %v3713_v31 = vld [vmem:[%s4212_s17 + $0xe8] sm:$0xff]  ;;  %v3717_v32 = vld [vmem:[%s4212_s17 + $0xf8] sm:$0xff]  ;;  %6823 = vst [vmem:[#allocation18_spill] sm:$0xff] %v4362_v58 }
  0x44   : > { %3836 = vmatprep.mubr.msk.f32.mxu0 %vm204_vm0, %v4225_v5  ;;  %3842 = vmatpush3.msra.mxu1 %v3668_v10  ;;  %v3712_v33 = vld [vmem:[%s4212_s17 + $0xe0] sm:$0xff]  ;;  %v3716_v34 = vld [vmem:[%s4212_s17 + $0xf0] sm:$0xff]  ;;  %v191_v36 = vld [vmem:[%s6591_s2 + $0x8] sm:$0xff]  ;;  %6824 = vst [vmem:[#allocation19_spill] sm:$0xff] %v4364_v59  ;;  %s4016_s17 = sshll.u32 %s4083_s11, 4  ;;  %s4017_s17 = int_to_ptr.vmem [resolvable:$false] %s4016_s17 }
  0x45   : > { %3843 = vmatprep.mubr.msk.f32.mxu1 %vm204_vm0, %v4225_v5  ;;  %3837 = vmatmul.mubr.msk.f32.vlgmr.msra.gmra.mxu0 %vm204_vm0, %v4230_v6  ;;  %v190_v35 = vld [vmem:[%s6591_s2] sm:$0xff]  ;;  %s4018_s4 = scalar_lea.vmem %s4017_s17, 8192  ;;  %p4019_p5 = scmp.lt.s32.totalorder %s6544_s28, %s4017_s17 }
  0x46   : > { %3844 = vmatmul.mubr.msk.f32.vlgmr.msra.gmra.mxu1 %vm204_vm0, %v4230_v6  ;;  %3846 = vmatprep.subr.mxu0 %v3673_v11  ;;  %p4020_p7 = scmp.lt.s32.totalorder %s4018_s4, %s4012_s10 }
  0x47   : > { %3853 = vmatprep.subr.mxu1 %v3677_v12  ;;  %3847 = vmatpush3.msra.mxu0 %v3673_v11 }
  0x48   : > { %3854 = vmatpush3.msra.mxu1 %v3677_v12  ;;  %3848 = vmatprep.subr.mxu0 %v3672_v13  ;;  %p4021_p8 = por %p4020_p7, %p4019_p5 }
  0x49   : > { %3855 = vmatprep.subr.mxu1 %v3676_v14  ;;  %3849 = vmatpush3.msra.mxu0 %v3672_v13 }
  0x4a   : > { %3850 = vmatprep.mubr.msk.f32.mxu0 %vm204_vm0, %v4225_v5  ;;  %3856 = vmatpush3.msra.mxu1 %v3676_v14  ;;  %p4022_p10 = pnand %p4021_p8, %p4015_p4 }
  0x4b   : > { %3857 = vmatprep.mubr.msk.f32.mxu1 %vm204_vm0, %v4225_v5  ;;  %3851 = vmatmul.mubr.msk.f32.vlgmr.msra.gmra.mxu0 %vm204_vm0, %v4230_v6 }
  0x4c   : > { %3858 = vmatmul.mubr.msk.f32.vlgmr.msra.gmra.mxu1 %vm204_vm0, %v4230_v6  ;;  %3860 = vmatprep.subr.mxu0 %v3681_v15 }
  0x4d   : > { %3867 = vmatprep.subr.mxu1 %v3685_v16  ;;  %3861 = vmatpush3.msra.mxu0 %v3681_v15 }
  0x4e   : > { %3868 = vmatpush3.msra.mxu1 %v3685_v16  ;;  %3862 = vmatprep.subr.mxu0 %v3680_v17 }
  0x4f   : > { %3869 = vmatprep.subr.mxu1 %v3684_v18  ;;  %3863 = vmatpush3.msra.mxu0 %v3680_v17 }
  0x50   : > { %3864 = vmatprep.mubr.msk.f32.mxu0 %vm204_vm0, %v4225_v5  ;;  %3870 = vmatpush3.msra.mxu1 %v3684_v18 }
  0x51   : > { %3871 = vmatprep.mubr.msk.f32.mxu1 %vm204_vm0, %v4225_v5  ;;  %3865 = vmatmul.mubr.msk.f32.vlgmr.msra.gmra.mxu0 %vm204_vm0, %v4230_v6 }
  0x52   : > { %3872 = vmatmul.mubr.msk.f32.vlgmr.msra.gmra.mxu1 %vm204_vm0, %v4230_v6  ;;  %3874 = vmatprep.subr.mxu0 %v3689_v19 }
  0x53   : > { %3881 = vmatprep.subr.mxu1 %v3693_v20  ;;  %3875 = vmatpush3.msra.mxu0 %v3689_v19 }
  0x54   : > { %3882 = vmatpush3.msra.mxu1 %v3693_v20  ;;  %3876 = vmatprep.subr.mxu0 %v3688_v21 }
  0x55   : > { %3883 = vmatprep.subr.mxu1 %v3692_v22  ;;  %3877 = vmatpush3.msra.mxu0 %v3688_v21 }
  0x56   : > { %3878 = vmatprep.mubr.msk.f32.mxu0 %vm204_vm0, %v4225_v5  ;;  %3884 = vmatpush3.msra.mxu1 %v3692_v22 }
  0x57   : > { %3885 = vmatprep.mubr.msk.f32.mxu1 %vm204_vm0, %v4225_v5  ;;  %3879 = vmatmul.mubr.msk.f32.vlgmr.msra.gmra.mxu0 %vm204_vm0, %v4230_v6 }
  0x58   : > { %3886 = vmatmul.mubr.msk.f32.vlgmr.msra.gmra.mxu1 %vm204_vm0, %v4230_v6  ;;  %3888 = vmatprep.subr.mxu0 %v3697_v23 }
  0x59   : > { %3895 = vmatprep.subr.mxu1 %v3701_v24  ;;  %3889 = vmatpush3.msra.mxu0 %v3697_v23 }
  0x5a   : > { %3896 = vmatpush3.msra.mxu1 %v3701_v24  ;;  %3890 = vmatprep.subr.mxu0 %v3696_v25 }
  0x5b   : > { %3897 = vmatprep.subr.mxu1 %v3700_v26  ;;  %3891 = vmatpush3.msra.mxu0 %v3696_v25 }
  0x5c   : > { %3892 = vmatprep.mubr.msk.f32.mxu0 %vm204_vm0, %v4225_v5  ;;  %3898 = vmatpush3.msra.mxu1 %v3700_v26 }
  0x5d   : > { %3899 = vmatprep.mubr.msk.f32.mxu1 %vm204_vm0, %v4225_v5  ;;  %3893 = vmatmul.mubr.msk.f32.vlgmr.msra.gmra.mxu0 %vm204_vm0, %v4230_v6 }
  0x5e   : > { %3900 = vmatmul.mubr.msk.f32.vlgmr.msra.gmra.mxu1 %vm204_vm0, %v4230_v6  ;;  %3902 = vmatprep.subr.mxu0 %v3705_v27 }
  0x5f   : > { %3909 = vmatprep.subr.mxu1 %v3709_v28  ;;  %3903 = vmatpush3.msra.mxu0 %v3705_v27 }
  0x60   : > { %3910 = vmatpush3.msra.mxu1 %v3709_v28  ;;  %3904 = vmatprep.subr.mxu0 %v3704_v29 }
  0x61   : > { %3911 = vmatprep.subr.mxu1 %v3708_v30  ;;  %3905 = vmatpush3.msra.mxu0 %v3704_v29 }
  0x62   : > { %3906 = vmatprep.mubr.msk.f32.mxu0 %vm204_vm0, %v4225_v5  ;;  %3912 = vmatpush3.msra.mxu1 %v3708_v30 }
  0x63   : > { %3913 = vmatprep.mubr.msk.f32.mxu1 %vm204_vm0, %v4225_v5  ;;  %3907 = vmatmul.mubr.msk.f32.vlgmr.msra.gmra.mxu0 %vm204_vm0, %v4230_v6 }
  0x64   : > { %3914 = vmatmul.mubr.msk.f32.vlgmr.msra.gmra.mxu1 %vm204_vm0, %v4230_v6  ;;  %3916 = vmatprep.subr.mxu0 %v3713_v31 }
  0x65   : > { %3923 = vmatprep.subr.mxu1 %v3717_v32  ;;  %3917 = vmatpush3.msra.mxu0 %v3713_v31 }
  0x66   : > { %3924 = vmatpush3.msra.mxu1 %v3717_v32  ;;  %3918 = vmatprep.subr.mxu0 %v3712_v33 }
  0x67   : > { %3925 = vmatprep.subr.mxu1 %v3716_v34  ;;  %3919 = vmatpush3.msra.mxu0 %v3712_v33 }
  0x68   : > { %3920 = vmatprep.mubr.msk.f32.mxu0 %vm204_vm0, %v4225_v5  ;;  %3926 = vmatpush3.msra.mxu1 %v3716_v34 }
  0x69   : > { %3927 = vmatprep.mubr.msk.f32.mxu1 %vm204_vm0, %v4225_v5  ;;  %3921 = vmatmul.mubr.msk.f32.vlgmr.msra.gmra.mxu0 %vm204_vm0, %v4230_v6 }
  0x6a   : > { %3928 = vmatmul.mubr.msk.f32.vlgmr.msra.gmra.mxu1 %vm204_vm0, %v4230_v6  ;;  %196 = vperm.xlu0 %3983, %v190_v35  }
  0x6e   : > { %201 = vperm.xlu0 %3983, %v191_v36  }
  0xe5   : > { %v4330_v37 = vpop.permute.xlu0 %196 }
  0xe6   : > { %6813 = vst [vmem:[#allocation8_spill] sm:$0xff] %v4330_v37 }
  0xe9   : > { %v4332_v44 = vpop.permute.xlu0 %201 }
  0xea   : > { %6814 = vst [vmem:[#allocation9_spill] sm:$0xff] %v4332_v44 }
  0xff   : > { %v3824_v38 = vpop.f32.mrf.mxu0 }
 0x100   : > { %v3831_v39 = vpop.f32.mrf.mxu1  ;;  %v4341_v47 = vadd.f32 %v3824_v38, %v4332_v44 }
 0x101   : > { %v277_v41 = vpop.f32.mrf.mxu0  ;;  %v4344_v48 = vadd.f32 %v3831_v39, %v4332_v44 }
 0x102   : > { %v356_v43 = vpop.f32.mrf.mxu1  ;;  %v4335_v45 = vadd.f32 %v277_v41, %v4330_v37  ;;  %6817 = vst [vmem:[#allocation12_spill] sm:$0xff] %v4341_v47  ;;  %v4372_v62 = vrot.slane %v4341_v47, %v4346_v49  ;;  %v4380_v0 = vrot.slane %v4341_v47, %v4348_v50  ;;  %v4396_v5 = vrot.slane %v4341_v47, %v4350_v51 }
 0x103   : > { %v4338_v46 = vadd.f32 %v356_v43, %v4330_v37  ;;  %6818 = vst [vmem:[#allocation13_spill] sm:$0xff] %v4344_v48  ;;  %v4376_v63 = vrot.slane %v4344_v48, %v4346_v49  ;;  %v4384_v1 = vrot.slane %v4344_v48, %v4348_v50  ;;  %v4400_v6 = vrot.slane %v4344_v48, %v4350_v51 }
 0x104   : > { %6815 = vst [vmem:[#allocation10_spill] sm:$0xff] %v4335_v45  ;;  %v1474_v53 = vrot.slane %v4335_v45, %v4346_v49  ;;  %v1480_v54 = vrot.slane %v4335_v45, %v4348_v50  ;;  %6825 = vst [vmem:[#allocation20_spill] sm:$0xff] %v4372_v62  ;;  %v4388_v2 = vrot.slane %v4335_v45, %v4350_v51 }
 0x105   : > { %6816 = vst [vmem:[#allocation11_spill] sm:$0xff] %v4338_v46  ;;  %v3838_v57 = vpop.f32.mrf.mxu0  ;;  %v1602_v60 = vrot.slane %v4338_v46, %v4346_v49  ;;  %v1608_v61 = vrot.slane %v4338_v46, %v4348_v50  ;;  %6826 = vst [vmem:[#allocation21_spill] sm:$0xff] %v4376_v63  ;;  %v4392_v3 = vrot.slane %v4335_v45, %v4352_v52 }
 0x106   : > { %6827 = vst [vmem:[#allocation22_spill] sm:$0xff] %v4380_v0  ;;  %6828 = vst [vmem:[#allocation23_spill] sm:$0xff] %v4384_v1  ;;  %v3845_v4 = vpop.f32.mrf.mxu1  ;;  %v1475_v7 = vmul.f32 %v1474_v53, %v4335_v45  ;;  %v4405_v8 = vrot.slane %v4335_v45, %v4358_v55  ;;  %v4409_v9 = vrot.slane %v4335_v45, %v4360_v56 }
 0x107   : > { %6829 = vst [vmem:[#allocation24_spill] sm:$0xff] %v4396_v5  ;;  %6830 = vst [vmem:[#allocation25_spill] sm:$0xff] %v4400_v6  ;;  %v1481_v10 = vmul.f32 %v1480_v54, %v4338_v46  ;;  %v435_v11 = vpop.f32.mrf.mxu0  ;;  %v1476_v12 = vmul.f32 %v1474_v53, %v4341_v47  ;;  %v1482_v13 = vmul.f32 %v1480_v54, %v4344_v48 }
 0x108   : > { %v1604_v14 = vmul.f32 %v1602_v60, %v4341_v47  ;;  %v1610_v15 = vmul.f32 %v1608_v61, %v4344_v48  ;;  %v1603_v16 = vmul.f32 %v1602_v60, %v4335_v45  ;;  %v1609_v17 = vmul.f32 %v1608_v61, %v4338_v46  ;;  %v514_v24 = vpop.f32.mrf.mxu1 }
 0x109   : > { %v1616_v18 = vrot.slane %v4338_v46, %v4350_v51  ;;  %v4421_v19 = vadd.f32 %v3838_v57, %v4332_v44  ;;  %v4425_v20 = vrot.slane %v4335_v45, %v4362_v58  ;;  %v4429_v21 = vrot.slane %v4335_v45, %v4364_v59 }
 0x10a   : > { %v4433_v22 = vrot.slane %v4338_v46, %v4352_v52  ;;  %v4436_v23 = vadd.f32 %v435_v11, %v4330_v37  ;;  %v1483_v25 = vadd.f32 %v1481_v10, %v1475_v7  ;;  %v4440_v26 = vrot.slane %v4338_v46, %v4358_v55 }
 0x10b   : > { %6831 = vst [vmem:[#allocation26_spill] sm:$0xff] %v4421_v19  ;;  %6832 = vst [vmem:[#allocation27_spill] sm:$0xff] %v4429_v21  ;;  %v4444_v27 = vrot.slane %v4338_v46, %v4360_v56  ;;  %v4448_v28 = vrot.slane %v4338_v46, %v4362_v58  ;;  %v4452_v29 = vrot.slane %v4338_v46, %v4364_v59 }
 0x10c   : > { %6833 = vst [vmem:[#allocation28_spill] sm:$0xff] %v4436_v23  ;;  %v1484_v30 = vadd.f32 %v1482_v13, %v1476_v12  ;;  %v1612_v31 = vadd.f32 %v1610_v15, %v1604_v14  ;;  %v4455_v32 = vadd.f32 %v3845_v4, %v4332_v44  ;;  %v1611_v33 = vadd.f32 %v1609_v17, %v1603_v16 }
 0x10d   : > { %6834 = vst [vmem:[#allocation29_spill] sm:$0xff] %v4452_v29  ;;  %v1490_v34 = vmul.f32 %v4388_v2, %v4421_v19  ;;  %v1618_v35 = vmul.f32 %v1616_v18, %v4421_v19  ;;  %v4461_v36 = vadd.f32 %v514_v24, %v4330_v37  ;;  %v4465_v38 = vrot.slane %v4421_v19, %v4346_v49 }
 0x10e   : > { %6835 = vst [vmem:[#allocation30_spill] sm:$0xff] %v4455_v32  ;;  %v4469_v39 = vrot.slane %v4421_v19, %v4348_v50  ;;  %v1731_v40 = vrot.slane %v4436_v23, %v4346_v49  ;;  %v1737_v41 = vrot.slane %v4436_v23, %v4348_v50  ;;  %v4477_v42 = vrot.slane %v4421_v19, %v4350_v51 }
 0x10f   : > { %6836 = vst [vmem:[#allocation31_spill] sm:$0xff] %v4461_v36  ;;  %6837 = vst [vmem:[#allocation32_spill] sm:$0xff] %v4465_v38  ;;  %v4481_v43 = vrot.slane %v4421_v19, %v4352_v52  ;;  %v4485_v53 = vrot.slane %v4421_v19, %v4358_v55  ;;  %v4489_v54 = vrot.slane %v4421_v19, %v4360_v56 }
 0x110   : > { %6838 = vst [vmem:[#allocation33_spill] sm:$0xff] %v4469_v39  ;;  %6839 = vst [vmem:[#allocation34_spill] sm:$0xff] %v4477_v42  ;;  %v1492_v57 = vadd.f32 %v1490_v34, %v1484_v30  ;;  %v1620_v60 = vadd.f32 %v1618_v35, %v1612_v31  ;;  %v4493_v61 = vrot.slane %v4421_v19, %v4362_v58 }
 0x111   : > { %6840 = vst [vmem:[#allocation35_spill] sm:$0xff] %v4481_v43  ;;  %6841 = vst [vmem:[#allocation36_spill] sm:$0xff] %v4485_v53  ;;  %v4497_v4 = vrot.slane %v4421_v19, %v4364_v59  ;;  %v1498_v7 = vmul.f32 %v4392_v3, %v4455_v32  ;;  %v1626_v10 = vmul.f32 %v4433_v22, %v4455_v32 }
 0x112   : > { %6842 = vst [vmem:[#allocation37_spill] sm:$0xff] %v4489_v54  ;;  %6843 = vst [vmem:[#allocation38_spill] sm:$0xff] %v4493_v61  ;;  %v4505_v11 = vrot.slane %v4455_v32, %v4346_v49  ;;  %v4509_v12 = vrot.slane %v4455_v32, %v4348_v50  ;;  %v1732_v13 = vmul.f32 %v1731_v40, %v4335_v45 }
 0x113   : > { %6844 = vst [vmem:[#allocation39_spill] sm:$0xff] %v4497_v4  ;;  %v1738_v14 = vmul.f32 %v1737_v41, %v4338_v46  ;;  %v1860_v15 = vrot.slane %v4461_v36, %v4346_v49  ;;  %v1866_v16 = vrot.slane %v4461_v36, %v4348_v50  ;;  %v4519_v17 = vrot.slane %v4455_v32, %v4350_v51 }
 0x114   : > { %6845 = vst [vmem:[#allocation40_spill] sm:$0xff] %v4505_v11  ;;  %6846 = vst [vmem:[#allocation41_spill] sm:$0xff] %v4509_v12  ;;  %v4523_v24 = vrot.slane %v4455_v32, %v4352_v52  ;;  %v1733_v30 = vmul.f32 %v1731_v40, %v4341_v47  ;;  %v1739_v31 = vmul.f32 %v1737_v41, %v4344_v48 }
 0x115   : > { %6847 = vst [vmem:[#allocation42_spill] sm:$0xff] %v4519_v17  ;;  %v4529_v34 = vrot.slane %v4455_v32, %v4358_v55  ;;  %v1745_v35 = vrot.slane %v4436_v23, %v4350_v51  ;;  %v1862_v4 = vmul.f32 %v1860_v15, %v4341_v47  ;;  %v1868_v61 = vmul.f32 %v1866_v16, %v4344_v48 }
 0x116   : > { %6848 = vst [vmem:[#allocation43_spill] sm:$0xff] %v4523_v24  ;;  %v1500_v54 = vadd.f32 %v1498_v7, %v1492_v57  ;;  %v4537_v53 = vrot.slane %v4455_v32, %v4360_v56  ;;  %v1489_v40 = vmul.f32 %v4388_v2, %v4436_v23  ;;  %v1874_v41 = vrot.slane %v4461_v36, %v4350_v51 }
 0x117   : > { %6849 = vst [vmem:[#allocation44_spill] sm:$0xff] %v4529_v34  ;;  %v1617_v34 = vmul.f32 %v1616_v18, %v4436_v23  ;;  %v1740_v24 = vadd.f32 %v1738_v14, %v1732_v13  ;;  %v1861_v43 = vmul.f32 %v1860_v15, %v4335_v45  ;;  %v1867_v17 = vmul.f32 %v1866_v16, %v4338_v46  ;;  %v3852_v14 = vpop.f32.mrf.mxu0 }
 0x118   : > { %6850 = vst [vmem:[#allocation45_spill] sm:$0xff] %v4537_v53  ;;  %v1628_v42 = vadd.f32 %v1626_v10, %v1620_v60  ;;  %v1741_v6 = vadd.f32 %v1739_v31, %v1733_v30  ;;  %v1753_v57 = vrot.slane %v4436_v23, %v4352_v52  ;;  %v1870_v7 = vadd.f32 %v1868_v61, %v1862_v4 }
 0x119   : > { %v4550_v53 = vrot.slane %v4455_v32, %v4362_v58  ;;  %v4554_v2 = vrot.slane %v4455_v32, %v4364_v59  ;;  %v1746_v18 = vmul.f32 %v1745_v35, %v4436_v23  ;;  %v4559_v13 = vrot.slane %v4436_v23, %v4358_v55 }
 0x11a   : > { %v1747_v60 = vmul.f32 %v1745_v35, %v4421_v19  ;;  %v4564_v10 = vrot.slane %v4436_v23, %v4360_v56  ;;  %v1876_v61 = vmul.f32 %v1874_v41, %v4421_v19  ;;  %v1882_v4 = vrot.slane %v4461_v36, %v4352_v52 }
 0x11b   : > { %6851 = vst [vmem:[#allocation46_spill] sm:$0xff] %v4550_v53  ;;  %6852 = vst [vmem:[#allocation47_spill] sm:$0xff] %v4554_v2  ;;  %v1491_v15 = vadd.f32 %v1489_v40, %v1483_v25  ;;  %v1619_v16 = vadd.f32 %v1617_v34, %v1611_v33  ;;  %v1748_v30 = vadd.f32 %v1746_v18, %v1740_v24  ;;  %v3859_v33 = vpop.f32.mrf.mxu1  ;;  %v593_v40 = vpop.f32.mrf.mxu0 }
 0x11c   : > { %v1869_v31 = vadd.f32 %v1867_v17, %v1861_v43  ;;  %v1749_v2 = vadd.f32 %v1747_v60, %v1741_v6  ;;  %v1755_v53 = vmul.f32 %v1753_v57, %v4455_v32  ;;  %v1497_v35 = vmul.f32 %v4392_v3, %v4461_v36 }
 0x11d   : > { %v1878_v5 = vadd.f32 %v1876_v61, %v1870_v7  ;;  %v1625_v12 = vmul.f32 %v4433_v22, %v4461_v36  ;;  %v1754_v39 = vmul.f32 %v1753_v57, %v4461_v36  ;;  %v1875_v1 = vmul.f32 %v1874_v41, %v4436_v23 }
 0x11e   : > { %v4577_v0 = vadd.f32 %v3852_v14, %v4332_v44  ;;  %v4581_v25 = vrot.slane %v4436_v23, %v4362_v58  ;;  %v4585_v6 = vrot.slane %v4436_v23, %v4364_v59  ;;  %v1884_v3 = vmul.f32 %v1882_v4, %v4455_v32 }
 0x11f   : > { %v4590_v22 = vrot.slane %v4461_v36, %v4358_v55  ;;  %v4592_v43 = vadd.f32 %v1497_v35, %v1491_v15  ;;  %v4594_v17 = vadd.f32 %v1625_v12, %v1619_v16  ;;  %v4596_v24 = vadd.f32 %v1754_v39, %v1748_v30 }
 0x120   : > { %6853 = vst [vmem:[#allocation48_spill] sm:$0xff] %v4577_v0  ;;  %6854 = vst [vmem:[#allocation49_spill] sm:$0xff] %v4585_v6  ;;  %v1877_v34 = vadd.f32 %v1875_v1, %v1869_v31  ;;  %v1883_v41 = vmul.f32 %v1882_v4, %v4461_v36  ;;  %v4601_v57 = vrot.slane %v4461_v36, %v4360_v56 }
 0x121   : > { %v1757_v7 = vadd.f32 %v1755_v53, %v1749_v2  ;;  %v1886_v18 = vadd.f32 %v1884_v3, %v1878_v5  ;;  %v4605_v60 = vrot.slane %v4461_v36, %v4362_v58  ;;  %v4609_v12 = vrot.slane %v4461_v36, %v4364_v59 }
 0x122   : > { %v1506_v1 = vmul.f32 %v4405_v8, %v4577_v0  ;;  %v4614_v39 = vadd.f32 %v3859_v33, %v4332_v44  ;;  %v1634_v61 = vmul.f32 %v4440_v26, %v4577_v0  ;;  %v1763_v5 = vmul.f32 %v4559_v13, %v4577_v0 }
 0x123   : > { %6855 = vst [vmem:[#allocation50_spill] sm:$0xff] %v4609_v12  ;;  %v1892_v53 = vmul.f32 %v4590_v22, %v4577_v0  ;;  %v4623_v2 = vadd.f32 %v593_v40, %v4330_v37  ;;  %v4625_v4 = vadd.f32 %v1883_v41, %v1877_v34  ;;  %v4629_v15 = vrot.slane %v4577_v0, %v4346_v49 }
 0x124   : > { %6856 = vst [vmem:[#allocation51_spill] sm:$0xff] %v4614_v39  ;;  %v1508_v14 = vadd.f32 %v1506_v1, %v1500_v54  ;;  %v4633_v16 = vrot.slane %v4577_v0, %v4348_v50  ;;  %v1636_v30 = vadd.f32 %v1634_v61, %v1628_v42  ;;  %v1765_v31 = vadd.f32 %v1763_v5, %v1757_v7  ;;  %v672_v1 = vpop.f32.mrf.mxu1 }
 0x125   : > { %6857 = vst [vmem:[#allocation52_spill] sm:$0xff] %v4623_v2  ;;  %6858 = vst [vmem:[#allocation53_spill] sm:$0xff] %v4629_v15  ;;  %v1894_v35 = vadd.f32 %v1892_v53, %v1886_v18  ;;  %v4637_v3 = vrot.slane %v4577_v0, %v4350_v51  ;;  %v4641_v33 = vrot.slane %v4577_v0, %v4352_v52 }
 0x126   : > { %6859 = vst [vmem:[#allocation54_spill] sm:$0xff] %v4633_v16  ;;  %v4645_v54 = vrot.slane %v4577_v0, %v4358_v55  ;;  %v1989_v34 = vrot.slane %v4623_v2, %v4346_v49  ;;  %v1995_v42 = vrot.slane %v4623_v2, %v4348_v50  ;;  %v4653_v40 = vrot.slane %v4577_v0, %v4360_v56 }
 0x127   : > { %6860 = vst [vmem:[#allocation55_spill] sm:$0xff] %v4637_v3  ;;  %6861 = vst [vmem:[#allocation56_spill] sm:$0xff] %v4641_v33  ;;  %v4657_v41 = vrot.slane %v4577_v0, %v4362_v58  ;;  %v1514_v7 = vmul.f32 %v4409_v9, %v4614_v39  ;;  %v1642_v18 = vmul.f32 %v4444_v27, %v4614_v39 }
 0x128   : > { %6862 = vst [vmem:[#allocation57_spill] sm:$0xff] %v4645_v54  ;;  %6863 = vst [vmem:[#allocation58_spill] sm:$0xff] %v4653_v40  ;;  %v1990_v61 = vmul.f32 %v1989_v34, %v4335_v45  ;;  %v1991_v5 = vmul.f32 %v1989_v34, %v4341_v47  ;;  %v1996_v53 = vmul.f32 %v1995_v42, %v4338_v46  ;;  %v3866_v40 = vpop.f32.mrf.mxu0 }
 0x129   : > { %6864 = vst [vmem:[#allocation59_spill] sm:$0xff] %v4657_v41  ;;  %v1997_v54 = vmul.f32 %v1995_v42, %v4344_v48  ;;  %v4669_v33 = vrot.slane %v4577_v0, %v4364_v59  ;;  %v1771_v41 = vmul.f32 %v4564_v10, %v4614_v39  ;;  %v1900_v3 = vmul.f32 %v4601_v57, %v4614_v39 }
 0x12a   : > { %v4677_v16 = vrot.slane %v4614_v39, %v4346_v49  ;;  %v4679_v34 = vadd.f32 %v1514_v7, %v1508_v14  ;;  %v4681_v15 = vadd.f32 %v1642_v18, %v1636_v30  ;;  %v4685_v42 = vrot.slane %v4614_v39, %v4348_v50  ;;  %v3873_v30 = vpop.f32.mrf.mxu1 }
 0x12b   : > { %6865 = vst [vmem:[#allocation60_spill] sm:$0xff] %v4669_v33  ;;  %v2003_v33 = vrot.slane %v4623_v2, %v4350_v51  ;;  %v4689_v11 = vadd.f32 %v1771_v41, %v1765_v31  ;;  %v4693_v38 = vrot.slane %v4614_v39, %v4350_v51  ;;  %v4700_v14 = vadd.f32 %v672_v1, %v4330_v37 }
 0x12c   : > { %6866 = vst [vmem:[#allocation61_spill] sm:$0xff] %v4677_v16  ;;  %6867 = vst [vmem:[#allocation62_spill] sm:$0xff] %v4685_v42  ;;  %v4697_v16 = vrot.slane %v4614_v39, %v4352_v52  ;;  %v4702_v7 = vadd.f32 %v1900_v3, %v1894_v35  ;;  %v4706_v18 = vrot.slane %v4614_v39, %v4358_v55  ;;  %v751_v42 = vpop.f32.mrf.mxu0 }
 0x12d   : > { %6868 = vst [vmem:[#allocation63_spill] sm:$0xff] %v4693_v38  ;;  %6870 = vst [vmem:[#allocation65_spill] sm:$0xff] %v4700_v14  ;;  %v1998_v31 = vadd.f32 %v1996_v53, %v1990_v61  ;;  %v1999_v41 = vadd.f32 %v1997_v54, %v1991_v5  ;;  %v4710_v38 = vrot.slane %v4614_v39, %v4360_v56 }
 0x12e   : > { %6869 = vst [vmem:[#allocation64_spill] sm:$0xff] %v4697_v16  ;;  %6871 = vst [vmem:[#allocation66_spill] sm:$0xff] %v4706_v18  ;;  %v4714_v16 = vrot.slane %v4614_v39, %v4362_v58  ;;  %v4718_v1 = vrot.slane %v4614_v39, %v4364_v59  ;;  %v4721_v35 = vadd.f32 %v3866_v40, %v4332_v44 }
 0x12f   : > { %6872 = vst [vmem:[#allocation67_spill] sm:$0xff] %v4710_v38  ;;  %v2004_v3 = vmul.f32 %v2003_v33, %v4436_v23  ;;  %v2005_v54 = vmul.f32 %v2003_v33, %v4421_v19  ;;  %v2011_v61 = vrot.slane %v4623_v2, %v4352_v52  ;;  %v4728_v5 = vadd.f32 %v3873_v30, %v4332_v44  ;;  %v830_v38 = vpop.f32.mrf.mxu1 }
 0x130   : > { %6873 = vst [vmem:[#allocation68_spill] sm:$0xff] %v4714_v16  ;;  %6874 = vst [vmem:[#allocation69_spill] sm:$0xff] %v4718_v1  ;;  %v2118_v53 = vrot.slane %v4700_v14, %v4346_v49  ;;  %v2124_v16 = vrot.slane %v4700_v14, %v4348_v50  ;;  %v2132_v40 = vrot.slane %v4700_v14, %v4350_v51 }
 0x131   : > { %6875 = vst [vmem:[#allocation70_spill] sm:$0xff] %v4721_v35  ;;  %6876 = vst [vmem:[#allocation71_spill] sm:$0xff] %v4728_v5  ;;  %v4737_v1 = vadd.f32 %v751_v42, %v4330_v37  ;;  %v1505_v33 = vmul.f32 %v4405_v8, %v4623_v2  ;;  %v1633_v30 = vmul.f32 %v4440_v26, %v4623_v2 }
 0x132   : > { %v2006_v18 = vadd.f32 %v2004_v3, %v1998_v31  ;;  %v2007_v63 = vadd.f32 %v2005_v54, %v1999_v41  ;;  %v2119_v62 = vmul.f32 %v2118_v53, %v4335_v45  ;;  %v2120_v44 = vmul.f32 %v2118_v53, %v4341_v47 }
 0x133   : > { %6877 = vst [vmem:[#allocation72_spill] sm:$0xff] %v4737_v1  ;;  %v2125_v12 = vmul.f32 %v2124_v16, %v4338_v46  ;;  %v2126_v6 = vmul.f32 %v2124_v16, %v4344_v48  ;;  %v2012_v42 = vmul.f32 %v2011_v61, %v4461_v36  ;;  %v2013_v29 = vmul.f32 %v2011_v61, %v4455_v32 }
 0x134   : > { %v2019_v8 = vrot.slane %v4623_v2, %v4358_v55  ;;  %v4752_v21 = vadd.f32 %v830_v38, %v4330_v37  ;;  %v2134_v41 = vmul.f32 %v2132_v40, %v4421_v19  ;;  %v2140_v3 = vrot.slane %v4700_v14, %v4352_v52 }
 0x135   : > { %v2127_v26 = vadd.f32 %v2125_v12, %v2119_v62  ;;  %v2128_v31 = vadd.f32 %v2126_v6, %v2120_v44  ;;  %v1507_v54 = vadd.f32 %v1505_v33, %v4592_v43  ;;  %v1762_v16 = vmul.f32 %v4559_v13, %v4623_v2 }
 0x136   : > { %6878 = vst [vmem:[#allocation73_spill] sm:$0xff] %v4752_v21  ;;  %v1891_v61 = vmul.f32 %v4590_v22, %v4623_v2  ;;  %v2133_v53 = vmul.f32 %v2132_v40, %v4436_v23  ;;  %v1635_v38 = vadd.f32 %v1633_v30, %v4594_v17  ;;  %v2014_v37 = vadd.f32 %v2012_v42, %v2006_v18 }
 0x137   : > { %v2015_v62 = vadd.f32 %v2013_v29, %v2007_v63  ;;  %v2136_v44 = vadd.f32 %v2134_v41, %v2128_v31  ;;  %v1764_v6 = vadd.f32 %v1762_v16, %v4596_v24  ;;  %v2027_v43 = vrot.slane %v4623_v2, %v4360_v56 }
 0x138   : > { %v1893_v12 = vadd.f32 %v1891_v61, %v4625_v4  ;;  %v2135_v33 = vadd.f32 %v2133_v53, %v2127_v26  ;;  %v2020_v13 = vmul.f32 %v2019_v8, %v4623_v2  ;;  %v2021_v21 = vmul.f32 %v2019_v8, %v4577_v0 }
 0x139   : > { %v2142_v22 = vmul.f32 %v2140_v3, %v4455_v32  ;;  %v2148_v17 = vrot.slane %v4700_v14, %v4358_v55  ;;  %v4775_v63 = vrot.slane %v4623_v2, %v4362_v58  ;;  %v4779_v29 = vrot.slane %v4623_v2, %v4364_v59 }
 0x13a   : > { %v1513_v24 = vmul.f32 %v4409_v9, %v4700_v14  ;;  %v2141_v4 = vmul.f32 %v2140_v3, %v4461_v36  ;;  %v2022_v18 = vadd.f32 %v2020_v13, %v2014_v37  ;;  %v2023_v40 = vadd.f32 %v2021_v21, %v2015_v62 }
 0x13b   : > { %6879 = vst [vmem:[#allocation74_spill] sm:$0xff] %v4779_v29  ;;  %v1641_v30 = vmul.f32 %v4444_v27, %v4700_v14  ;;  %v2144_v42 = vadd.f32 %v2142_v22, %v2136_v44  ;;  %v2029_v8 = vmul.f32 %v2027_v43, %v4614_v39  ;;  %v1770_v31 = vmul.f32 %v4564_v10, %v4700_v14 }
 0x13c   : > { %v4787_v26 = vadd.f32 %v1513_v24, %v1507_v54  ;;  %v2143_v41 = vadd.f32 %v2141_v4, %v2135_v33  ;;  %v1899_v16 = vmul.f32 %v4601_v57, %v4700_v14  ;;  %v2028_v9 = vmul.f32 %v2027_v43, %v4700_v14 }
 0x13d   : > { %v2150_v37 = vmul.f32 %v2148_v17, %v4577_v0  ;;  %v2156_v21 = vrot.slane %v4700_v14, %v4360_v56  ;;  %v4797_v27 = vadd.f32 %v1641_v30, %v1635_v38  ;;  %v4799_v3 = vadd.f32 %v1770_v31, %v1764_v6 }
 0x13e   : > { %v2149_v54 = vmul.f32 %v2148_v17, %v4623_v2  ;;  %v4804_v10 = vrot.slane %v4700_v14, %v4362_v58  ;;  %v4806_v61 = vadd.f32 %v1899_v16, %v1893_v12  ;;  %v4808_v57 = vadd.f32 %v2028_v9, %v2022_v18 }
 0x13f   : > { %v2152_v53 = vadd.f32 %v2150_v37, %v2144_v42  ;;  %v2031_v62 = vadd.f32 %v2029_v8, %v2023_v40  ;;  %v4812_v43 = vrot.slane %v4700_v14, %v4364_v59  ;;  %v1522_v38 = vmul.f32 %v4425_v20, %v4721_v35 }
 0x140   : > { %v2151_v44 = vadd.f32 %v2149_v54, %v2143_v41  ;;  %v1650_v6 = vmul.f32 %v4448_v28, %v4721_v35  ;;  %v2158_v33 = vmul.f32 %v2156_v21, %v4614_v39  ;;  %v1779_v12 = vmul.f32 %v4581_v25, %v4721_v35 }
 0x141   : > { %v1908_v13 = vmul.f32 %v4605_v60, %v4721_v35  ;;  %v2037_v22 = vmul.f32 %v4775_v63, %v4721_v35  ;;  %v2157_v17 = vmul.f32 %v2156_v21, %v4700_v14  ;;  %v1524_v24 = vadd.f32 %v1522_v38, %v4679_v34  ;;  %v6889_v38 = vld [vmem:[#allocation29_spill] sm:$0xff] }
 0x142   : > { %v1652_v4 = vadd.f32 %v1650_v6, %v4681_v15  ;;  %v2166_v18 = vmul.f32 %v4804_v10, %v4721_v35  ;;  %v1781_v40 = vadd.f32 %v1779_v12, %v4689_v11  ;;  %v2160_v8 = vadd.f32 %v2158_v33, %v2152_v53  ;;  %v6888_v53 = vld [vmem:[#allocation27_spill] sm:$0xff] }
 0x143   : > { %v1910_v30 = vadd.f32 %v1908_v13, %v4702_v7  ;;  %v2039_v42 = vadd.f32 %v2037_v22, %v2031_v62  ;;  %v4832_v31 = vadd.f32 %v2157_v17, %v2151_v44  ;;  %v4836_v41 = vrot.slane %v4721_v35, %v4346_v49  ;;  %v6890_v13 = vld [vmem:[#allocation49_spill] sm:$0xff] }
 0x144   : > { %v4840_v34 = vrot.slane %v4721_v35, %v4348_v50  ;;  %v4844_v15 = vrot.slane %v4721_v35, %v4350_v51  ;;  %v4848_v11 = vrot.slane %v4721_v35, %v4352_v52  ;;  %v4852_v7 = vrot.slane %v4721_v35, %v4358_v55 }
 0x145   : > { %6880 = vst [vmem:[#allocation75_spill] sm:$0xff] %v4836_v41  ;;  %v2247_v16 = vrot.slane %v4737_v1, %v4346_v49  ;;  %v2253_v9 = vrot.slane %v4737_v1, %v4348_v50  ;;  %v4860_v37 = vrot.slane %v4721_v35, %v4360_v56  ;;  %v4864_v21 = vrot.slane %v4721_v35, %v4362_v58 }
 0x146   : > { %6881 = vst [vmem:[#allocation76_spill] sm:$0xff] %v4840_v34  ;;  %6882 = vst [vmem:[#allocation77_spill] sm:$0xff] %v4844_v15  ;;  %v4868_v54 = vrot.slane %v4721_v35, %v4364_v59  ;;  %v1530_v62 = vmul.f32 %v6888_v53, %v4728_v5  ;;  %v2168_v44 = vadd.f32 %v2166_v18, %v2160_v8  ;;  %v6892_v18 = vld [vmem:[#allocation50_spill] sm:$0xff] }
 0x147   : > { %6883 = vst [vmem:[#allocation78_spill] sm:$0xff] %v4848_v11  ;;  %6884 = vst [vmem:[#allocation79_spill] sm:$0xff] %v4852_v7  ;;  %v1658_v6 = vmul.f32 %v6889_v38, %v4728_v5  ;;  %v2248_v33 = vmul.f32 %v2247_v16, %v4335_v45  ;;  %v2249_v12 = vmul.f32 %v2247_v16, %v4341_v47 }
 0x148   : > { %6885 = vst [vmem:[#allocation80_spill] sm:$0xff] %v4860_v37  ;;  %6886 = vst [vmem:[#allocation81_spill] sm:$0xff] %v4864_v21  ;;  %v1787_v22 = vmul.f32 %v6890_v13, %v4728_v5  ;;  %v2254_v17 = vmul.f32 %v2253_v9, %v4338_v46  ;;  %v2255_v21 = vmul.f32 %v2253_v9, %v4344_v48 }
 0x149   : > { %6887 = vst [vmem:[#allocation82_spill] sm:$0xff] %v4868_v54  ;;  %v2261_v54 = vrot.slane %v4737_v1, %v4350_v51  ;;  %v4882_v37 = vadd.f32 %v1530_v62, %v1524_v24  ;;  %v1916_v8 = vmul.f32 %v6892_v18, %v4728_v5  ;;  %v2045_v7 = vmul.f32 %v4779_v29, %v4728_v5 }
 0x14a   : > { %v2174_v16 = vmul.f32 %v4812_v43, %v4728_v5  ;;  %v4890_v11 = vadd.f32 %v1658_v6, %v1652_v4  ;;  %v4894_v15 = vrot.slane %v4728_v5, %v4346_v49  ;;  %v2256_v9 = vadd.f32 %v2254_v17, %v2248_v33 }
 0x14b   : > { %6891 = vst [vmem:[#allocation27_spill] sm:$0xff] %v4882_v37  ;;  %v2257_v34 = vadd.f32 %v2255_v21, %v2249_v12  ;;  %v4896_v41 = vadd.f32 %v1787_v22, %v1781_v40  ;;  %v4898_v24 = vadd.f32 %v1916_v8, %v1910_v30  ;;  %v4900_v62 = vadd.f32 %v2045_v7, %v2039_v42 }
 0x14c   : > { %v4904_v37 = vrot.slane %v4728_v5, %v4348_v50  ;;  %v4906_v29 = vadd.f32 %v2174_v16, %v2168_v44  ;;  %v2262_v4 = vmul.f32 %v2261_v54, %v4436_v23  ;;  %v2263_v6 = vmul.f32 %v2261_v54, %v4421_v19 }
 0x14d   : > { %v2269_v33 = vrot.slane %v4737_v1, %v4352_v52  ;;  %v4914_v40 = vrot.slane %v4728_v5, %v4350_v51  ;;  %v4918_v30 = vrot.slane %v4728_v5, %v4352_v52  ;;  %v1521_v42 = vmul.f32 %v4425_v20, %v4737_v1 }
 0x14e   : > { %v1649_v7 = vmul.f32 %v4448_v28, %v4737_v1  ;;  %v4926_v21 = vrot.slane %v4728_v5, %v4358_v55  ;;  %v4930_v54 = vrot.slane %v4728_v5, %v4360_v56  ;;  %v2264_v44 = vadd.f32 %v2262_v4, %v2256_v9 }
 0x14f   : > { %6893 = vst [vmem:[#allocation29_spill] sm:$0xff] %v4914_v40  ;;  %6894 = vst [vmem:[#allocation49_spill] sm:$0xff] %v4918_v30  ;;  %v2265_v12 = vadd.f32 %v2263_v6, %v2257_v34  ;;  %v4934_v22 = vrot.slane %v4728_v5, %v4362_v58  ;;  %v4938_v20 = vrot.slane %v4728_v5, %v4364_v59 }
 0x150   : > { %6895 = vst [vmem:[#allocation50_spill] sm:$0xff] %v4926_v21  ;;  %6896 = vst [vmem:[#allocation83_spill] sm:$0xff] %v4930_v54  ;;  %v1778_v28 = vmul.f32 %v4581_v25, %v4737_v1  ;;  %v1907_v17 = vmul.f32 %v4605_v60, %v4737_v1  ;;  %v2036_v8 = vmul.f32 %v4775_v63, %v4737_v1  ;;  %v6899_v63 = vld [vmem:[#allocation73_spill] sm:$0xff] }
 0x151   : > { %6897 = vst [vmem:[#allocation84_spill] sm:$0xff] %v4934_v22  ;;  %6898 = vst [vmem:[#allocation85_spill] sm:$0xff] %v4938_v20  ;;  %v2270_v16 = vmul.f32 %v2269_v33, %v4461_v36  ;;  %v2271_v34 = vmul.f32 %v2269_v33, %v4455_v32  ;;  %v2277_v9 = vrot.slane %v4737_v1, %v4358_v55 }
 0x152   : > { %v1523_v4 = vadd.f32 %v1521_v42, %v4787_v26  ;;  %v1651_v6 = vadd.f32 %v1649_v7, %v4797_v27  ;;  %v1780_v20 = vadd.f32 %v1778_v28, %v4799_v3  ;;  %v2165_v25 = vmul.f32 %v4804_v10, %v4737_v1 }
 0x153   : > { %v2272_v60 = vadd.f32 %v2270_v16, %v2264_v44  ;;  %v2273_v22 = vadd.f32 %v2271_v34, %v2265_v12  ;;  %v2376_v54 = vrot.slane %v6899_v63, %v4346_v49  ;;  %v2382_v33 = vrot.slane %v6899_v63, %v4348_v50 }
 0x154   : > { %v1909_v21 = vadd.f32 %v1907_v17, %v4806_v61  ;;  %v2285_v26 = vrot.slane %v4737_v1, %v4360_v56  ;;  %v2293_v27 = vrot.slane %v4737_v1, %v4362_v58  ;;  %v2390_v3 = vrot.slane %v6899_v63, %v4350_v51 }
 0x155   : > { %v2278_v10 = vmul.f32 %v2277_v9, %v4623_v2  ;;  %v2279_v42 = vmul.f32 %v2277_v9, %v4577_v0  ;;  %v2377_v7 = vmul.f32 %v2376_v54, %v4335_v45  ;;  %v2378_v44 = vmul.f32 %v2376_v54, %v4341_v47 }
 0x156   : > { %v2038_v12 = vadd.f32 %v2036_v8, %v4808_v57  ;;  %v2383_v61 = vmul.f32 %v2382_v33, %v4338_v46  ;;  %v2384_v28 = vmul.f32 %v2382_v33, %v4344_v48  ;;  %v2398_v17 = vrot.slane %v6899_v63, %v4352_v52 }
 0x157   : > { %v2167_v16 = vadd.f32 %v2165_v25, %v4832_v31  ;;  %v2280_v34 = vadd.f32 %v2278_v10, %v2272_v60  ;;  %v2281_v30 = vadd.f32 %v2279_v42, %v2273_v22  ;;  %v2406_v9 = vrot.slane %v6899_v63, %v4358_v55 }
 0x158   : > { %v2385_v40 = vadd.f32 %v2383_v61, %v2377_v7  ;;  %v2386_v45 = vadd.f32 %v2384_v28, %v2378_v44  ;;  %v2391_v54 = vmul.f32 %v2390_v3, %v4436_v23  ;;  %v2392_v57 = vmul.f32 %v2390_v3, %v4421_v19 }
 0x159   : > { %v2286_v8 = vmul.f32 %v2285_v26, %v4700_v14  ;;  %v2287_v33 = vmul.f32 %v2285_v26, %v4614_v39  ;;  %v2294_v48 = vmul.f32 %v2293_v27, %v4737_v1  ;;  %v2301_v31 = vrot.slane %v4737_v1, %v4364_v59 }
 0x15a   : > { %v2393_v25 = vadd.f32 %v2391_v54, %v2385_v40  ;;  %v2394_v22 = vadd.f32 %v2392_v57, %v2386_v45  ;;  %v2399_v60 = vmul.f32 %v2398_v17, %v4461_v36  ;;  %v2400_v10 = vmul.f32 %v2398_v17, %v4455_v32 }
 0x15b   : > { %v2288_v42 = vadd.f32 %v2286_v8, %v2280_v34  ;;  %v2289_v7 = vadd.f32 %v2287_v33, %v2281_v30  ;;  %v2295_v44 = vmul.f32 %v2293_v27, %v4721_v35  ;;  %v1529_v3 = vmul.f32 %v6888_v53, %v6899_v63  ;;  %v6900_v34 = vld [vmem:[#allocation74_spill] sm:$0xff]  ;;  %v3880_v8 = vpop.f32.mrf.mxu0 }
 0x15c   : > { %v2401_v61 = vadd.f32 %v2399_v60, %v2393_v25  ;;  %v2402_v26 = vadd.f32 %v2400_v10, %v2394_v22  ;;  %v2408_v28 = vmul.f32 %v2406_v9, %v4577_v0  ;;  %v2414_v19 = vrot.slane %v6899_v63, %v4360_v56 }
 0x15d   : > { %v2303_v45 = vmul.f32 %v2301_v31, %v4728_v5  ;;  %v1657_v40 = vmul.f32 %v6889_v38, %v6899_v63  ;;  %v1786_v30 = vmul.f32 %v6890_v13, %v6899_v63  ;;  %v2407_v27 = vmul.f32 %v2406_v9, %v4623_v2  ;;  %v3887_v9 = vpop.f32.mrf.mxu1 }
 0x15e   : > { %v4999_v17 = vadd.f32 %v1529_v3, %v1523_v4  ;;  %v1915_v53 = vmul.f32 %v6892_v18, %v6899_v63  ;;  %v2044_v54 = vmul.f32 %v6900_v34, %v6899_v63  ;;  %v2410_v57 = vadd.f32 %v2408_v28, %v2402_v26  ;;  %v6906_v34 = vld [vmem:[#allocation32_spill] sm:$0xff] }
 0x15f   : > { %v2296_v33 = vadd.f32 %v2294_v48, %v2288_v42  ;;  %v2297_v25 = vadd.f32 %v2295_v44, %v2289_v7  ;;  %v2173_v38 = vmul.f32 %v4812_v43, %v6899_v63  ;;  %v2409_v22 = vadd.f32 %v2407_v27, %v2401_v61  ;;  %v6901_v7 = vld [vmem:[#allocation9_spill] sm:$0xff] }
 0x160   : > { %v5007_v60 = vadd.f32 %v1657_v40, %v1651_v6  ;;  %v2416_v13 = vmul.f32 %v2414_v19, %v4614_v39  ;;  %v2422_v4 = vrot.slane %v6899_v63, %v4362_v58  ;;  %v2430_v18 = vrot.slane %v6899_v63, %v4364_v59  ;;  %v6905_v27 = vld [vmem:[#allocation21_spill] sm:$0xff] }
 0x161   : > { %v5014_v10 = vadd.f32 %v1786_v30, %v1780_v20  ;;  %v2302_v48 = vmul.f32 %v2301_v31, %v6899_v63  ;;  %v2415_v42 = vmul.f32 %v2414_v19, %v4700_v14  ;;  %v5019_v43 = vadd.f32 %v3880_v8, %v6901_v7 }
 0x162   : > { %v5021_v6 = vadd.f32 %v1915_v53, %v1909_v21  ;;  %v5023_v44 = vadd.f32 %v2044_v54, %v2038_v12  ;;  %v5025_v3 = vadd.f32 %v2173_v38, %v2167_v16  ;;  %v2418_v61 = vadd.f32 %v2416_v13, %v2410_v57  ;;  %v6904_v12 = vld [vmem:[#allocation20_spill] sm:$0xff]  ;;  %v6909_v38 = vld [vmem:[#allocation61_spill] sm:$0xff] }
 0x163   : > { %6902 = vst [vmem:[#allocation74_spill] sm:$0xff] %v5019_v43  ;;  %v5027_v26 = vadd.f32 %v2302_v48, %v2296_v33  ;;  %v2417_v28 = vadd.f32 %v2415_v42, %v2409_v22  ;;  %v2305_v40 = vadd.f32 %v2303_v45, %v2297_v25  ;;  %v5030_v20 = vadd.f32 %v3887_v9, %v6901_v7  ;;  %v6907_v54 = vld [vmem:[#allocation40_spill] sm:$0xff]  ;;  %v6908_v33 = vld [vmem:[#allocation53_spill] sm:$0xff] }
 0x164   : > { %v2423_v31 = vmul.f32 %v2422_v4, %v4737_v1  ;;  %v2424_v19 = vmul.f32 %v2422_v4, %v4721_v35  ;;  %v2431_v30 = vmul.f32 %v2430_v18, %v6899_v63  ;;  %v2432_v21 = vmul.f32 %v2430_v18, %v4728_v5  ;;  %v6911_v18 = vld [vmem:[#allocation27_spill] sm:$0xff] }
 0x165   : > { %6903 = vst [vmem:[#allocation86_spill] sm:$0xff] %v5030_v20  ;;  %v1538_v16 = vmul.f32 %v6904_v12, %v5019_v43  ;;  %v1666_v53 = vmul.f32 %v6905_v27, %v5019_v43  ;;  %v1795_v45 = vmul.f32 %v6906_v34, %v5019_v43  ;;  %v1924_v57 = vmul.f32 %v6907_v54, %v5019_v43  ;;  %v6912_v63 = vld [vmem:[#allocation75_spill] sm:$0xff] }
 0x166   : > { %v2426_v8 = vadd.f32 %v2424_v19, %v2418_v61  ;;  %v2053_v25 = vmul.f32 %v6908_v33, %v5019_v43  ;;  %v2182_v22 = vmul.f32 %v6909_v38, %v5019_v43  ;;  %v5050_v13 = vrot.slane %v5019_v43, %v4346_v49 }
 0x167   : > { %v2425_v4 = vadd.f32 %v2423_v31, %v2417_v28  ;;  %v1540_v9 = vadd.f32 %v1538_v16, %v6911_v18  ;;  %v1668_v48 = vadd.f32 %v1666_v53, %v4890_v11  ;;  %v1797_v42 = vadd.f32 %v1795_v45, %v4896_v41  ;;  %v909_v16 = vpop.f32.mrf.mxu0 }
 0x168   : > { %6910 = vst [vmem:[#allocation20_spill] sm:$0xff] %v5050_v13  ;;  %v1926_v5 = vadd.f32 %v1924_v57, %v4898_v24  ;;  %v2055_v61 = vadd.f32 %v2053_v25, %v4900_v62  ;;  %v2184_v19 = vadd.f32 %v2182_v22, %v4906_v29  ;;  %v2311_v35 = vmul.f32 %v6912_v63, %v5019_v43 }
 0x169   : > { %v2440_v1 = vmul.f32 %v4894_v15, %v5019_v43  ;;  %v5064_v28 = vrot.slane %v5019_v43, %v4348_v50  ;;  %v5068_v11 = vrot.slane %v5019_v43, %v4350_v51  ;;  %v5072_v41 = vrot.slane %v5019_v43, %v4352_v52 }
 0x16a   : > { %v2313_v24 = vadd.f32 %v2311_v35, %v2305_v40  ;;  %v2434_v29 = vadd.f32 %v2432_v21, %v2426_v8  ;;  %v5076_v62 = vmul.f32 %v5050_v13, %v5019_v43  ;;  %v5080_v31 = vrot.slane %v5019_v43, %v4358_v55  ;;  %v6921_v40 = vld [vmem:[#allocation22_spill] sm:$0xff]  ;;  %v6922_v8 = vld [vmem:[#allocation23_spill] sm:$0xff] }
 0x16b   : > { %6913 = vst [vmem:[#allocation21_spill] sm:$0xff] %v5068_v11  ;;  %6914 = vst [vmem:[#allocation32_spill] sm:$0xff] %v5072_v41  ;;  %v5082_v53 = vadd.f32 %v2431_v30, %v2425_v4  ;;  %v5086_v45 = vrot.slane %v5019_v43, %v4360_v56  ;;  %v5090_v57 = vrot.slane %v5019_v43, %v4362_v58  ;;  %v6923_v30 = vld [vmem:[#allocation33_spill] sm:$0xff] }
 0x16c   : > { %6915 = vst [vmem:[#allocation40_spill] sm:$0xff] %v5076_v62  ;;  %6916 = vst [vmem:[#allocation53_spill] sm:$0xff] %v5080_v31  ;;  %v5094_v35 = vrot.slane %v5019_v43, %v4364_v59  ;;  %v1546_v21 = vmul.f32 %v6921_v40, %v5030_v20  ;;  %v1674_v25 = vmul.f32 %v6922_v8, %v5030_v20  ;;  %v6924_v4 = vld [vmem:[#allocation41_spill] sm:$0xff]  ;;  %v6928_v62 = vld [vmem:[#allocation8_spill] sm:$0xff] }
 0x16d   : > { %6917 = vst [vmem:[#allocation61_spill] sm:$0xff] %v5082_v53  ;;  %6918 = vst [vmem:[#allocation27_spill] sm:$0xff] %v5086_v45  ;;  %v1803_v22 = vmul.f32 %v6923_v30, %v5030_v20  ;;  %v1932_v18 = vmul.f32 %v6924_v4, %v5030_v20  ;;  %v6925_v45 = vld [vmem:[#allocation54_spill] sm:$0xff]  ;;  %v5111_v40 = vadd.f32 %v909_v16, %v6928_v62 }
 0x16e   : > { %6919 = vst [vmem:[#allocation75_spill] sm:$0xff] %v5090_v57  ;;  %6920 = vst [vmem:[#allocation87_spill] sm:$0xff] %v5094_v35  ;;  %v2061_v31 = vmul.f32 %v6925_v45, %v5030_v20  ;;  %v6926_v57 = vld [vmem:[#allocation62_spill] sm:$0xff]  ;;  %v6927_v35 = vld [vmem:[#allocation76_spill] sm:$0xff]  ;;  %v2442_v13 = vadd.f32 %v2440_v1, %v2434_v29  ;;  %v5113_v8 = vadd.f32 %v1546_v21, %v1540_v9 }
 0x16f   : > { %v2190_v41 = vmul.f32 %v6926_v57, %v5030_v20  ;;  %v2319_v11 = vmul.f32 %v6927_v35, %v5030_v20  ;;  %6929 = vst [vmem:[#allocation88_spill] sm:$0xff] %v5111_v40  ;;  %v5115_v39 = vadd.f32 %v1674_v25, %v1668_v48  ;;  %v5117_v30 = vadd.f32 %v1803_v22, %v1797_v42  ;;  %v6938_v16 = vld [vmem:[#allocation10_spill] sm:$0xff] }
 0x170   : > { %v5119_v4 = vadd.f32 %v1932_v18, %v1926_v5  ;;  %v5121_v53 = vadd.f32 %v2061_v31, %v2055_v61  ;;  %v2448_v35 = vmul.f32 %v4904_v37, %v5030_v20  ;;  %v5131_v1 = vmul.f32 %v5064_v28, %v5030_v20  ;;  %v6939_v18 = vld [vmem:[#allocation13_spill] sm:$0xff] }
 0x171   : > { %v5123_v45 = vadd.f32 %v2190_v41, %v2184_v19  ;;  %v5125_v57 = vadd.f32 %v2319_v11, %v2313_v24  ;;  %v5135_v9 = vrot.slane %v5030_v20, %v4346_v49  ;;  %v5139_v5 = vrot.slane %v5030_v20, %v4348_v50  ;;  %v988_v11 = vpop.f32.mrf.mxu1 }
 0x172   : > { %6930 = vst [vmem:[#allocation89_spill] sm:$0xff] %v5119_v4  ;;  %6931 = vst [vmem:[#allocation90_spill] sm:$0xff] %v5121_v53  ;;  %v5143_v48 = vrot.slane %v5030_v20, %v4350_v51  ;;  %v2505_v42 = vrot.slane %v5111_v40, %v4346_v49  ;;  %v2511_v61 = vrot.slane %v5111_v40, %v4348_v50 }
 0x173   : > { %6932 = vst [vmem:[#allocation91_spill] sm:$0xff] %v5123_v45  ;;  %6933 = vst [vmem:[#allocation92_spill] sm:$0xff] %v5125_v57  ;;  %v2519_v19 = vrot.slane %v5111_v40, %v4350_v51  ;;  %v5151_v41 = vadd.f32 %v2448_v35, %v2442_v13  ;;  %v5155_v24 = vrot.slane %v5030_v20, %v4352_v52  ;;  %v3894_v35 = vpop.f32.mrf.mxu0  ;;  %v6944_v45 = vld [vmem:[#allocation26_spill] sm:$0xff] }
 0x174   : > { %6934 = vst [vmem:[#allocation93_spill] sm:$0xff] %v5143_v48  ;;  %v5159_v29 = vrot.slane %v5030_v20, %v4358_v55  ;;  %v2527_v31 = vrot.slane %v5111_v40, %v4352_v52  ;;  %v2506_v21 = vmul.f32 %v2505_v42, %v6938_v16  ;;  %v2507_v25 = vmul.f32 %v2505_v42, %v4341_v47 }
 0x175   : > { %6935 = vst [vmem:[#allocation94_spill] sm:$0xff] %v5151_v41  ;;  %6936 = vst [vmem:[#allocation95_spill] sm:$0xff] %v5155_v24  ;;  %v2512_v22 = vmul.f32 %v2511_v61, %v4338_v46  ;;  %v2513_v13 = vmul.f32 %v2511_v61, %v6939_v18  ;;  %v5169_v48 = vmul.f32 %v5135_v9, %v5019_v43  ;;  %v3901_v43 = vpop.f32.mrf.mxu1 }
 0x176   : > { %6937 = vst [vmem:[#allocation96_spill] sm:$0xff] %v5159_v29  ;;  %v5173_v24 = vmul.f32 %v5139_v5, %v5030_v20  ;;  %v5177_v29 = vrot.slane %v5030_v20, %v4360_v56  ;;  %v5181_v42 = vrot.slane %v5030_v20, %v4362_v58  ;;  %v2520_v61 = vmul.f32 %v2519_v19, %v4436_v23 }
 0x177   : > { %6940 = vst [vmem:[#allocation97_spill] sm:$0xff] %v5169_v48  ;;  %v2514_v41 = vadd.f32 %v2512_v22, %v2506_v21  ;;  %v2515_v57 = vadd.f32 %v2513_v13, %v2507_v25  ;;  %v2521_v53 = vmul.f32 %v2519_v19, %v6944_v45  ;;  %v5187_v4 = vrot.slane %v5030_v20, %v4364_v59 }
 0x178   : > { %6941 = vst [vmem:[#allocation98_spill] sm:$0xff] %v5173_v24  ;;  %6942 = vst [vmem:[#allocation99_spill] sm:$0xff] %v5177_v29  ;;  %v1537_v24 = vmul.f32 %v6904_v12, %v5111_v40  ;;  %v5192_v29 = vadd.f32 %v988_v11, %v6928_v62  ;;  %v5195_v48 = vadd.f32 %v3894_v35, %v6901_v7  ;;  %v6954_v62 = vld [vmem:[#allocation70_spill] sm:$0xff] }
 0x179   : > { %6943 = vst [vmem:[#allocation100_spill] sm:$0xff] %v5181_v42  ;;  %6945 = vst [vmem:[#allocation101_spill] sm:$0xff] %v5187_v4  ;;  %v2522_v21 = vadd.f32 %v2520_v61, %v2514_v41  ;;  %v2523_v25 = vadd.f32 %v2521_v53, %v2515_v57  ;;  %v2528_v22 = vmul.f32 %v2527_v31, %v4461_v36 }
 0x17a   : > { %6946 = vst [vmem:[#allocation102_spill] sm:$0xff] %v5192_v29  ;;  %6947 = vst [vmem:[#allocation103_spill] sm:$0xff] %v5195_v48  ;;  %v2535_v19 = vrot.slane %v5111_v40, %v4358_v55  ;;  %v1665_v13 = vmul.f32 %v6905_v27, %v5111_v40  ;;  %v5203_v4 = vadd.f32 %v3901_v43, %v6901_v7 }
 0x17b   : > { %v5207_v12 = vrot.slane %v4341_v47, %v4352_v52  ;;  %v5211_v11 = vrot.slane %v6939_v18, %v4352_v52  ;;  %v1794_v53 = vmul.f32 %v6906_v34, %v5111_v40  ;;  %v1923_v57 = vmul.f32 %v6907_v54, %v5111_v40 }
 0x17c   : > { %6948 = vst [vmem:[#allocation104_spill] sm:$0xff] %v5203_v4  ;;  %v2529_v41 = vmul.f32 %v2527_v31, %v4455_v32  ;;  %v2530_v27 = vadd.f32 %v2528_v22, %v2522_v21  ;;  %v2052_v43 = vmul.f32 %v6908_v33, %v5111_v40  ;;  %v2181_v35 = vmul.f32 %v6909_v38, %v5111_v40 }
 0x17d   : > { %6949 = vst [vmem:[#allocation105_spill] sm:$0xff] %v5207_v12  ;;  %6950 = vst [vmem:[#allocation106_spill] sm:$0xff] %v5211_v11  ;;  %v2310_v61 = vmul.f32 %v6912_v63, %v5111_v40  ;;  %v2439_v42 = vmul.f32 %v4894_v15, %v5111_v40  ;;  %v5227_v34 = vadd.f32 %v1537_v24, %v4999_v17 }
 0x17e   : > { %v2531_v7 = vadd.f32 %v2529_v41, %v2523_v25  ;;  %v2536_v54 = vmul.f32 %v2535_v19, %v4623_v2  ;;  %v2543_v31 = vrot.slane %v5111_v40, %v4360_v56  ;;  %v1667_v33 = vadd.f32 %v1665_v13, %v5007_v60 }
 0x17f   : > { %v5234_v21 = vadd.f32 %v1794_v53, %v5014_v10  ;;  %v5237_v38 = vadd.f32 %v1923_v57, %v5021_v6  ;;  %v5240_v63 = vadd.f32 %v2052_v43, %v5023_v44  ;;  %v5243_v15 = vadd.f32 %v2181_v35, %v5025_v3  ;;  %v6951_v53 = vld [vmem:[#allocation61_spill] sm:$0xff]  ;;  %v6952_v43 = vld [vmem:[#allocation51_spill] sm:$0xff] }
 0x180   : > { %v2537_v17 = vmul.f32 %v2535_v19, %v4577_v0  ;;  %v2538_v24 = vadd.f32 %v2536_v54, %v2530_v27  ;;  %v2634_v25 = vrot.slane %v5192_v29, %v4346_v49  ;;  %v5249_v60 = vadd.f32 %v2310_v61, %v5027_v26 }
 0x181   : > { %v2551_v10 = vrot.slane %v5111_v40, %v4362_v58  ;;  %v2640_v6 = vrot.slane %v5192_v29, %v4348_v50  ;;  %v2648_v44 = vrot.slane %v5192_v29, %v4350_v51  ;;  %v2544_v22 = vmul.f32 %v2543_v31, %v4700_v14 }
 0x182   : > { %v2539_v3 = vadd.f32 %v2537_v17, %v2531_v7  ;;  %v2635_v19 = vmul.f32 %v2634_v25, %v6938_v16  ;;  %v2636_v13 = vmul.f32 %v2634_v25, %v4341_v47  ;;  %v5261_v57 = vadd.f32 %v2439_v42, %v6951_v53  ;;  %v6953_v16 = vld [vmem:[#allocation72_spill] sm:$0xff] }
 0x183   : > { %v2559_v26 = vrot.slane %v5111_v40, %v4364_v59  ;;  %v2641_v41 = vmul.f32 %v2640_v6, %v4338_v46  ;;  %v2642_v27 = vmul.f32 %v2640_v6, %v6939_v18  ;;  %v2545_v35 = vmul.f32 %v2543_v31, %v6952_v43 }
 0x184   : > { %v2546_v61 = vadd.f32 %v2544_v22, %v2538_v24  ;;  %v2649_v7 = vmul.f32 %v2648_v44, %v4436_v23  ;;  %v2656_v54 = vrot.slane %v5192_v29, %v4352_v52  ;;  %v2650_v42 = vmul.f32 %v2648_v44, %v6944_v45 }
 0x185   : > { %v2643_v17 = vadd.f32 %v2641_v41, %v2635_v19  ;;  %v2644_v25 = vadd.f32 %v2642_v27, %v2636_v13  ;;  %v2664_v53 = vrot.slane %v5192_v29, %v4358_v55  ;;  %v2547_v47 = vadd.f32 %v2545_v35, %v2539_v3  ;;  %v6955_v41 = vld [vmem:[#allocation73_spill] sm:$0xff]  ;;  %v6956_v27 = vld [vmem:[#allocation71_spill] sm:$0xff] }
 0x186   : > { %v2552_v46 = vmul.f32 %v2551_v10, %v6953_v16  ;;  %v2553_v6 = vmul.f32 %v2551_v10, %v6954_v62  ;;  %v2672_v31 = vrot.slane %v5192_v29, %v4360_v56  ;;  %v2657_v23 = vmul.f32 %v2656_v54, %v4461_v36 }
 0x187   : > { %v2651_v24 = vadd.f32 %v2649_v7, %v2643_v17  ;;  %v2652_v22 = vadd.f32 %v2650_v42, %v2644_v25  ;;  %v2658_v19 = vmul.f32 %v2656_v54, %v4455_v32  ;;  %v2560_v44 = vmul.f32 %v2559_v26, %v6955_v41  ;;  %v6957_v17 = vld [vmem:[#allocation20_spill] sm:$0xff] }
 0x188   : > { %v2554_v13 = vadd.f32 %v2552_v46, %v2546_v61  ;;  %v2561_v45 = vmul.f32 %v2559_v26, %v6956_v27  ;;  %v2680_v3 = vrot.slane %v5192_v29, %v4362_v58  ;;  %v2665_v10 = vmul.f32 %v2664_v53, %v4623_v2  ;;  %v6958_v61 = vld [vmem:[#allocation22_spill] sm:$0xff] }
 0x189   : > { %v2659_v35 = vadd.f32 %v2657_v23, %v2651_v24  ;;  %v2660_v18 = vadd.f32 %v2658_v19, %v2652_v22  ;;  %v2666_v11 = vmul.f32 %v2664_v53, %v4577_v0  ;;  %v2555_v7 = vadd.f32 %v2553_v6, %v2547_v47  ;;  %v6959_v22 = vld [vmem:[#allocation23_spill] sm:$0xff]  ;;  %v6960_v47 = vld [vmem:[#allocation33_spill] sm:$0xff] }
 0x18a   : > { %v2568_v25 = vmul.f32 %v6957_v17, %v5111_v40  ;;  %v2697_v46 = vmul.f32 %v5135_v9, %v5111_v40  ;;  %v1545_v54 = vmul.f32 %v6958_v61, %v5192_v29  ;;  %v2673_v32 = vmul.f32 %v2672_v31, %v4700_v14  ;;  %v6961_v9 = vld [vmem:[#allocation41_spill] sm:$0xff] }
 0x18b   : > { %v2667_v26 = vadd.f32 %v2665_v10, %v2659_v35  ;;  %v2668_v42 = vadd.f32 %v2666_v11, %v2660_v18  ;;  %v2674_v23 = vmul.f32 %v2672_v31, %v6952_v43  ;;  %v2562_v24 = vadd.f32 %v2560_v44, %v2554_v13 }
 0x18c   : > { %v1673_v53 = vmul.f32 %v6959_v22, %v5192_v29  ;;  %v1802_v6 = vmul.f32 %v6960_v47, %v5192_v29  ;;  %v2688_v19 = vrot.slane %v5192_v29, %v4364_v59  ;;  %v1931_v17 = vmul.f32 %v6961_v9, %v5192_v29  ;;  %v6962_v22 = vld [vmem:[#allocation54_spill] sm:$0xff] }
 0x18d   : > { %v2675_v61 = vadd.f32 %v2673_v32, %v2667_v26  ;;  %v2676_v35 = vadd.f32 %v2674_v23, %v2668_v42  ;;  %v2682_v18 = vmul.f32 %v2680_v3, %v6954_v62  ;;  %v2563_v11 = vadd.f32 %v2561_v45, %v2555_v7  ;;  %v6963_v9 = vld [vmem:[#allocation62_spill] sm:$0xff] }
 0x18e   : > { %v5304_v31 = vadd.f32 %v1545_v54, %v5227_v34  ;;  %v5306_v13 = vadd.f32 %v1673_v53, %v1667_v33  ;;  %v2681_v44 = vmul.f32 %v2680_v3, %v6953_v16  ;;  %v5310_v10 = vadd.f32 %v1802_v6, %v5234_v21  ;;  %v6964_v3 = vld [vmem:[#allocation76_spill] sm:$0xff] }
 0x18f   : > { %v2060_v47 = vmul.f32 %v6962_v22, %v5192_v29  ;;  %v2189_v32 = vmul.f32 %v6963_v9, %v5192_v29  ;;  %v2684_v26 = vadd.f32 %v2682_v18, %v2676_v35  ;;  %v2570_v42 = vadd.f32 %v2568_v25, %v2562_v24  ;;  %v6965_v53 = vld [vmem:[#allocation40_spill] sm:$0xff]  ;;  %v6969_v18 = vld [vmem:[#allocation34_spill] sm:$0xff] }
 0x190   : > { %v5317_v45 = vadd.f32 %v1931_v17, %v5237_v38  ;;  %v2683_v34 = vadd.f32 %v2681_v44, %v2675_v61  ;;  %v2690_v33 = vmul.f32 %v2688_v19, %v6956_v27  ;;  %v2318_v54 = vmul.f32 %v6964_v3, %v5192_v29  ;;  %v6968_v61 = vld [vmem:[#allocation25_spill] sm:$0xff]  ;;  %v6972_v9 = vld [vmem:[#allocation42_spill] sm:$0xff] }
 0x191   : > { %v5321_v7 = vadd.f32 %v2060_v47, %v5240_v63  ;;  %v5324_v21 = vadd.f32 %v2189_v32, %v5243_v15  ;;  %v2447_v23 = vmul.f32 %v4904_v37, %v5192_v29  ;;  %v2576_v25 = vmul.f32 %v5064_v28, %v5192_v29  ;;  %v6967_v15 = vld [vmem:[#allocation24_spill] sm:$0xff]  ;;  %v6975_v3 = vld [vmem:[#allocation97_spill] sm:$0xff] }
 0x192   : > { %v2689_v38 = vmul.f32 %v2688_v19, %v6955_v41  ;;  %v2692_v24 = vadd.f32 %v2690_v33, %v2684_v26  ;;  %v2571_v6 = vadd.f32 %v6965_v53, %v2563_v11  ;;  %v5335_v63 = vadd.f32 %v2318_v54, %v5249_v60  ;;  %v6973_v26 = vld [vmem:[#allocation55_spill] sm:$0xff]  ;;  %v6978_v53 = vld [vmem:[#allocation89_spill] sm:$0xff]  ;;  %v6983_v41 = vld [vmem:[#allocation94_spill] sm:$0xff] }
 0x193   : > { %v1554_v17 = vmul.f32 %v6967_v15, %v5195_v48  ;;  %v1682_v35 = vmul.f32 %v6968_v61, %v5195_v48  ;;  %v1811_v37 = vmul.f32 %v6969_v18, %v5195_v48  ;;  %v5344_v44 = vadd.f32 %v2447_v23, %v5261_v57  ;;  %v6974_v57 = vld [vmem:[#allocation63_spill] sm:$0xff] }
 0x194   : > { %6966 = vst [vmem:[#allocation61_spill] sm:$0xff] %v5335_v63  ;;  %v5346_v28 = vadd.f32 %v2576_v25, %v2570_v42  ;;  %v2691_v19 = vadd.f32 %v2689_v38, %v2683_v34  ;;  %v2705_v11 = vmul.f32 %v5139_v5, %v5192_v29  ;;  %v1940_v32 = vmul.f32 %v6972_v9, %v5195_v48  ;;  %v6976_v5 = vld [vmem:[#allocation77_spill] sm:$0xff]  ;;  %v6984_v63 = vld [vmem:[#allocation98_spill] sm:$0xff] }
 0x195   : > { %6970 = vst [vmem:[#allocation20_spill] sm:$0xff] %v5344_v44  ;;  %v1556_v60 = vadd.f32 %v1554_v17, %v5113_v8  ;;  %v1684_v22 = vadd.f32 %v1682_v35, %v5115_v39  ;;  %v1813_v47 = vadd.f32 %v1811_v37, %v5117_v30  ;;  %v2069_v33 = vmul.f32 %v6973_v26, %v5195_v48  ;;  %v6977_v39 = vld [vmem:[#allocation29_spill] sm:$0xff] }
 0x196   : > { %6971 = vst [vmem:[#allocation22_spill] sm:$0xff] %v5346_v28  ;;  %v2198_v42 = vmul.f32 %v6974_v57, %v5195_v48  ;;  %v2579_v34 = vadd.f32 %v5131_v1, %v2571_v6  ;;  %v2700_v54 = vadd.f32 %v6975_v3, %v2692_v24  ;;  %v2327_v8 = vmul.f32 %v6976_v5, %v5195_v48  ;;  %v6979_v35 = vld [vmem:[#allocation21_spill] sm:$0xff]  ;;  %v6980_v6 = vld [vmem:[#allocation90_spill] sm:$0xff]  ;;  %v6981_v3 = vld [vmem:[#allocation91_spill] sm:$0xff] }
 0x197   : > { %v2456_v23 = vmul.f32 %v6977_v39, %v5195_v48  ;;  %v2825_v30 = vrot.slane %v5195_v48, %v4346_v49  ;;  %v2833_v25 = vrot.slane %v5195_v48, %v4348_v50  ;;  %v2699_v38 = vadd.f32 %v2697_v46, %v2691_v19  ;;  %v6982_v28 = vld [vmem:[#allocation92_spill] sm:$0xff]  ;;  %v6985_v19 = vld [vmem:[#allocation93_spill] sm:$0xff] }
 0x198   : > { %v1942_v17 = vadd.f32 %v1940_v32, %v6978_v53  ;;  %v2585_v1 = vmul.f32 %v6979_v35, %v5195_v48  ;;  %v5374_v24 = vrot.slane %v5195_v48, %v4350_v51  ;;  %v2071_v37 = vadd.f32 %v2069_v33, %v6980_v6  ;;  %v6986_v33 = vld [vmem:[#allocation74_spill] sm:$0xff] }
 0x199   : > { %v2200_v27 = vadd.f32 %v2198_v42, %v6981_v3  ;;  %v2329_v62 = vadd.f32 %v2327_v8, %v6982_v28  ;;  %v2458_v44 = vadd.f32 %v2456_v23, %v6983_v41  ;;  %v2708_v46 = vadd.f32 %v6984_v63, %v2700_v54 }
 0x19a   : > { %v2587_v43 = vadd.f32 %v2585_v1, %v2579_v34  ;;  %v2714_v32 = vmul.f32 %v6985_v19, %v5195_v48  ;;  %v5385_v53 = vrot.slane %v5195_v48, %v4352_v52  ;;  %v5388_v35 = vmul.f32 %v2825_v30, %v5111_v40  ;;  %v6996_v1 = vld [vmem:[#allocation35_spill] sm:$0xff] }
 0x19b   : > { %v5391_v6 = vmul.f32 %v2825_v30, %v6986_v33  ;;  %v5394_v28 = vmul.f32 %v2833_v25, %v5192_v29  ;;  %v5398_v41 = vrot.slane %v5195_v48, %v4358_v55  ;;  %v5400_v63 = vadd.f32 %v2705_v11, %v2699_v38  ;;  %v6995_v30 = vld [vmem:[#allocation106_spill] sm:$0xff] }
 0x19c   : > { %v5403_v42 = vmul.f32 %v2833_v25, %v5030_v20  ;;  %v5407_v34 = vmul.f32 %v5374_v24, %v5195_v48  ;;  %v5411_v54 = vrot.slane %v5195_v48, %v4360_v56  ;;  %v5415_v8 = vrot.slane %v5195_v48, %v4362_v58 }
 0x19d   : > { %6987 = vst [vmem:[#allocation23_spill] sm:$0xff] %v5391_v6  ;;  %6988 = vst [vmem:[#allocation33_spill] sm:$0xff] %v5394_v28  ;;  %v5419_v23 = vrot.slane %v5195_v48, %v4364_v59  ;;  %v1562_v11 = vmul.f32 %v5207_v12, %v5203_v4  ;;  %v1690_v25 = vmul.f32 %v6995_v30, %v5203_v4  ;;  %v7001_v28 = vld [vmem:[#allocation64_spill] sm:$0xff]  ;;  %v7002_v30 = vld [vmem:[#allocation78_spill] sm:$0xff] }
 0x19e   : > { %6989 = vst [vmem:[#allocation41_spill] sm:$0xff] %v5398_v41  ;;  %6990 = vst [vmem:[#allocation54_spill] sm:$0xff] %v5403_v42  ;;  %v2716_v38 = vadd.f32 %v2714_v32, %v2708_v46  ;;  %v1819_v3 = vmul.f32 %v6996_v1, %v5203_v4  ;;  %v1067_v42 = vpop.f32.mrf.mxu0  ;;  %v2206_v12 = vmul.f32 %v7001_v28, %v5203_v4 }
 0x19f   : > { %6991 = vst [vmem:[#allocation62_spill] sm:$0xff] %v5407_v34  ;;  %6992 = vst [vmem:[#allocation76_spill] sm:$0xff] %v5411_v54  ;;  %v6997_v54 = vld [vmem:[#allocation43_spill] sm:$0xff]  ;;  %v6998_v34 = vld [vmem:[#allocation56_spill] sm:$0xff]  ;;  %v5431_v6 = vadd.f32 %v1562_v11, %v1556_v60  ;;  %v2335_v46 = vmul.f32 %v7002_v30, %v5203_v4 }
 0x1a0   : > { %6993 = vst [vmem:[#allocation40_spill] sm:$0xff] %v5415_v8  ;;  %6994 = vst [vmem:[#allocation24_spill] sm:$0xff] %v5419_v23  ;;  %v1948_v41 = vmul.f32 %v6997_v54, %v5203_v4  ;;  %v2077_v8 = vmul.f32 %v6998_v34, %v5203_v4  ;;  %v5433_v23 = vadd.f32 %v1690_v25, %v1684_v22  ;;  %v7005_v60 = vld [vmem:[#allocation49_spill] sm:$0xff]  ;;  %v7006_v11 = vld [vmem:[#allocation32_spill] sm:$0xff] }
 0x1a1   : > { %6999 = vst [vmem:[#allocation25_spill] sm:$0xff] %v5431_v6  ;;  %v5439_v32 = vadd.f32 %v1819_v3, %v1813_v47  ;;  %v2954_v54 = vrot.slane %v5203_v4, %v4346_v49  ;;  %v2962_v34 = vrot.slane %v5203_v4, %v4348_v50  ;;  %v2464_v22 = vmul.f32 %v7005_v60, %v5203_v4  ;;  %v7007_v47 = vld [vmem:[#allocation8_spill] sm:$0xff] }
 0x1a2   : > { %7000 = vst [vmem:[#allocation34_spill] sm:$0xff] %v5433_v23  ;;  %v5441_v1 = vadd.f32 %v1948_v41, %v1942_v17  ;;  %v2593_v25 = vmul.f32 %v7006_v11, %v5203_v4  ;;  %v5453_v23 = vrot.slane %v5203_v4, %v4350_v51  ;;  %v5456_v3 = vadd.f32 %v1067_v42, %v7007_v47 }
 0x1a3   : > { %7003 = vst [vmem:[#allocation42_spill] sm:$0xff] %v5439_v32  ;;  %v5458_v17 = vadd.f32 %v2077_v8, %v2071_v37  ;;  %v5460_v41 = vadd.f32 %v2206_v12, %v2200_v27  ;;  %v5466_v6 = vrot.slane %v5203_v4, %v4352_v52  ;;  %v5468_v60 = vadd.f32 %v2335_v46, %v2329_v62  ;;  %v1146_v62 = vpop.f32.mrf.mxu1 }
 0x1a4   : > { %7004 = vst [vmem:[#allocation55_spill] sm:$0xff] %v5441_v1  ;;  %7008 = vst [vmem:[#allocation63_spill] sm:$0xff] %v5456_v3  ;;  %v7011_v1 = vld [vmem:[#allocation95_spill] sm:$0xff]  ;;  %v5470_v11 = vadd.f32 %v2464_v22, %v2458_v44  ;;  %v5472_v30 = vadd.f32 %v2593_v25, %v2587_v43  ;;  %v5476_v42 = vmul.f32 %v5385_v53, %v5203_v4  ;;  %v3908_v25 = vpop.f32.mrf.mxu0 }
 0x1a5   : > { %7009 = vst [vmem:[#allocation97_spill] sm:$0xff] %v5458_v17  ;;  %7010 = vst [vmem:[#allocation77_spill] sm:$0xff] %v5460_v41  ;;  %v2722_v32 = vmul.f32 %v7011_v1, %v5203_v4  ;;  %v5481_v12 = vmul.f32 %v2954_v54, %v5111_v40  ;;  %v5484_v27 = vmul.f32 %v2954_v54, %v6986_v33  ;;  %v7035_v17 = vld [vmem:[#allocation28_spill] sm:$0xff] }
 0x1a6   : > { %7012 = vst [vmem:[#allocation29_spill] sm:$0xff] %v5466_v6  ;;  %7013 = vst [vmem:[#allocation89_spill] sm:$0xff] %v5468_v60  ;;  %v5487_v8 = vmul.f32 %v2962_v34, %v5192_v29  ;;  %v5490_v44 = vmul.f32 %v2962_v34, %v5030_v20  ;;  %v5494_v43 = vmul.f32 %v5453_v23, %v5195_v48  ;;  %v7027_v29 = vld [vmem:[#allocation10_spill] sm:$0xff] }
 0x1a7   : > { %7014 = vst [vmem:[#allocation90_spill] sm:$0xff] %v5470_v11  ;;  %7015 = vst [vmem:[#allocation91_spill] sm:$0xff] %v5472_v30  ;;  %v5478_v37 = vadd.f32 %v2722_v32, %v2716_v38  ;;  %v2763_v38 = vrot.slane %v5456_v3, %v4346_v49  ;;  %v2769_v46 = vrot.slane %v5456_v3, %v4348_v50  ;;  %v7030_v30 = vld [vmem:[#allocation13_spill] sm:$0xff] }
 0x1a8   : > { %7016 = vst [vmem:[#allocation92_spill] sm:$0xff] %v5476_v42  ;;  %7018 = vst [vmem:[#allocation98_spill] sm:$0xff] %v5481_v12  ;;  %v5502_v54 = vmul.f32 %v5466_v6, %v5203_v4  ;;  %v5506_v32 = vrot.slane %v5203_v4, %v4358_v55  ;;  %v5510_v34 = vrot.slane %v5203_v4, %v4360_v56 }
 0x1a9   : > { %7017 = vst [vmem:[#allocation94_spill] sm:$0xff] %v5478_v37  ;;  %7019 = vst [vmem:[#allocation93_spill] sm:$0xff] %v5487_v8  ;;  %v2777_v22 = vrot.slane %v5456_v3, %v4350_v51  ;;  %v5516_v48 = vrot.slane %v5203_v4, %v4362_v58  ;;  %v5520_v20 = vrot.slane %v5203_v4, %v4364_v59  ;;  %v7032_v4 = vld [vmem:[#allocation9_spill] sm:$0xff] }
 0x1aa   : > { %7020 = vst [vmem:[#allocation64_spill] sm:$0xff] %v5490_v44  ;;  %7021 = vst [vmem:[#allocation95_spill] sm:$0xff] %v5494_v43  ;;  %v2764_v33 = vmul.f32 %v2763_v38, %v7027_v29  ;;  %v2785_v11 = vrot.slane %v5456_v3, %v4352_v52  ;;  %v5529_v42 = vadd.f32 %v1146_v62, %v7007_v47  ;;  %v3915_v43 = vpop.f32.mrf.mxu1  ;;  %v7036_v47 = vld [vmem:[#allocation26_spill] sm:$0xff] }
 0x1ab   : > { %7022 = vst [vmem:[#allocation107_spill] sm:$0xff] %v5502_v54  ;;  %7023 = vst [vmem:[#allocation108_spill] sm:$0xff] %v5506_v32  ;;  %v7028_v54 = vld [vmem:[#allocation12_spill] sm:$0xff]  ;;  %v7029_v32 = vld [vmem:[#allocation11_spill] sm:$0xff]  ;;  %v2778_v62 = vmul.f32 %v2777_v22, %v7035_v17  ;;  %v2779_v8 = vmul.f32 %v2777_v22, %v7036_v47  ;;  %v1553_v44 = vmul.f32 %v6967_v15, %v5456_v3 }
 0x1ac   : > { %7024 = vst [vmem:[#allocation109_spill] sm:$0xff] %v5510_v34  ;;  %7025 = vst [vmem:[#allocation110_spill] sm:$0xff] %v5516_v48  ;;  %v2765_v40 = vmul.f32 %v2763_v38, %v7028_v54  ;;  %v2770_v37 = vmul.f32 %v2769_v46, %v7029_v32  ;;  %v2771_v34 = vmul.f32 %v2769_v46, %v7030_v30 }
 0x1ad   : > { %7026 = vst [vmem:[#allocation111_spill] sm:$0xff] %v5520_v20  ;;  %7031 = vst [vmem:[#allocation112_spill] sm:$0xff] %v5529_v42  ;;  %v2793_v48 = vrot.slane %v5456_v3, %v4358_v55  ;;  %v5534_v20 = vadd.f32 %v3908_v25, %v7032_v4  ;;  %v5538_v38 = vrot.slane %v7028_v54, %v4358_v55 }
 0x1ae   : > { %v5542_v46 = vrot.slane %v7030_v30, %v4358_v55  ;;  %v2772_v60 = vadd.f32 %v2770_v37, %v2764_v33  ;;  %v2773_v41 = vadd.f32 %v2771_v34, %v2765_v40  ;;  %v2801_v25 = vrot.slane %v5456_v3, %v4360_v56  ;;  %v7039_v37 = vld [vmem:[#allocation30_spill] sm:$0xff] }
 0x1af   : > { %7033 = vst [vmem:[#allocation113_spill] sm:$0xff] %v5534_v20  ;;  %v5551_v6 = vadd.f32 %v3915_v43, %v7032_v4  ;;  %v5555_v12 = vrot.slane %v7028_v54, %v4360_v56  ;;  %v2786_v40 = vmul.f32 %v2785_v11, %v4461_v36  ;;  %v2787_v34 = vmul.f32 %v2785_v11, %v7039_v37 }
 0x1b0   : > { %7034 = vst [vmem:[#allocation114_spill] sm:$0xff] %v5542_v46  ;;  %v2780_v46 = vadd.f32 %v2778_v62, %v2772_v60  ;;  %v2781_v33 = vadd.f32 %v2779_v8, %v2773_v41  ;;  %v1681_v22 = vmul.f32 %v6968_v61, %v5456_v3  ;;  %v1810_v15 = vmul.f32 %v6969_v18, %v5456_v3 }
 0x1b1   : > { %7037 = vst [vmem:[#allocation115_spill] sm:$0xff] %v5551_v6  ;;  %7038 = vst [vmem:[#allocation116_spill] sm:$0xff] %v5555_v12  ;;  %v1939_v43 = vmul.f32 %v6972_v9, %v5456_v3  ;;  %v5567_v4 = vrot.slane %v7030_v30, %v4360_v56  ;;  %v2794_v41 = vmul.f32 %v2793_v48, %v4623_v2 }
 0x1b2   : > { %v2788_v12 = vadd.f32 %v2786_v40, %v2780_v46  ;;  %v2789_v60 = vadd.f32 %v2787_v34, %v2781_v33  ;;  %v2809_v11 = vrot.slane %v5456_v3, %v4362_v58  ;;  %v2068_v61 = vmul.f32 %v6973_v26, %v5456_v3 }
 0x1b3   : > { %7040 = vst [vmem:[#allocation117_spill] sm:$0xff] %v5567_v4  ;;  %v2197_v18 = vmul.f32 %v6974_v57, %v5456_v3  ;;  %v2326_v9 = vmul.f32 %v6976_v5, %v5456_v3  ;;  %v2795_v8 = vmul.f32 %v2793_v48, %v4577_v0  ;;  %v1555_v62 = vadd.f32 %v1553_v44, %v5304_v31 }
 0x1b4   : > { %v2455_v46 = vmul.f32 %v6977_v39, %v5456_v3  ;;  %v2796_v33 = vadd.f32 %v2794_v41, %v2788_v12  ;;  %v2802_v40 = vmul.f32 %v2801_v25, %v4700_v14  ;;  %v1683_v34 = vadd.f32 %v1681_v22, %v5306_v13  ;;  %v7041_v13 = vld [vmem:[#allocation61_spill] sm:$0xff] }
 0x1b5   : > { %v5585_v26 = vadd.f32 %v1810_v15, %v5310_v10  ;;  %v2797_v4 = vadd.f32 %v2795_v8, %v2789_v60  ;;  %v2817_v57 = vrot.slane %v5456_v3, %v4364_v59  ;;  %v5590_v5 = vadd.f32 %v1939_v43, %v5317_v45  ;;  %v7042_v10 = vld [vmem:[#allocation51_spill] sm:$0xff]  ;;  %v7043_v60 = vld [vmem:[#allocation20_spill] sm:$0xff]  ;;  %v7045_v8 = vld [vmem:[#allocation21_spill] sm:$0xff] }
 0x1b6   : > { %v5593_v48 = vadd.f32 %v2068_v61, %v5321_v7  ;;  %v2804_v31 = vadd.f32 %v2802_v40, %v2796_v33  ;;  %v2810_v39 = vmul.f32 %v2809_v11, %v6953_v16  ;;  %v5597_v12 = vadd.f32 %v2197_v18, %v5324_v21  ;;  %v7044_v61 = vld [vmem:[#allocation73_spill] sm:$0xff] }
 0x1b7   : > { %v5600_v44 = vadd.f32 %v2326_v9, %v7041_v13  ;;  %v2803_v22 = vmul.f32 %v2801_v25, %v7042_v10  ;;  %v2892_v15 = vrot.slane %v5529_v42, %v4346_v49  ;;  %v5606_v45 = vadd.f32 %v2455_v46, %v7043_v60 }
 0x1b8   : > { %v2812_v43 = vadd.f32 %v2810_v39, %v2804_v31  ;;  %v2898_v7 = vrot.slane %v5529_v42, %v4348_v50  ;;  %v2906_v41 = vrot.slane %v5529_v42, %v4350_v51  ;;  %v2818_v18 = vmul.f32 %v2817_v57, %v7044_v61  ;;  %v7046_v39 = vld [vmem:[#allocation70_spill] sm:$0xff] }
 0x1b9   : > { %v2805_v21 = vadd.f32 %v2803_v22, %v2797_v4  ;;  %v2893_v9 = vmul.f32 %v2892_v15, %v7027_v29  ;;  %v2894_v25 = vmul.f32 %v2892_v15, %v7028_v54  ;;  %v2584_v33 = vmul.f32 %v7045_v8, %v5456_v3 }
 0x1ba   : > { %v2713_v46 = vmul.f32 %v6985_v19, %v5456_v3  ;;  %v2899_v40 = vmul.f32 %v2898_v7, %v7029_v32  ;;  %v2900_v31 = vmul.f32 %v2898_v7, %v7030_v30  ;;  %v2811_v13 = vmul.f32 %v2809_v11, %v7046_v39  ;;  %v7047_v19 = vld [vmem:[#allocation22_spill] sm:$0xff] }
 0x1bb   : > { %v2820_v60 = vadd.f32 %v2818_v18, %v2812_v43  ;;  %v2914_v4 = vrot.slane %v5529_v42, %v4352_v52  ;;  %v2922_v22 = vrot.slane %v5529_v42, %v4358_v55  ;;  %v2907_v8 = vmul.f32 %v2906_v41, %v7035_v17 }
 0x1bc   : > { %v2901_v15 = vadd.f32 %v2899_v40, %v2893_v9  ;;  %v2902_v54 = vadd.f32 %v2900_v31, %v2894_v25  ;;  %v2908_v29 = vmul.f32 %v2906_v41, %v7036_v47  ;;  %v2586_v6 = vadd.f32 %v2584_v33, %v7047_v19  ;;  %v7048_v9 = vld [vmem:[#allocation71_spill] sm:$0xff]  ;;  %v7049_v31 = vld [vmem:[#allocation105_spill] sm:$0xff] }
 0x1bd   : > { %v2715_v32 = vadd.f32 %v2713_v46, %v5400_v63  ;;  %v2813_v7 = vadd.f32 %v2811_v13, %v2805_v21  ;;  %v2915_v11 = vmul.f32 %v2914_v4, %v4461_v36  ;;  %v2916_v30 = vmul.f32 %v2914_v4, %v7039_v37 }
 0x1be   : > { %v2909_v43 = vadd.f32 %v2907_v8, %v2901_v15  ;;  %v2910_v18 = vadd.f32 %v2908_v29, %v2902_v54  ;;  %v2930_v55 = vrot.slane %v5529_v42, %v4360_v56  ;;  %v2819_v25 = vmul.f32 %v2817_v57, %v7048_v9  ;;  %v7050_v57 = vld [vmem:[#allocation106_spill] sm:$0xff] }
 0x1bf   : > { %v2828_v40 = vadd.f32 %v5388_v35, %v2820_v60  ;;  %v2842_v41 = vmul.f32 %v5374_v24, %v5456_v3  ;;  %v2923_v33 = vmul.f32 %v2922_v22, %v4623_v2  ;;  %v2924_v46 = vmul.f32 %v2922_v22, %v4577_v0  ;;  %v7051_v22 = vld [vmem:[#allocation33_spill] sm:$0xff] }
 0x1c0   : > { %v2917_v63 = vadd.f32 %v2915_v11, %v2909_v43  ;;  %v2918_v21 = vadd.f32 %v2916_v30, %v2910_v18  ;;  %v2938_v29 = vrot.slane %v5529_v42, %v4362_v58  ;;  %v2821_v54 = vadd.f32 %v2819_v25, %v2813_v7 }
 0x1c1   : > { %v1561_v13 = vmul.f32 %v7049_v31, %v5529_v42  ;;  %v1689_v4 = vmul.f32 %v7050_v57, %v5529_v42  ;;  %v2946_v35 = vrot.slane %v5529_v42, %v4364_v59  ;;  %v2931_v15 = vmul.f32 %v2930_v55, %v4700_v14 }
 0x1c2   : > { %v2925_v24 = vadd.f32 %v2923_v33, %v2917_v63  ;;  %v2926_v60 = vadd.f32 %v2924_v46, %v2918_v21  ;;  %v2932_v30 = vmul.f32 %v2930_v55, %v7042_v10  ;;  %v2836_v8 = vadd.f32 %v7051_v22, %v2828_v40  ;;  %v7052_v63 = vld [vmem:[#allocation23_spill] sm:$0xff] }
 0x1c3   : > { %v5653_v19 = vmul.f32 %v5453_v23, %v5456_v3  ;;  %v5655_v7 = vadd.f32 %v1561_v13, %v1555_v62  ;;  %v5657_v11 = vadd.f32 %v1689_v4, %v1683_v34  ;;  %v2939_v25 = vmul.f32 %v2938_v29, %v6953_v16  ;;  %v7053_v55 = vld [vmem:[#allocation35_spill] sm:$0xff]  ;;  %v7055_v23 = vld [vmem:[#allocation56_spill] sm:$0xff] }
 0x1c4   : > { %v2933_v43 = vadd.f32 %v2931_v15, %v2925_v24  ;;  %v2934_v18 = vadd.f32 %v2932_v30, %v2926_v60  ;;  %v2940_v33 = vmul.f32 %v2938_v29, %v7046_v39  ;;  %v2829_v21 = vadd.f32 %v7052_v63, %v2821_v54  ;;  %v7054_v40 = vld [vmem:[#allocation43_spill] sm:$0xff]  ;;  %v7057_v54 = vld [vmem:[#allocation78_spill] sm:$0xff]  ;;  %v7058_v15 = vld [vmem:[#allocation49_spill] sm:$0xff] }
 0x1c5   : > { %v1818_v46 = vmul.f32 %v7053_v55, %v5529_v42  ;;  %v1947_v31 = vmul.f32 %v7054_v40, %v5529_v42  ;;  %v2076_v62 = vmul.f32 %v7055_v23, %v5529_v42  ;;  %v2947_v57 = vmul.f32 %v2946_v35, %v7044_v61  ;;  %v7063_v55 = vld [vmem:[#allocation54_spill] sm:$0xff]  ;;  %v7086_v39 = vld [vmem:[#allocation89_spill] sm:$0xff] }
 0x1c6   : > { %v2941_v13 = vadd.f32 %v2939_v25, %v2933_v43  ;;  %v2942_v34 = vadd.f32 %v2940_v33, %v2934_v18  ;;  %v2948_v4 = vmul.f32 %v2946_v35, %v7048_v9  ;;  %v2205_v29 = vmul.f32 %v7001_v28, %v5529_v42  ;;  %v7062_v28 = vld [vmem:[#allocation32_spill] sm:$0xff]  ;;  %v7085_v9 = vld [vmem:[#allocation77_spill] sm:$0xff] }
 0x1c7   : > { %v5671_v24 = vadd.f32 %v1818_v46, %v5585_v26  ;;  %v2334_v60 = vmul.f32 %v7057_v54, %v5529_v42  ;;  %v2463_v30 = vmul.f32 %v7058_v15, %v5529_v42  ;;  %v2844_v22 = vadd.f32 %v2842_v41, %v2836_v8  ;;  %v7077_v15 = vld [vmem:[#allocation66_spill] sm:$0xff] }
 0x1c8   : > { %v5680_v43 = vadd.f32 %v1947_v31, %v5590_v5  ;;  %v2949_v18 = vadd.f32 %v2947_v57, %v2941_v13  ;;  %v2950_v25 = vadd.f32 %v2948_v4, %v2942_v34  ;;  %v5683_v35 = vadd.f32 %v2076_v62, %v5593_v48  ;;  %v7067_v31 = vld [vmem:[#allocation98_spill] sm:$0xff]  ;;  %v7071_v13 = vld [vmem:[#allocation25_spill] sm:$0xff]  ;;  %v7073_v57 = vld [vmem:[#allocation36_spill] sm:$0xff] }
 0x1c9   : > { %7056 = vst [vmem:[#allocation61_spill] sm:$0xff] %v5671_v24  ;;  %v5686_v26 = vadd.f32 %v2205_v29, %v5597_v12  ;;  %v2592_v33 = vmul.f32 %v7062_v28, %v5529_v42  ;;  %v2721_v63 = vmul.f32 %v7011_v1, %v5529_v42  ;;  %v2850_v41 = vmul.f32 %v5385_v53, %v5529_v42  ;;  %v7075_v29 = vld [vmem:[#allocation64_spill] sm:$0xff] }
 0x1ca   : > { %7059 = vst [vmem:[#allocation20_spill] sm:$0xff] %v5680_v43  ;;  %7060 = vst [vmem:[#allocation21_spill] sm:$0xff] %v5683_v35  ;;  %v2958_v5 = vadd.f32 %v5484_v27, %v2950_v25  ;;  %v1570_v8 = vmul.f32 %v5538_v38, %v5534_v20  ;;  %v2837_v48 = vadd.f32 %v7063_v55, %v2829_v21  ;;  %v7070_v27 = vld [vmem:[#allocation29_spill] sm:$0xff]  ;;  %v7072_v21 = vld [vmem:[#allocation114_spill] sm:$0xff] }
 0x1cb   : > { %7061 = vst [vmem:[#allocation22_spill] sm:$0xff] %v5686_v26  ;;  %v5699_v46 = vadd.f32 %v2334_v60, %v5600_v44  ;;  %v5702_v12 = vadd.f32 %v2463_v30, %v5606_v45  ;;  %v5704_v40 = vadd.f32 %v2592_v33, %v2586_v6  ;;  %v2957_v1 = vadd.f32 %v7067_v31, %v2949_v18  ;;  %v7074_v6 = vld [vmem:[#allocation44_spill] sm:$0xff]  ;;  %v7079_v25 = vld [vmem:[#allocation62_spill] sm:$0xff]  ;;  %v7080_v33 = vld [vmem:[#allocation93_spill] sm:$0xff] }
 0x1cc   : > { %v5707_v23 = vadd.f32 %v2721_v63, %v2715_v32  ;;  %v5709_v53 = vadd.f32 %v2850_v41, %v2844_v22  ;;  %v2979_v62 = vmul.f32 %v7070_v27, %v5529_v42  ;;  %v1572_v34 = vadd.f32 %v1570_v8, %v7071_v13  ;;  %v7076_v32 = vld [vmem:[#allocation57_spill] sm:$0xff]  ;;  %v7078_v22 = vld [vmem:[#allocation79_spill] sm:$0xff]  ;;  %v7081_v41 = vld [vmem:[#allocation34_spill] sm:$0xff] }
 0x1cd   : > { %7064 = vst [vmem:[#allocation105_spill] sm:$0xff] %v5699_v46  ;;  %7065 = vst [vmem:[#allocation106_spill] sm:$0xff] %v5702_v12  ;;  %v1698_v44 = vmul.f32 %v7072_v21, %v5534_v20  ;;  %v1827_v45 = vmul.f32 %v7073_v57, %v5534_v20  ;;  %v1956_v4 = vmul.f32 %v7074_v6, %v5534_v20  ;;  %v7082_v55 = vld [vmem:[#allocation42_spill] sm:$0xff]  ;;  %v7083_v27 = vld [vmem:[#allocation55_spill] sm:$0xff] }
 0x1ce   : > { %7066 = vst [vmem:[#allocation33_spill] sm:$0xff] %v5704_v40  ;;  %7068 = vst [vmem:[#allocation23_spill] sm:$0xff] %v5707_v23  ;;  %v2966_v54 = vadd.f32 %v7075_v29, %v2958_v5  ;;  %v2085_v60 = vmul.f32 %v7076_v32, %v5534_v20  ;;  %v2214_v30 = vmul.f32 %v7077_v15, %v5534_v20  ;;  %v7084_v5 = vld [vmem:[#allocation97_spill] sm:$0xff]  ;;  %v7087_v12 = vld [vmem:[#allocation50_spill] sm:$0xff] }
 0x1cf   : > { %7069 = vst [vmem:[#allocation35_spill] sm:$0xff] %v5709_v53  ;;  %v2343_v18 = vmul.f32 %v7078_v22, %v5534_v20  ;;  %v2845_v28 = vadd.f32 %v7079_v25, %v2837_v48  ;;  %v2965_v63 = vadd.f32 %v7080_v33, %v2957_v1  ;;  %v1700_v8 = vadd.f32 %v1698_v44, %v7081_v41  ;;  %v7088_v1 = vld [vmem:[#allocation53_spill] sm:$0xff]  ;;  %v7089_v44 = vld [vmem:[#allocation95_spill] sm:$0xff]  ;;  %v7098_v46 = vld [vmem:[#allocation108_spill] sm:$0xff] }
 0x1d0   : > { %v1829_v31 = vadd.f32 %v1827_v45, %v7082_v55  ;;  %v1958_v13 = vadd.f32 %v1956_v4, %v7083_v27  ;;  %v2087_v29 = vadd.f32 %v2085_v60, %v7084_v5  ;;  %v2216_v53 = vadd.f32 %v2214_v30, %v7085_v9  ;;  %v7090_v4 = vld [vmem:[#allocation96_spill] sm:$0xff]  ;;  %v7092_v55 = vld [vmem:[#allocation90_spill] sm:$0xff] }
 0x1d1   : > { %v2345_v23 = vadd.f32 %v2343_v18, %v7086_v39  ;;  %v3083_v40 = vrot.slane %v5534_v20, %v4346_v49  ;;  %v2472_v48 = vmul.f32 %v7087_v12, %v5534_v20  ;;  %v2601_v25 = vmul.f32 %v7088_v1, %v5534_v20  ;;  %v7091_v9 = vld [vmem:[#allocation92_spill] sm:$0xff]  ;;  %v7106_v12 = vld [vmem:[#allocation86_spill] sm:$0xff] }
 0x1d2   : > { %v2974_v33 = vadd.f32 %v7089_v44, %v2966_v54  ;;  %v3091_v45 = vrot.slane %v5534_v20, %v4348_v50  ;;  %v2730_v60 = vmul.f32 %v7090_v4, %v5534_v20  ;;  %v2853_v30 = vadd.f32 %v7091_v9, %v2845_v28  ;;  %v7093_v54 = vld [vmem:[#allocation41_spill] sm:$0xff]  ;;  %v7094_v44 = vld [vmem:[#allocation16_spill] sm:$0xff]  ;;  %v7096_v4 = vld [vmem:[#allocation91_spill] sm:$0xff] }
 0x1d3   : > { %v3099_v39 = vrot.slane %v5534_v20, %v4350_v51  ;;  %v3107_v18 = vrot.slane %v5534_v20, %v4352_v52  ;;  %v2973_v41 = vadd.f32 %v5653_v19, %v2965_v63  ;;  %v2474_v27 = vadd.f32 %v2472_v48, %v7092_v55  ;;  %v7097_v28 = vld [vmem:[#allocation94_spill] sm:$0xff]  ;;  %v7099_v26 = vld [vmem:[#allocation88_spill] sm:$0xff]  ;;  %v7101_v19 = vld [vmem:[#allocation107_spill] sm:$0xff] }
 0x1d4   : > { %v2859_v5 = vmul.f32 %v7093_v54, %v5534_v20  ;;  %v5757_v61 = vrot.slane %v5534_v20, %v7094_v44  ;;  %v2603_v1 = vadd.f32 %v2601_v25, %v7096_v4  ;;  %v2732_v9 = vadd.f32 %v2730_v60, %v7097_v28  ;;  %v7102_v48 = vld [vmem:[#allocation74_spill] sm:$0xff]  ;;  %v7109_v60 = vld [vmem:[#allocation103_spill] sm:$0xff] }
 0x1d5   : > { %v2988_v16 = vmul.f32 %v7098_v46, %v5534_v20  ;;  %v5764_v35 = vmul.f32 %v3083_v40, %v7099_v26  ;;  %v2982_v63 = vadd.f32 %v7101_v19, %v2974_v33  ;;  %v5768_v55 = vmul.f32 %v3083_v40, %v7102_v48  ;;  %v7104_v54 = vld [vmem:[#allocation102_spill] sm:$0xff]  ;;  %v7113_v40 = vld [vmem:[#allocation104_spill] sm:$0xff] }
 0x1d6   : > { %7095 = vst [vmem:[#allocation43_spill] sm:$0xff] %v5757_v61  ;;  %v5771_v10 = vmul.f32 %v3091_v45, %v7104_v54  ;;  %v5774_v43 = vmul.f32 %v3091_v45, %v7106_v12  ;;  %v2861_v25 = vadd.f32 %v2859_v5, %v2853_v30  ;;  %v5777_v4 = vmul.f32 %v3099_v39, %v5456_v3  ;;  %v7121_v5 = vld [vmem:[#allocation117_spill] sm:$0xff]  ;;  %v7128_v46 = vld [vmem:[#allocation80_spill] sm:$0xff] }
 0x1d7   : > { %7100 = vst [vmem:[#allocation56_spill] sm:$0xff] %v5764_v35  ;;  %7103 = vst [vmem:[#allocation78_spill] sm:$0xff] %v5768_v55  ;;  %v5780_v28 = vmul.f32 %v3099_v39, %v7109_v60  ;;  %v5783_v35 = vmul.f32 %v3107_v18, %v5529_v42  ;;  %v5785_v33 = vadd.f32 %v2979_v62, %v2973_v41  ;;  %v7119_v62 = vld [vmem:[#allocation115_spill] sm:$0xff]  ;;  %v7120_v41 = vld [vmem:[#allocation116_spill] sm:$0xff] }
 0x1d8   : > { %7105 = vst [vmem:[#allocation49_spill] sm:$0xff] %v5771_v10  ;;  %7107 = vst [vmem:[#allocation32_spill] sm:$0xff] %v5774_v43  ;;  %v5788_v19 = vmul.f32 %v3107_v18, %v7113_v40  ;;  %v5792_v55 = vmul.f32 %v5757_v61, %v5534_v20  ;;  %v5796_v45 = vrot.slane %v5534_v20, %v4360_v56  ;;  %v7123_v43 = vld [vmem:[#allocation45_spill] sm:$0xff]  ;;  %v7124_v10 = vld [vmem:[#allocation58_spill] sm:$0xff] }
 0x1d9   : > { %7108 = vst [vmem:[#allocation54_spill] sm:$0xff] %v5777_v4  ;;  %7110 = vst [vmem:[#allocation98_spill] sm:$0xff] %v5780_v28  ;;  %v5800_v30 = vrot.slane %v5534_v20, %v4362_v58  ;;  %v5804_v39 = vrot.slane %v5534_v20, %v4364_v59  ;;  %v1578_v18 = vmul.f32 %v7120_v41, %v7119_v62 }
 0x1da   : > { %7111 = vst [vmem:[#allocation29_spill] sm:$0xff] %v5783_v35  ;;  %7112 = vst [vmem:[#allocation25_spill] sm:$0xff] %v5785_v33  ;;  %v2990_v28 = vadd.f32 %v2988_v16, %v2982_v63  ;;  %v1964_v4 = vmul.f32 %v7123_v43, %v7119_v62  ;;  %v1225_v16 = vpop.f32.mrf.mxu0 }
 0x1db   : > { %7114 = vst [vmem:[#allocation114_spill] sm:$0xff] %v5788_v19  ;;  %7115 = vst [vmem:[#allocation36_spill] sm:$0xff] %v5792_v55  ;;  %v1706_v19 = vmul.f32 %v7121_v5, %v7119_v62  ;;  %v7122_v55 = vld [vmem:[#allocation37_spill] sm:$0xff]  ;;  %v5816_v61 = vadd.f32 %v1578_v18, %v1572_v34  ;;  %v2351_v5 = vmul.f32 %v7128_v46, %v7119_v62  ;;  %v7134_v18 = vld [vmem:[#allocation27_spill] sm:$0xff] }
 0x1dc   : > { %7116 = vst [vmem:[#allocation44_spill] sm:$0xff] %v5796_v45  ;;  %7117 = vst [vmem:[#allocation64_spill] sm:$0xff] %v5800_v30  ;;  %v1835_v35 = vmul.f32 %v7122_v55, %v7119_v62  ;;  %v2093_v30 = vmul.f32 %v7124_v10, %v7119_v62  ;;  %v5826_v55 = vadd.f32 %v1964_v4, %v1958_v13  ;;  %v7136_v13 = vld [vmem:[#allocation76_spill] sm:$0xff]  ;;  %v7137_v4 = vld [vmem:[#allocation109_spill] sm:$0xff] }
 0x1dd   : > { %7118 = vst [vmem:[#allocation57_spill] sm:$0xff] %v5804_v39  ;;  %7125 = vst [vmem:[#allocation66_spill] sm:$0xff] %v5816_v61  ;;  %v5818_v33 = vadd.f32 %v1706_v19, %v1700_v8  ;;  %v7127_v39 = vld [vmem:[#allocation67_spill] sm:$0xff]  ;;  %v3212_v10 = vrot.slane %v7119_v62, %v4346_v49  ;;  %v3220_v61 = vrot.slane %v7119_v62, %v4348_v50 }
 0x1de   : > { %v2222_v41 = vmul.f32 %v7127_v39, %v7119_v62  ;;  %v5824_v63 = vadd.f32 %v1835_v35, %v1829_v31  ;;  %7130 = vst [vmem:[#allocation93_spill] sm:$0xff] %v5826_v55  ;;  %v5828_v24 = vadd.f32 %v2093_v30, %v2087_v29  ;;  %v7133_v8 = vld [vmem:[#allocation83_spill] sm:$0xff]  ;;  %v2867_v29 = vmul.f32 %v7136_v13, %v7119_v62 }
 0x1df   : > { %7126 = vst [vmem:[#allocation79_spill] sm:$0xff] %v5818_v33  ;;  %v2480_v19 = vmul.f32 %v7133_v8, %v7119_v62  ;;  %v2609_v33 = vmul.f32 %v7134_v18, %v7119_v62  ;;  %v7135_v35 = vld [vmem:[#allocation99_spill] sm:$0xff]  ;;  %v2996_v30 = vmul.f32 %v7137_v4, %v7119_v62  ;;  %v5866_v4 = vmul.f32 %v3212_v10, %v7099_v26 }
 0x1e0   : > { %7129 = vst [vmem:[#allocation62_spill] sm:$0xff] %v5824_v63  ;;  %7131 = vst [vmem:[#allocation34_spill] sm:$0xff] %v5828_v24  ;;  %v5832_v34 = vadd.f32 %v2222_v41, %v2216_v53  ;;  %v2738_v31 = vmul.f32 %v7135_v35, %v7119_v62  ;;  %v7138_v53 = vld [vmem:[#allocation8_spill] sm:$0xff]  ;;  %v5857_v63 = vmul.f32 %v5796_v45, %v7119_v62 }
 0x1e1   : > { %v5847_v41 = vadd.f32 %v1225_v16, %v7138_v53  ;;  %v5851_v24 = vadd.f32 %v2480_v19, %v2474_v27  ;;  %v5853_v55 = vadd.f32 %v2609_v33, %v2603_v1  ;;  %v5861_v18 = vadd.f32 %v2867_v29, %v2861_v25  ;;  %v1304_v33 = vpop.f32.mrf.mxu1  ;;  %v7151_v29 = vld [vmem:[#allocation10_spill] sm:$0xff] }
 0x1e2   : > { %7132 = vst [vmem:[#allocation42_spill] sm:$0xff] %v5832_v34  ;;  %v5849_v34 = vadd.f32 %v2351_v5, %v2345_v23  ;;  %7143 = vst [vmem:[#allocation95_spill] sm:$0xff] %v5857_v63  ;;  %v5859_v35 = vadd.f32 %v2738_v31, %v2732_v9  ;;  %v5863_v13 = vadd.f32 %v2996_v30, %v2990_v28 }
 0x1e3   : > { %7139 = vst [vmem:[#allocation55_spill] sm:$0xff] %v5847_v41  ;;  %7141 = vst [vmem:[#allocation77_spill] sm:$0xff] %v5851_v24  ;;  %v5869_v23 = vmul.f32 %v3212_v10, %v7102_v48  ;;  %v5872_v27 = vmul.f32 %v3220_v61, %v7104_v54  ;;  %v5875_v1 = vmul.f32 %v3220_v61, %v7106_v12  ;;  %v7152_v12 = vld [vmem:[#allocation12_spill] sm:$0xff] }
 0x1e4   : > { %7140 = vst [vmem:[#allocation97_spill] sm:$0xff] %v5849_v34  ;;  %7142 = vst [vmem:[#allocation89_spill] sm:$0xff] %v5853_v55  ;;  %v3228_v9 = vrot.slane %v7119_v62, %v4350_v51  ;;  %v3236_v25 = vrot.slane %v7119_v62, %v4352_v52  ;;  %v5883_v28 = vrot.slane %v7119_v62, %v7094_v44  ;;  %v7175_v34 = vld [vmem:[#allocation106_spill] sm:$0xff] }
 0x1e5   : > { %7144 = vst [vmem:[#allocation92_spill] sm:$0xff] %v5859_v35  ;;  %7145 = vst [vmem:[#allocation90_spill] sm:$0xff] %v5861_v18  ;;  %v3021_v10 = vrot.slane %v5847_v41, %v4346_v49  ;;  %v3027_v5 = vrot.slane %v5847_v41, %v4348_v50  ;;  %v5891_v61 = vrot.slane %v7119_v62, %v4360_v56  ;;  %v7157_v18 = vld [vmem:[#allocation13_spill] sm:$0xff] }
 0x1e6   : > { %7146 = vst [vmem:[#allocation91_spill] sm:$0xff] %v5863_v13  ;;  %7147 = vst [vmem:[#allocation94_spill] sm:$0xff] %v5872_v27  ;;  %v5895_v16 = vrot.slane %v7119_v62, %v4362_v58  ;;  %v5899_v19 = vrot.slane %v7119_v62, %v4364_v59  ;;  %v3035_v31 = vrot.slane %v5847_v41, %v4350_v51 }
 0x1e7   : > { %7148 = vst [vmem:[#allocation107_spill] sm:$0xff] %v5891_v61  ;;  %v3022_v30 = vmul.f32 %v3021_v10, %v7151_v29  ;;  %v3023_v54 = vmul.f32 %v3021_v10, %v7152_v12  ;;  %v3043_v48 = vrot.slane %v5847_v41, %v4352_v52  ;;  %v5908_v26 = vadd.f32 %v1304_v33, %v7138_v53 }
 0x1e8   : > { %7149 = vst [vmem:[#allocation45_spill] sm:$0xff] %v5895_v16  ;;  %7150 = vst [vmem:[#allocation67_spill] sm:$0xff] %v5899_v19  ;;  %v5911_v45 = vmul.f32 %v3228_v9, %v5456_v3  ;;  %v5914_v16 = vmul.f32 %v3228_v9, %v7109_v60  ;;  %v7156_v19 = vld [vmem:[#allocation11_spill] sm:$0xff]  ;;  %v3029_v35 = vmul.f32 %v3027_v5, %v7157_v18 }
 0x1e9   : > { %7153 = vst [vmem:[#allocation80_spill] sm:$0xff] %v5908_v26  ;;  %v3028_v13 = vmul.f32 %v3027_v5, %v7156_v19  ;;  %v5919_v55 = vmul.f32 %v3236_v25, %v5529_v42  ;;  %v5922_v10 = vmul.f32 %v3236_v25, %v7113_v40  ;;  %v5926_v33 = vmul.f32 %v5883_v28, %v5534_v20 }
 0x1ea   : > { %7154 = vst [vmem:[#allocation83_spill] sm:$0xff] %v5911_v45  ;;  %7155 = vst [vmem:[#allocation118_spill] sm:$0xff] %v5914_v16  ;;  %v3036_v53 = vmul.f32 %v3035_v31, %v7035_v17  ;;  %v3031_v45 = vadd.f32 %v3029_v35, %v3023_v54  ;;  %v3037_v9 = vmul.f32 %v3035_v31, %v7036_v47 }
 0x1eb   : > { %7158 = vst [vmem:[#allocation119_spill] sm:$0xff] %v5919_v55  ;;  %7159 = vst [vmem:[#allocation120_spill] sm:$0xff] %v5922_v10  ;;  %v3030_v3 = vadd.f32 %v3028_v13, %v3022_v30  ;;  %v3051_v60 = vrot.slane %v5847_v41, %v7094_v44  ;;  %v5934_v5 = vmul.f32 %v5891_v61, %v7119_v62  ;;  %v7166_v55 = vld [vmem:[#allocation21_spill] sm:$0xff] }
 0x1ec   : > { %7160 = vst [vmem:[#allocation121_spill] sm:$0xff] %v5926_v33  ;;  %v1569_v25 = vmul.f32 %v5538_v38, %v5847_v41  ;;  %v1697_v20 = vmul.f32 %v7072_v21, %v5847_v41  ;;  %v3044_v40 = vmul.f32 %v3043_v48, %v4461_v36  ;;  %v3039_v13 = vadd.f32 %v3037_v9, %v3031_v45  ;;  %v7169_v33 = vld [vmem:[#allocation105_spill] sm:$0xff] }
 0x1ed   : > { %7161 = vst [vmem:[#allocation122_spill] sm:$0xff] %v5934_v5  ;;  %v3038_v42 = vadd.f32 %v3036_v53, %v3030_v3  ;;  %v3045_v54 = vmul.f32 %v3043_v48, %v7039_v37  ;;  %v3059_v35 = vrot.slane %v5847_v41, %v4360_v56  ;;  %v1826_v31 = vmul.f32 %v7073_v57, %v5847_v41 }
 0x1ee   : > { %v1955_v30 = vmul.f32 %v7074_v6, %v5847_v41  ;;  %v2084_v38 = vmul.f32 %v7076_v32, %v5847_v41  ;;  %v3067_v21 = vrot.slane %v5847_v41, %v4362_v58  ;;  %v3052_v45 = vmul.f32 %v3051_v60, %v4623_v2 }
 0x1ef   : > { %v3046_v62 = vadd.f32 %v3044_v40, %v3038_v42  ;;  %v3047_v3 = vadd.f32 %v3045_v54, %v3039_v13  ;;  %v3053_v48 = vmul.f32 %v3051_v60, %v4577_v0  ;;  %v1571_v53 = vadd.f32 %v1569_v25, %v5655_v7  ;;  %v7162_v13 = vld [vmem:[#allocation61_spill] sm:$0xff]  ;;  %v7163_v7 = vld [vmem:[#allocation20_spill] sm:$0xff] }
 0x1f0   : > { %v5956_v9 = vadd.f32 %v1697_v20, %v5657_v11  ;;  %v2213_v57 = vmul.f32 %v7077_v15, %v5847_v41  ;;  %v2342_v6 = vmul.f32 %v7078_v22, %v5847_v41  ;;  %v3060_v42 = vmul.f32 %v3059_v35, %v4700_v14  ;;  %v7164_v20 = vld [vmem:[#allocation50_spill] sm:$0xff]  ;;  %v7165_v15 = vld [vmem:[#allocation51_spill] sm:$0xff] }
 0x1f1   : > { %v3054_v32 = vadd.f32 %v3052_v45, %v3046_v62  ;;  %v3055_v61 = vadd.f32 %v3053_v48, %v3047_v3  ;;  %v3075_v40 = vrot.slane %v5847_v41, %v4364_v59  ;;  %v5966_v60 = vadd.f32 %v1826_v31, %v7162_v13  ;;  %v7167_v62 = vld [vmem:[#allocation22_spill] sm:$0xff]  ;;  %v7168_v48 = vld [vmem:[#allocation72_spill] sm:$0xff] }
 0x1f2   : > { %v5969_v25 = vadd.f32 %v1955_v30, %v7163_v7  ;;  %v2471_v11 = vmul.f32 %v7164_v20, %v5847_v41  ;;  %v3061_v54 = vmul.f32 %v3059_v35, %v7165_v15  ;;  %v5975_v22 = vadd.f32 %v2084_v38, %v7166_v55  ;;  %v7170_v30 = vld [vmem:[#allocation53_spill] sm:$0xff]  ;;  %v7171_v7 = vld [vmem:[#allocation96_spill] sm:$0xff] }
 0x1f3   : > { %v5978_v3 = vadd.f32 %v2213_v57, %v7167_v62  ;;  %v3062_v45 = vadd.f32 %v3060_v42, %v3054_v32  ;;  %v3068_v5 = vmul.f32 %v3067_v21, %v7168_v48  ;;  %v5982_v31 = vadd.f32 %v2342_v6, %v7169_v33  ;;  %v7172_v35 = vld [vmem:[#allocation41_spill] sm:$0xff]  ;;  %v7173_v38 = vld [vmem:[#allocation108_spill] sm:$0xff] }
 0x1f4   : > { %v2600_v13 = vmul.f32 %v7170_v30, %v5847_v41  ;;  %v2729_v20 = vmul.f32 %v7171_v7, %v5847_v41  ;;  %v3063_v24 = vadd.f32 %v3061_v54, %v3055_v61  ;;  %v2858_v55 = vmul.f32 %v7172_v35, %v5847_v41  ;;  %v7174_v32 = vld [vmem:[#allocation73_spill] sm:$0xff]  ;;  %v7177_v30 = vld [vmem:[#allocation23_spill] sm:$0xff]  ;;  %v7179_v7 = vld [vmem:[#allocation70_spill] sm:$0xff] }
 0x1f5   : > { %v2987_v57 = vmul.f32 %v7173_v38, %v5847_v41  ;;  %v3070_v62 = vadd.f32 %v3068_v5, %v3062_v45  ;;  %v3076_v42 = vmul.f32 %v3075_v40, %v7174_v32  ;;  %v5994_v10 = vadd.f32 %v2471_v11, %v7175_v34  ;;  %v7176_v33 = vld [vmem:[#allocation33_spill] sm:$0xff]  ;;  %v7180_v54 = vld [vmem:[#allocation35_spill] sm:$0xff] }
 0x1f6   : > { %v5997_v6 = vadd.f32 %v2600_v13, %v7176_v33  ;;  %v6000_v63 = vadd.f32 %v2729_v20, %v7177_v30  ;;  %v3069_v61 = vmul.f32 %v3067_v21, %v7179_v7  ;;  %v6004_v27 = vadd.f32 %v2858_v55, %v7180_v54  ;;  %v7182_v35 = vld [vmem:[#allocation25_spill] sm:$0xff]  ;;  %v7184_v11 = vld [vmem:[#allocation71_spill] sm:$0xff]  ;;  %v7185_v21 = vld [vmem:[#allocation56_spill] sm:$0xff] }
 0x1f7   : > { %v6007_v16 = vadd.f32 %v2987_v57, %v7182_v35  ;;  %v3078_v5 = vadd.f32 %v3076_v42, %v3070_v62  ;;  %v3150_v45 = vrot.slane %v5908_v26, %v4346_v49  ;;  %v3077_v38 = vmul.f32 %v3075_v40, %v7184_v11  ;;  %v7186_v42 = vld [vmem:[#allocation43_spill] sm:$0xff]  ;;  %v7188_v54 = vld [vmem:[#allocation116_spill] sm:$0xff] }
 0x1f8   : > { %7178 = vst [vmem:[#allocation61_spill] sm:$0xff] %v6000_v63  ;;  %7181 = vst [vmem:[#allocation20_spill] sm:$0xff] %v6004_v27  ;;  %v3071_v34 = vadd.f32 %v3069_v61, %v3063_v24  ;;  %v3156_v13 = vrot.slane %v5908_v26, %v4348_v50  ;;  %v3164_v20 = vrot.slane %v5908_v26, %v4350_v51 }
 0x1f9   : > { %7183 = vst [vmem:[#allocation50_spill] sm:$0xff] %v6007_v16  ;;  %v3086_v33 = vadd.f32 %v7185_v21, %v3078_v5  ;;  %v3151_v55 = vmul.f32 %v3150_v45, %v7151_v29  ;;  %v3152_v57 = vmul.f32 %v3150_v45, %v7152_v12  ;;  %v3172_v62 = vrot.slane %v5908_v26, %v4352_v52  ;;  %v7189_v5 = vld [vmem:[#allocation117_spill] sm:$0xff] }
 0x1fa   : > { %v3116_v24 = vmul.f32 %v7186_v42, %v5847_v41  ;;  %v6025_v40 = vmul.f32 %v5883_v28, %v5847_v41  ;;  %v3157_v30 = vmul.f32 %v3156_v13, %v7156_v19  ;;  %v3158_v61 = vmul.f32 %v3156_v13, %v7157_v18  ;;  %v7190_v21 = vld [vmem:[#allocation37_spill] sm:$0xff] }
 0x1fb   : > { %v1577_v35 = vmul.f32 %v7188_v54, %v5908_v26  ;;  %v1705_v45 = vmul.f32 %v7189_v5, %v5908_v26  ;;  %v1834_v29 = vmul.f32 %v7190_v21, %v5908_v26  ;;  %v3180_v42 = vrot.slane %v5908_v26, %v7094_v44  ;;  %v7191_v13 = vld [vmem:[#allocation49_spill] sm:$0xff] }
 0x1fc   : > { %7187 = vst [vmem:[#allocation21_spill] sm:$0xff] %v6025_v40  ;;  %v3159_v52 = vadd.f32 %v3157_v30, %v3151_v55  ;;  %v3160_v16 = vadd.f32 %v3158_v61, %v3152_v57  ;;  %v3165_v28 = vmul.f32 %v3164_v20, %v7035_v17  ;;  %v3166_v19 = vmul.f32 %v3164_v20, %v7036_v47  ;;  %v7192_v30 = vld [vmem:[#allocation58_spill] sm:$0xff]  ;;  %v7233_v47 = vld [vmem:[#allocation89_spill] sm:$0xff] }
 0x1fd   : > { %v3079_v41 = vadd.f32 %v3077_v38, %v3071_v34  ;;  %v3094_v40 = vadd.f32 %v7191_v13, %v3086_v33  ;;  %v1963_v54 = vmul.f32 %v7123_v43, %v5908_v26  ;;  %v3173_v5 = vmul.f32 %v3172_v62, %v4461_v36  ;;  %v7194_v61 = vld [vmem:[#allocation54_spill] sm:$0xff]  ;;  %v7229_v36 = vld [vmem:[#allocation95_spill] sm:$0xff] }
 0x1fe   : > { %v3167_v27 = vadd.f32 %v3165_v28, %v3159_v52  ;;  %v3168_v63 = vadd.f32 %v3166_v19, %v3160_v16  ;;  %v3174_v21 = vmul.f32 %v3172_v62, %v7039_v37  ;;  %v3188_v55 = vrot.slane %v5908_v26, %v4360_v56  ;;  %v7193_v19 = vld [vmem:[#allocation78_spill] sm:$0xff] }
 0x1ff   : > { %v6046_v57 = vadd.f32 %v1577_v35, %v1571_v53  ;;  %v2092_v20 = vmul.f32 %v7192_v30, %v5908_v26  ;;  %v2221_v34 = vmul.f32 %v7127_v39, %v5908_v26  ;;  %v3181_v38 = vmul.f32 %v3180_v42, %v4623_v2  ;;  %v7228_v2 = vld [vmem:[#allocation110_spill] sm:$0xff] }
 0x200   : > { %v3175_v43 = vadd.f32 %v3173_v5, %v3167_v27  ;;  %v3176_v33 = vadd.f32 %v3174_v21, %v3168_v63  ;;  %v3182_v52 = vmul.f32 %v3180_v42, %v4577_v0  ;;  %v3196_v16 = vrot.slane %v5908_v26, %v4362_v58  ;;  %v3922_v42 = vpop.f32.mrf.mxu0 }
 0x201   : > { %v3087_v62 = vadd.f32 %v7193_v19, %v3079_v41  ;;  %v3102_v53 = vadd.f32 %v7194_v61, %v3094_v40  ;;  %v6059_v35 = vadd.f32 %v1705_v45, %v5956_v9  ;;  %v3204_v28 = vrot.slane %v5908_v26, %v4364_v59 }
 0x202   : > { %v3183_v39 = vadd.f32 %v3181_v38, %v3175_v43  ;;  %v3184_v13 = vadd.f32 %v3182_v52, %v3176_v33  ;;  %v3189_v27 = vmul.f32 %v3188_v55, %v4700_v14  ;;  %v3190_v63 = vmul.f32 %v3188_v55, %v7165_v15  ;;  %v7198_v55 = vld [vmem:[#allocation32_spill] sm:$0xff]  ;;  %v7199_v33 = vld [vmem:[#allocation29_spill] sm:$0xff] }
 0x203   : > { %v6066_v5 = vadd.f32 %v1834_v29, %v5966_v60  ;;  %v6069_v41 = vadd.f32 %v1963_v54, %v5969_v25  ;;  %v6072_v40 = vadd.f32 %v2092_v20, %v5975_v22  ;;  %v6075_v9 = vadd.f32 %v2221_v34, %v5978_v3  ;;  %v7200_v25 = vld [vmem:[#allocation9_spill] sm:$0xff]  ;;  %v7227_v14 = vld [vmem:[#allocation40_spill] sm:$0xff] }
 0x204   : > { %v3191_v45 = vadd.f32 %v3189_v27, %v3183_v39  ;;  %v3192_v21 = vadd.f32 %v3190_v63, %v3184_v13  ;;  %v3197_v30 = vmul.f32 %v3196_v16, %v7168_v48  ;;  %v3198_v38 = vmul.f32 %v3196_v16, %v7179_v7  ;;  %v7202_v16 = vld [vmem:[#allocation27_spill] sm:$0xff]  ;;  %v7219_v48 = vld [vmem:[#allocation81_spill] sm:$0xff] }
 0x205   : > { %7195 = vst [vmem:[#allocation22_spill] sm:$0xff] %v6069_v41  ;;  %7196 = vst [vmem:[#allocation105_spill] sm:$0xff] %v6072_v40  ;;  %v3095_v43 = vadd.f32 %v7198_v55, %v3087_v62  ;;  %v3110_v29 = vadd.f32 %v7199_v33, %v3102_v53  ;;  %v2350_v60 = vmul.f32 %v7128_v46, %v5908_v26  ;;  %v7203_v62 = vld [vmem:[#allocation99_spill] sm:$0xff]  ;;  %v7204_v46 = vld [vmem:[#allocation76_spill] sm:$0xff] }
 0x206   : > { %7197 = vst [vmem:[#allocation53_spill] sm:$0xff] %v6075_v9  ;;  %v6084_v54 = vadd.f32 %v3922_v42, %v7200_v25  ;;  %v3199_v22 = vadd.f32 %v3197_v30, %v3191_v45  ;;  %v3200_v20 = vadd.f32 %v3198_v38, %v3192_v21  ;;  %v3205_v3 = vmul.f32 %v3204_v28, %v7174_v32  ;;  %v7208_v30 = vld [vmem:[#allocation38_spill] sm:$0xff]  ;;  %v7218_v32 = vld [vmem:[#allocation68_spill] sm:$0xff]  ;;  %v7236_v9 = vld [vmem:[#allocation91_spill] sm:$0xff] }
 0x207   : > { %v3206_v34 = vmul.f32 %v3204_v28, %v7184_v11  ;;  %v2479_v52 = vmul.f32 %v7133_v8, %v5908_v26  ;;  %v6092_v19 = vmul.f32 %v7202_v16, %v5908_v26  ;;  %v6096_v61 = vmul.f32 %v7203_v62, %v5908_v26  ;;  %v7206_v28 = vld [vmem:[#allocation109_spill] sm:$0xff]  ;;  %v7209_v55 = vld [vmem:[#allocation46_spill] sm:$0xff]  ;;  %v7237_v40 = vld [vmem:[#allocation64_spill] sm:$0xff] }
 0x208   : > { %7201 = vst [vmem:[#allocation96_spill] sm:$0xff] %v6084_v54  ;;  %v6100_v53 = vmul.f32 %v7204_v46, %v5908_v26  ;;  %v6103_v39 = vadd.f32 %v2350_v60, %v5982_v31  ;;  %v6107_v13 = vmul.f32 %v7206_v28, %v5908_v26  ;;  %v3207_v8 = vadd.f32 %v3205_v3, %v3199_v22  ;;  %v7210_v33 = vld [vmem:[#allocation98_spill] sm:$0xff]  ;;  %v7213_v16 = vld [vmem:[#allocation93_spill] sm:$0xff] }
 0x209   : > { %v3208_v27 = vadd.f32 %v3206_v34, %v3200_v20  ;;  %v6109_v63 = vadd.f32 %v3116_v24, %v3110_v29  ;;  %v6112_v42 = vadd.f32 %v2479_v52, %v5994_v10  ;;  %v6116_v45 = vrot.slane %v7152_v12, %v4362_v58  ;;  %v7211_v20 = vld [vmem:[#allocation59_spill] sm:$0xff]  ;;  %v7212_v34 = vld [vmem:[#allocation62_spill] sm:$0xff]  ;;  %v7238_v41 = vld [vmem:[#allocation121_spill] sm:$0xff] }
 0x20a   : > { %7205 = vst [vmem:[#allocation41_spill] sm:$0xff] %v6103_v39  ;;  %v6120_v21 = vrot.slane %v7157_v18, %v4362_v58  ;;  %v1843_v38 = vmul.f32 %v7208_v30, %v6084_v54  ;;  %v1972_v24 = vmul.f32 %v7209_v55, %v6084_v54  ;;  %v3103_v29 = vadd.f32 %v7210_v33, %v3095_v43  ;;  %v7214_v46 = vld [vmem:[#allocation114_spill] sm:$0xff] }
 0x20b   : > { %7207 = vst [vmem:[#allocation108_spill] sm:$0xff] %v6112_v42  ;;  %v3216_v31 = vadd.f32 %v5869_v23, %v3208_v27  ;;  %v3215_v10 = vadd.f32 %v5866_v4, %v3207_v8  ;;  %v1586_v60 = vmul.f32 %v6116_v45, %v6084_v54  ;;  %v2101_v3 = vmul.f32 %v7211_v20, %v6084_v54  ;;  %v7215_v43 = vld [vmem:[#allocation66_spill] sm:$0xff]  ;;  %v7216_v4 = vld [vmem:[#allocation79_spill] sm:$0xff] }
 0x20c   : > { %v1714_v22 = vmul.f32 %v6120_v21, %v6084_v54  ;;  %v1845_v52 = vadd.f32 %v1843_v38, %v7212_v34  ;;  %v1974_v62 = vadd.f32 %v1972_v24, %v7213_v16  ;;  %v3111_v28 = vadd.f32 %v7214_v46, %v3103_v29  ;;  %v7217_v33 = vld [vmem:[#allocation34_spill] sm:$0xff]  ;;  %v7221_v38 = vld [vmem:[#allocation36_spill] sm:$0xff] }
 0x20d   : > { %v3224_v23 = vadd.f32 %v5875_v1, %v3216_v31  ;;  %v1588_v27 = vadd.f32 %v1586_v60, %v7215_v43  ;;  %v2103_v11 = vadd.f32 %v2101_v3, %v7217_v33  ;;  %v2230_v7 = vmul.f32 %v7218_v32, %v6084_v54  ;;  %v7220_v1 = vld [vmem:[#allocation84_spill] sm:$0xff]  ;;  %v7222_v24 = vld [vmem:[#allocation118_spill] sm:$0xff] }
 0x20e   : > { %v1716_v8 = vadd.f32 %v1714_v22, %v7216_v4  ;;  %v2359_v15 = vmul.f32 %v7219_v48, %v6084_v54  ;;  %v2488_v31 = vmul.f32 %v7220_v1, %v6084_v54  ;;  %v3119_v34 = vadd.f32 %v7221_v38, %v3111_v28  ;;  %v7223_v29 = vld [vmem:[#allocation94_spill] sm:$0xff]  ;;  %v7225_v22 = vld [vmem:[#allocation75_spill] sm:$0xff]  ;;  %v7226_v4 = vld [vmem:[#allocation100_spill] sm:$0xff] }
 0x20f   : > { %v3232_v16 = vadd.f32 %v7222_v24, %v3224_v23  ;;  %v3223_v46 = vadd.f32 %v7223_v29, %v3215_v10  ;;  %v7224_v60 = vld [vmem:[#allocation42_spill] sm:$0xff]  ;;  %v2617_v3 = vmul.f32 %v7225_v22, %v6084_v54  ;;  %v2746_v33 = vmul.f32 %v7226_v4, %v6084_v54  ;;  %v7230_v38 = vld [vmem:[#allocation120_spill] sm:$0xff]  ;;  %v3929_v24 = vpop.f32.mrf.mxu1  ;;  %v7231_v10 = vld [vmem:[#allocation97_spill] sm:$0xff] }
 0x210   : > { %v2232_v43 = vadd.f32 %v2230_v7, %v7224_v60  ;;  %v2875_v0 = vmul.f32 %v7227_v14, %v6084_v54  ;;  %v3004_v37 = vmul.f32 %v7228_v2, %v6084_v54  ;;  %v3127_v28 = vadd.f32 %v7229_v36, %v3119_v34  ;;  %v7232_v7 = vld [vmem:[#allocation77_spill] sm:$0xff]  ;;  %v7234_v22 = vld [vmem:[#allocation92_spill] sm:$0xff]  ;;  %v7235_v4 = vld [vmem:[#allocation90_spill] sm:$0xff] }
 0x211   : > { %v3240_v23 = vadd.f32 %v7230_v38, %v3232_v16  ;;  %v2361_v29 = vadd.f32 %v2359_v15, %v7231_v10  ;;  %v2490_v60 = vadd.f32 %v2488_v31, %v7232_v7  ;;  %v2619_v17 = vadd.f32 %v2617_v3, %v7233_v47  ;;  %v7239_v34 = vld [vmem:[#allocation83_spill] sm:$0xff]  ;;  %v7240_v38 = vld [vmem:[#allocation45_spill] sm:$0xff] }
 0x212   : > { %v2748_v42 = vadd.f32 %v2746_v33, %v7234_v22  ;;  %v2877_v39 = vadd.f32 %v2875_v0, %v7235_v4  ;;  %v3006_v14 = vadd.f32 %v3004_v37, %v7236_v9  ;;  %v3133_v2 = vmul.f32 %v7237_v40, %v6084_v54  ;;  %v7242_v22 = vld [vmem:[#allocation122_spill] sm:$0xff]  ;;  %v7244_v4 = vld [vmem:[#allocation47_spill] sm:$0xff] }
 0x213   : > { %v3248_v36 = vadd.f32 %v7238_v41, %v3240_v23  ;;  %v3231_v16 = vadd.f32 %v7239_v34, %v3223_v46  ;;  %v3262_v15 = vmul.f32 %v7240_v38, %v6084_v54  ;;  %v6176_v31 = vrot.slane %v6084_v54, %v4346_v49  ;;  %v7243_v46 = vld [vmem:[#allocation39_spill] sm:$0xff]  ;;  %v7248_v49 = vld [vmem:[#allocation85_spill] sm:$0xff] }
 0x214   : > { %v6179_v47 = vadd.f32 %v3929_v24, %v7200_v25  ;;  %v3135_v0 = vadd.f32 %v3133_v2, %v3127_v28  ;;  %v6184_v9 = vrot.slane %v7152_v12, %v4364_v59  ;;  %v6188_v41 = vrot.slane %v7157_v18, %v4364_v59  ;;  %v7245_v25 = vld [vmem:[#allocation60_spill] sm:$0xff]  ;;  %v7246_v28 = vld [vmem:[#allocation69_spill] sm:$0xff] }
 0x215   : > { %v3256_v37 = vadd.f32 %v7242_v22, %v3248_v36  ;;  %v7247_v36 = vld [vmem:[#allocation82_spill] sm:$0xff] }
 0x216   : > { %7241 = vst [vmem:[#allocation106_spill] sm:$0xff] %v6179_v47  ;;  %v1851_v3 = vmul.f32 %v7243_v46, %v6179_v47  ;;  %v1980_v33 = vmul.f32 %v7244_v4, %v6179_v47  ;;  %v2109_v2 = vmul.f32 %v7245_v25, %v6179_v47  ;;  %v2238_v23 = vmul.f32 %v7246_v28, %v6179_v47 }
 0x217   : > { %v3264_v24 = vadd.f32 %v3262_v15, %v3256_v37  ;;  %v1594_v10 = vmul.f32 %v6184_v9, %v6179_v47  ;;  %v1722_v7 = vmul.f32 %v6188_v41, %v6179_v47  ;;  %v2367_v34 = vmul.f32 %v7247_v36, %v6179_v47 }
 0x218   : > { %v1853_v22 = vadd.f32 %v1851_v3, %v1845_v52  ;;  %v1982_v46 = vadd.f32 %v1980_v33, %v1974_v62  ;;  %v2111_v59 = vadd.f32 %v2109_v2, %v2103_v11  ;;  %v2240_v4 = vadd.f32 %v2238_v23, %v2232_v43  ;;  %v7249_v11 = vld [vmem:[#allocation87_spill] sm:$0xff]  ;;  %v7250_v62 = vld [vmem:[#allocation101_spill] sm:$0xff] }
 0x219   : > { %v1596_v18 = vadd.f32 %v1594_v10, %v1588_v27  ;;  %v1724_v12 = vadd.f32 %v1722_v7, %v1716_v8  ;;  %v2369_v25 = vadd.f32 %v2367_v34, %v2361_v29  ;;  %v2496_v28 = vmul.f32 %v7248_v49, %v6179_v47  ;;  %v7251_v8 = vld [vmem:[#allocation24_spill] sm:$0xff]  ;;  %v7252_v29 = vld [vmem:[#allocation111_spill] sm:$0xff] }
 0x21a   : > { %3723 = vst [vmem:[%s6208_s26 + $0x28] sm:$0xff] %v1853_v22  ;;  %3725 = vst [vmem:[%s6208_s26 + $0x38] sm:$0xff] %v1982_v46  ;;  %v2625_v52 = vmul.f32 %v7249_v11, %v6179_v47  ;;  %v2754_v27 = vmul.f32 %v7250_v62, %v6179_v47  ;;  %v2883_v43 = vmul.f32 %v7251_v8, %v6179_v47  ;;  %v7253_v46 = vld [vmem:[#allocation57_spill] sm:$0xff]  ;;  %v7255_v34 = vld [vmem:[#allocation119_spill] sm:$0xff] }
 0x21b   : > { %3727 = vst [vmem:[%s6208_s26 + $0x48] sm:$0xff] %v2111_v59  ;;  %3729 = vst [vmem:[%s6208_s26 + $0x58] sm:$0xff] %v2240_v4  ;;  %v3012_v15 = vmul.f32 %v7252_v29, %v6179_v47  ;;  %v3349_v37 = vrot.slane %v6084_v54, %v4348_v50  ;;  %v2498_v59 = vadd.f32 %v2496_v28, %v2490_v60  ;;  %v7254_v4 = vld [vmem:[#allocation67_spill] sm:$0xff]  ;;  %v7256_v28 = vld [vmem:[#allocation61_spill] sm:$0xff] }
 0x21c   : > { %1598 = vst [vmem:[%s6208_s26 + $0x8] sm:$0xff] %v1596_v18  ;;  %3721 = vst [vmem:[%s6208_s26 + $0x18] sm:$0xff] %v1724_v12  ;;  %v3141_v3 = vmul.f32 %v7253_v46, %v6179_v47  ;;  %v3270_v33 = vmul.f32 %v7254_v4, %v6179_v47  ;;  %v2627_v2 = vadd.f32 %v2625_v52, %v2619_v17  ;;  %v7257_v52 = vld [vmem:[#allocation20_spill] sm:$0xff] }
 0x21d   : > { %3731 = vst [vmem:[%s6208_s26 + $0x68] sm:$0xff] %v2369_v25  ;;  %v2756_v23 = vadd.f32 %v2754_v27, %v2748_v42  ;;  %v2885_v10 = vadd.f32 %v2883_v43, %v2877_v39  ;;  %v3014_v7 = vadd.f32 %v3012_v15, %v3006_v14  ;;  %v3239_v22 = vadd.f32 %v7255_v34, %v3231_v16  ;;  %v7258_v14 = vld [vmem:[#allocation44_spill] sm:$0xff]  ;;  %v7259_v16 = vld [vmem:[#allocation50_spill] sm:$0xff] }
 0x21e   : > { %v3357_v12 = vrot.slane %v6084_v54, %v4350_v51  ;;  %3733 = vst [vmem:[%s6208_s26 + $0x78] sm:$0xff] %v2498_v59  ;;  %v3143_v18 = vadd.f32 %v3141_v3, %v3135_v0  ;;  %v3272_v60 = vadd.f32 %v3270_v33, %v3264_v24  ;;  %v2610_v25 = vadd.f32 %v6092_v19, %v5997_v6  ;;  %v7260_v24 = vld [vmem:[#allocation107_spill] sm:$0xff]  ;;  %v7262_v15 = vld [vmem:[#allocation88_spill] sm:$0xff]  ;;  %v7263_v3 = vld [vmem:[#allocation74_spill] sm:$0xff] }
 0x21f   : > { %v2739_v17 = vadd.f32 %v6096_v61, %v7256_v28  ;;  %v2868_v39 = vadd.f32 %v6100_v53, %v7257_v52  ;;  %v3124_v42 = vmul.f32 %v7258_v14, %v5908_v26  ;;  %3735 = vst [vmem:[%s6208_s26 + $0x88] sm:$0xff] %v2627_v2  ;;  %3737 = vst [vmem:[%s6208_s26 + $0x98] sm:$0xff] %v2756_v23  ;;  %v7261_v6 = vld [vmem:[#allocation15_spill] sm:$0xff]  ;;  %v1383_v53 = vpop.f32.mrf.mxu0  ;;  %v7264_v2 = vld [vmem:[#allocation21_spill] sm:$0xff] }
 0x220   : > { %3739 = vst [vmem:[%s6208_s26 + $0xa8] sm:$0xff] %v2885_v10  ;;  %3741 = vst [vmem:[%s6208_s26 + $0xb8] sm:$0xff] %v3014_v7  ;;  %v2997_v0 = vadd.f32 %v6107_v13, %v7259_v16  ;;  %v3253_v27 = vmul.f32 %v7260_v24, %v5908_v26  ;;  %v3365_v19 = vrot.slane %v6084_v54, %v7261_v6  ;;  %v7265_v10 = vld [vmem:[#allocation102_spill] sm:$0xff]  ;;  %v7271_v28 = vld [vmem:[#allocation103_spill] sm:$0xff]  ;;  %v1462_v16 = vpop.f32.mrf.mxu1 }
 0x221   : > { %v3373_v61 = vrot.slane %v6084_v54, %v7094_v44  ;;  %3743 = vst [vmem:[%s6208_s26 + $0xc8] sm:$0xff] %v3143_v18  ;;  %3745 = vst [vmem:[%s6208_s26 + $0xd8] sm:$0xff] %v3272_v60  ;;  %v3126_v43 = vadd.f32 %v3124_v42, %v6109_v63  ;;  %v6260_v59 = vmul.f32 %v6176_v31, %v7262_v15  ;;  %v7267_v34 = vld [vmem:[#allocation86_spill] sm:$0xff]  ;;  %v7269_v63 = vld [vmem:[#allocation63_spill] sm:$0xff] }
 0x222   : > { %v6264_v13 = vmul.f32 %v6176_v31, %v7263_v3  ;;  %v6268_v33 = vrot.slane %v6084_v54, %v4360_v56  ;;  %v3247_v23 = vadd.f32 %v7264_v2, %v3239_v22  ;;  %v6272_v7 = vmul.f32 %v3349_v37, %v7265_v10  ;;  %v7275_v22 = vld [vmem:[#allocation8_spill] sm:$0xff] }
 0x223   : > { %v6275_v18 = vmul.f32 %v3349_v37, %v7267_v34  ;;  %v6278_v60 = vmul.f32 %v3357_v12, %v7269_v63  ;;  %v6281_v52 = vmul.f32 %v3357_v12, %v7271_v28  ;;  %v6285_v31 = vrot.slane %v6084_v54, %v4362_v58  ;;  %v7277_v37 = vld [vmem:[#allocation112_spill] sm:$0xff]  ;;  %v7281_v12 = vld [vmem:[#allocation55_spill] sm:$0xff]  ;;  %v7283_v34 = vld [vmem:[#allocation113_spill] sm:$0xff] }
 0x224   : > { %7266 = vst [vmem:[#allocation33_spill] sm:$0xff] %v6272_v7  ;;  %v6289_v14 = vrot.slane %v6179_v47, %v4362_v58  ;;  %v6292_v42 = vadd.f32 %v1383_v53, %v7275_v22  ;;  %v6295_v24 = vmul.f32 %v3365_v19, %v7277_v37  ;;  %v7279_v2 = vld [vmem:[#allocation104_spill] sm:$0xff]  ;;  %v6301_v28 = vmul.f32 %v3373_v61, %v7281_v12  ;;  %v7308_v7 = vld [vmem:[#allocation65_spill] sm:$0xff] }
 0x225   : > { %7268 = vst [vmem:[#allocation23_spill] sm:$0xff] %v6275_v18  ;;  %7270 = vst [vmem:[#allocation35_spill] sm:$0xff] %v6278_v60  ;;  %v6298_v63 = vmul.f32 %v3365_v19, %v7279_v2  ;;  %v6304_v10 = vmul.f32 %v3373_v61, %v7283_v34  ;;  %v6308_v3 = vmul.f32 %v6268_v33, %v5908_v26 }
 0x226   : > { %7272 = vst [vmem:[#allocation25_spill] sm:$0xff] %v6281_v52  ;;  %7273 = vst [vmem:[#allocation56_spill] sm:$0xff] %v6285_v31  ;;  %v6312_v53 = vmul.f32 %v6289_v14, %v6084_v54  ;;  %v1585_v37 = vmul.f32 %v6116_v45, %v6292_v42  ;;  %v1713_v19 = vmul.f32 %v6120_v21, %v6292_v42  ;;  %v7303_v52 = vld [vmem:[#allocation26_spill] sm:$0xff]  ;;  %v7304_v54 = vld [vmem:[#allocation31_spill] sm:$0xff] }
 0x227   : > { %7274 = vst [vmem:[#allocation43_spill] sm:$0xff] %v6289_v14  ;;  %7276 = vst [vmem:[#allocation116_spill] sm:$0xff] %v6292_v42  ;;  %v3255_v2 = vadd.f32 %v3253_v27, %v3247_v23  ;;  %v1842_v12 = vmul.f32 %v7208_v30, %v6292_v42  ;;  %v1971_v61 = vmul.f32 %v7209_v55, %v6292_v42  ;;  %v7287_v23 = vld [vmem:[#allocation22_spill] sm:$0xff] }
 0x228   : > { %7278 = vst [vmem:[#allocation117_spill] sm:$0xff] %v6295_v24  ;;  %7280 = vst [vmem:[#allocation37_spill] sm:$0xff] %v6298_v63  ;;  %v6323_v26 = vadd.f32 %v1462_v16, %v7275_v22  ;;  %v2100_v14 = vmul.f32 %v7211_v20, %v6292_v42  ;;  %v2358_v45 = vmul.f32 %v7219_v48, %v6292_v42  ;;  %v7288_v16 = vld [vmem:[#allocation105_spill] sm:$0xff]  ;;  %v7302_v24 = vld [vmem:[#allocation28_spill] sm:$0xff] }
 0x229   : > { %7282 = vst [vmem:[#allocation49_spill] sm:$0xff] %v6301_v28  ;;  %7284 = vst [vmem:[#allocation58_spill] sm:$0xff] %v6304_v10  ;;  %v2487_v21 = vmul.f32 %v7220_v1, %v6292_v42  ;;  %v1587_v30 = vadd.f32 %v1585_v37, %v6046_v57  ;;  %v1715_v27 = vadd.f32 %v1713_v19, %v6059_v35  ;;  %v7289_v20 = vld [vmem:[#allocation53_spill] sm:$0xff]  ;;  %v7291_v10 = vld [vmem:[#allocation108_spill] sm:$0xff] }
 0x22a   : > { %7285 = vst [vmem:[#allocation78_spill] sm:$0xff] %v6308_v3  ;;  %7286 = vst [vmem:[#allocation54_spill] sm:$0xff] %v6312_v53  ;;  %v2229_v53 = vmul.f32 %v7218_v32, %v6292_v42  ;;  %v1844_v55 = vadd.f32 %v1842_v12, %v6066_v5  ;;  %v1973_v22 = vadd.f32 %v1971_v61, %v7287_v23  ;;  %v7290_v3 = vld [vmem:[#allocation41_spill] sm:$0xff]  ;;  %v7292_v1 = vld [vmem:[#allocation75_spill] sm:$0xff] }
 0x22b   : > { %v2102_v34 = vadd.f32 %v2100_v14, %v7288_v16  ;;  %v6340_v32 = vadd.f32 %v2358_v45, %v7290_v3  ;;  %v6343_v48 = vadd.f32 %v2487_v21, %v7291_v10  ;;  %v2616_v28 = vmul.f32 %v7292_v1, %v6292_v42  ;;  %v7293_v57 = vld [vmem:[#allocation100_spill] sm:$0xff]  ;;  %v7295_v12 = vld [vmem:[#allocation110_spill] sm:$0xff] }
 0x22c   : > { %v2231_v15 = vadd.f32 %v2229_v53, %v7289_v20  ;;  %v2745_v35 = vmul.f32 %v7293_v57, %v6292_v42  ;;  %v7294_v5 = vld [vmem:[#allocation40_spill] sm:$0xff]  ;;  %v3003_v14 = vmul.f32 %v7295_v12, %v6292_v42  ;;  %v3132_v53 = vmul.f32 %v7237_v40, %v6292_v42  ;;  %v7296_v10 = vld [vmem:[#allocation14_spill] sm:$0xff]  ;;  %v7300_v12 = vld [vmem:[#allocation13_spill] sm:$0xff] }
 0x22d   : > { %v2874_v37 = vmul.f32 %v7294_v5, %v6292_v42  ;;  %v3261_v3 = vmul.f32 %v7240_v38, %v6292_v42  ;;  %v3279_v19 = vrot.slane %v6292_v42, %v7296_v10  ;;  %v3285_v61 = vrot.slane %v6292_v42, %v4348_v50  ;;  %v7297_v20 = vld [vmem:[#allocation10_spill] sm:$0xff]  ;;  %v7298_v40 = vld [vmem:[#allocation12_spill] sm:$0xff]  ;;  %v7299_v5 = vld [vmem:[#allocation11_spill] sm:$0xff] }
 0x22e   : > { %v6361_v45 = vadd.f32 %v2616_v28, %v2610_v25  ;;  %v6363_v21 = vadd.f32 %v2745_v35, %v2739_v17  ;;  %v6367_v16 = vadd.f32 %v3003_v14, %v2997_v0  ;;  %v3293_v63 = vrot.slane %v6292_v42, %v4350_v51 }
 0x22f   : > { %v6365_v23 = vadd.f32 %v2874_v37, %v2868_v39  ;;  %v3280_v1 = vmul.f32 %v3279_v19, %v7297_v20  ;;  %v3281_v57 = vmul.f32 %v3279_v19, %v7298_v40  ;;  %v3286_v38 = vmul.f32 %v3285_v61, %v7299_v5  ;;  %v7301_v37 = vld [vmem:[#allocation19_spill] sm:$0xff] }
 0x230   : > { %v3287_v47 = vmul.f32 %v3285_v61, %v7300_v12  ;;  %v3301_v25 = vrot.slane %v6292_v42, %v7261_v6  ;;  %v3309_v17 = vrot.slane %v6292_v42, %v7094_v44  ;;  %v3317_v39 = vrot.slane %v6292_v42, %v4360_v56  ;;  %v7305_v6 = vld [vmem:[#allocation30_spill] sm:$0xff]  ;;  %v7312_v12 = vld [vmem:[#allocation73_spill] sm:$0xff] }
 0x231   : > { %v3288_v0 = vadd.f32 %v3286_v38, %v3280_v1  ;;  %v3325_v35 = vrot.slane %v6292_v42, %v4362_v58  ;;  %v3333_v14 = vrot.slane %v6292_v42, %v7301_v37  ;;  %v6385_v19 = vadd.f32 %v3132_v53, %v3126_v43  ;;  %v7306_v1 = vld [vmem:[#allocation52_spill] sm:$0xff]  ;;  %v7309_v43 = vld [vmem:[#allocation51_spill] sm:$0xff]  ;;  %v7311_v37 = vld [vmem:[#allocation70_spill] sm:$0xff] }
 0x232   : > { %v3289_v28 = vadd.f32 %v3287_v47, %v3281_v57  ;;  %v6387_v61 = vadd.f32 %v3261_v3, %v3255_v2  ;;  %v3294_v31 = vmul.f32 %v3293_v63, %v7302_v24  ;;  %v3295_v60 = vmul.f32 %v3293_v63, %v7303_v52  ;;  %v7307_v57 = vld [vmem:[#allocation48_spill] sm:$0xff]  ;;  %v7313_v52 = vld [vmem:[#allocation71_spill] sm:$0xff] }
 0x233   : > { %v3302_v44 = vmul.f32 %v3301_v25, %v7304_v54  ;;  %v3303_v56 = vmul.f32 %v3301_v25, %v7305_v6  ;;  %v3310_v47 = vmul.f32 %v3309_v17, %v7306_v1  ;;  %v3311_v38 = vmul.f32 %v3309_v17, %v7307_v57  ;;  %v7310_v2 = vld [vmem:[#allocation72_spill] sm:$0xff] }
 0x234   : > { %v3296_v58 = vadd.f32 %v3294_v31, %v3288_v0  ;;  %v3297_v18 = vadd.f32 %v3295_v60, %v3289_v28  ;;  %v3318_v42 = vmul.f32 %v3317_v39, %v7308_v7  ;;  %v3319_v53 = vmul.f32 %v3317_v39, %v7309_v43  ;;  %v7314_v31 = vld [vmem:[#allocation39_spill] sm:$0xff]  ;;  %v7316_v28 = vld [vmem:[#allocation60_spill] sm:$0xff] }
 0x235   : > { %v3326_v3 = vmul.f32 %v3325_v35, %v7310_v2  ;;  %v3327_v24 = vmul.f32 %v3325_v35, %v7311_v37  ;;  %v3334_v63 = vmul.f32 %v3333_v14, %v7312_v12  ;;  %v3335_v54 = vmul.f32 %v3333_v14, %v7313_v52  ;;  %v7315_v39 = vld [vmem:[#allocation47_spill] sm:$0xff] }
 0x236   : > { %v3304_v5 = vadd.f32 %v3302_v44, %v3296_v58  ;;  %v3305_v25 = vadd.f32 %v3303_v56, %v3297_v18  ;;  %v1593_v1 = vmul.f32 %v6184_v9, %v6323_v26  ;;  %v1721_v60 = vmul.f32 %v6188_v41, %v6323_v26  ;;  %v7317_v58 = vld [vmem:[#allocation69_spill] sm:$0xff] }
 0x237   : > { %v1850_v17 = vmul.f32 %v7314_v31, %v6323_v26  ;;  %v1979_v0 = vmul.f32 %v7315_v39, %v6323_v26  ;;  %v2108_v35 = vmul.f32 %v7316_v28, %v6323_v26  ;;  %v2237_v56 = vmul.f32 %v7317_v58, %v6323_v26 }
 0x238   : > { %v3312_v44 = vadd.f32 %v3310_v47, %v3304_v5  ;;  %v3313_v9 = vadd.f32 %v3311_v38, %v3305_v25  ;;  %v1595_v41 = vadd.f32 %v1593_v1, %v1587_v30  ;;  %v1723_v18 = vadd.f32 %v1721_v60, %v1715_v27  ;;  %v7318_v5 = vld [vmem:[#allocation115_spill] sm:$0xff]  ;;  %v7320_v47 = vld [vmem:[#allocation13_spill] sm:$0xff]  ;;  %v7324_v60 = vld [vmem:[#allocation26_spill] sm:$0xff] }
 0x239   : > { %v1852_v14 = vadd.f32 %v1850_v17, %v1844_v55  ;;  %v1981_v52 = vadd.f32 %v1979_v0, %v1973_v22  ;;  %v2110_v31 = vadd.f32 %v2108_v35, %v2102_v34  ;;  %v2239_v12 = vadd.f32 %v2237_v56, %v2231_v15  ;;  %v7325_v0 = vld [vmem:[#allocation15_spill] sm:$0xff] }
 0x23a   : > { %v3320_v37 = vadd.f32 %v3318_v42, %v3312_v44  ;;  %v3321_v39 = vadd.f32 %v3319_v53, %v3313_v9  ;;  %1597 = vst [vmem:[%s6208_s26] sm:$0xff] %v1595_v41  ;;  %3720 = vst [vmem:[%s6208_s26 + $0x10] sm:$0xff] %v1723_v18  ;;  %v2366_v28 = vmul.f32 %v7247_v36, %v6323_v26  ;;  %v7321_v53 = vld [vmem:[#allocation33_spill] sm:$0xff]  ;;  %v7327_v56 = vld [vmem:[#allocation19_spill] sm:$0xff] }
 0x23b   : > { %v2495_v58 = vmul.f32 %v7248_v49, %v6323_v26  ;;  %3722 = vst [vmem:[%s6208_s26 + $0x20] sm:$0xff] %v1852_v14  ;;  %3724 = vst [vmem:[%s6208_s26 + $0x30] sm:$0xff] %v1981_v52  ;;  %v2624_v34 = vmul.f32 %v7249_v11, %v6323_v26  ;;  %v2753_v15 = vmul.f32 %v7250_v62, %v6323_v26  ;;  %v7328_v44 = vld [vmem:[#allocation96_spill] sm:$0xff]  ;;  %v7329_v41 = vld [vmem:[#allocation35_spill] sm:$0xff] }
 0x23c   : > { %3726 = vst [vmem:[%s6208_s26 + $0x40] sm:$0xff] %v2110_v31  ;;  %3728 = vst [vmem:[%s6208_s26 + $0x50] sm:$0xff] %v2239_v12  ;;  %v2882_v42 = vmul.f32 %v7251_v8, %v6323_v26  ;;  %v3011_v36 = vmul.f32 %v7252_v29, %v6323_v26  ;;  %v3328_v49 = vadd.f32 %v3326_v3, %v3320_v37  ;;  %v7319_v37 = vld [vmem:[#allocation11_spill] sm:$0xff]  ;;  %v7330_v14 = vld [vmem:[#allocation25_spill] sm:$0xff] }
 0x23d   : > { %v3329_v52 = vadd.f32 %v3327_v24, %v3321_v39  ;;  %v2368_v30 = vadd.f32 %v2366_v28, %v6340_v32  ;;  %v2497_v27 = vadd.f32 %v2495_v58, %v6343_v48  ;;  %v2626_v11 = vadd.f32 %v2624_v34, %v6361_v45  ;;  %v7331_v39 = vld [vmem:[#allocation17_spill] sm:$0xff] }
 0x23e   : > { %v2755_v62 = vadd.f32 %v2753_v15, %v6363_v21  ;;  %v2884_v55 = vadd.f32 %v2882_v42, %v6365_v23  ;;  %v3013_v8 = vadd.f32 %v3011_v36, %v6367_v16  ;;  %v3336_v22 = vadd.f32 %v3334_v63, %v3328_v49  ;;  %v7322_v63 = vld [vmem:[#allocation23_spill] sm:$0xff]  ;;  %v7333_v49 = vld [vmem:[#allocation56_spill] sm:$0xff] }
 0x23f   : > { %v3337_v29 = vadd.f32 %v3335_v54, %v3329_v52  ;;  %3730 = vst [vmem:[%s6208_s26 + $0x60] sm:$0xff] %v2368_v30  ;;  %3732 = vst [vmem:[%s6208_s26 + $0x70] sm:$0xff] %v2497_v27  ;;  %v3140_v24 = vmul.f32 %v7253_v46, %v6323_v26  ;;  %v3269_v32 = vmul.f32 %v7254_v4, %v6323_v26  ;;  %v7332_v15 = vld [vmem:[#allocation31_spill] sm:$0xff]  ;;  %v7334_v30 = vld [vmem:[#allocation117_spill] sm:$0xff] }
 0x240   : > { %v3383_v48 = vmul.f32 %v6268_v33, %v7318_v5  ;;  %3734 = vst [vmem:[%s6208_s26 + $0x80] sm:$0xff] %v2626_v11  ;;  %3736 = vst [vmem:[%s6208_s26 + $0x90] sm:$0xff] %v2755_v62  ;;  %v3408_v54 = vrot.slane %v6323_v26, %v7296_v10  ;;  %v3414_v45 = vrot.slane %v6323_v26, %v4348_v50  ;;  %v7335_v11 = vld [vmem:[#allocation37_spill] sm:$0xff] }
 0x241   : > { %3738 = vst [vmem:[%s6208_s26 + $0xa0] sm:$0xff] %v2884_v55  ;;  %3740 = vst [vmem:[%s6208_s26 + $0xb0] sm:$0xff] %v3013_v8  ;;  %v3422_v46 = vrot.slane %v6323_v26, %v4350_v51  ;;  %v3344_v4 = vadd.f32 %v6260_v59, %v3336_v22  ;;  %v3345_v21 = vadd.f32 %v6264_v13, %v3337_v29  ;;  %v7323_v59 = vld [vmem:[#allocation28_spill] sm:$0xff]  ;;  %v7336_v55 = vld [vmem:[#allocation18_spill] sm:$0xff] }
 0x242   : > { %v3142_v33 = vadd.f32 %v3140_v24, %v6385_v19  ;;  %v3271_v23 = vadd.f32 %v3269_v32, %v6387_v61  ;;  %v3409_v16 = vmul.f32 %v3408_v54, %v7297_v20  ;;  %v3410_v12 = vmul.f32 %v3408_v54, %v7298_v40  ;;  %v7326_v40 = vld [vmem:[#allocation16_spill] sm:$0xff] }
 0x243   : > { %v3415_v1 = vmul.f32 %v3414_v45, %v7319_v37  ;;  %v3416_v38 = vmul.f32 %v3414_v45, %v7320_v47  ;;  %v3352_v3 = vadd.f32 %v7321_v53, %v3344_v4  ;;  %v3353_v25 = vadd.f32 %v7322_v63, %v3345_v21  ;;  %v7337_v24 = vld [vmem:[#allocation52_spill] sm:$0xff]  ;;  %v7338_v45 = vld [vmem:[#allocation106_spill] sm:$0xff]  ;;  %v7339_v4 = vld [vmem:[#allocation49_spill] sm:$0xff] }
 0x244   : > { %3742 = vst [vmem:[%s6208_s26 + $0xc0] sm:$0xff] %v3142_v33  ;;  %3744 = vst [vmem:[%s6208_s26 + $0xd0] sm:$0xff] %v3271_v23  ;;  %v3423_v13 = vmul.f32 %v3422_v46, %v7323_v59  ;;  %v3424_v19 = vmul.f32 %v3422_v46, %v7324_v60  ;;  %v3430_v20 = vrot.slane %v6323_v26, %v7325_v0  ;;  %v7340_v21 = vld [vmem:[#allocation58_spill] sm:$0xff] }
 0x245   : > { %v3417_v17 = vadd.f32 %v3415_v1, %v3409_v16  ;;  %v3418_v61 = vadd.f32 %v3416_v38, %v3410_v12  ;;  %v3438_v35 = vrot.slane %v6323_v26, %v7326_v40  ;;  %v3397_v9 = vrot.slane %v7328_v44, %v7327_v56  ;;  %v7341_v38 = vld [vmem:[#allocation78_spill] sm:$0xff] }
 0x246   : > { %v3360_v18 = vadd.f32 %v7329_v41, %v3352_v3  ;;  %v3361_v31 = vadd.f32 %v7330_v14, %v3353_v25  ;;  %v3446_v28 = vrot.slane %v6323_v26, %v7331_v39  ;;  %v3431_v42 = vmul.f32 %v3430_v20, %v7332_v15  ;;  %v7342_v3 = vld [vmem:[#allocation116_spill] sm:$0xff] }
 0x247   : > { %v3425_v58 = vadd.f32 %v3423_v13, %v3417_v17  ;;  %v3426_v34 = vadd.f32 %v3424_v19, %v3418_v61  ;;  %v3432_v36 = vmul.f32 %v3430_v20, %v7305_v6  ;;  %v3391_v52 = vmul.f32 %v7333_v49, %v7328_v44  ;;  %v7343_v13 = vld [vmem:[#allocation70_spill] sm:$0xff]  ;;  %v7344_v20 = vld [vmem:[#allocation73_spill] sm:$0xff]  ;;  %v7345_v44 = vld [vmem:[#allocation71_spill] sm:$0xff] }
 0x248   : > { %v3368_v27 = vadd.f32 %v7334_v30, %v3360_v18  ;;  %v3369_v62 = vadd.f32 %v7335_v11, %v3361_v31  ;;  %v3454_v8 = vrot.slane %v6323_v26, %v7336_v55  ;;  %v3439_v32 = vmul.f32 %v3438_v35, %v7337_v24  ;;  %v7346_v31 = vld [vmem:[#allocation88_spill] sm:$0xff]  ;;  %v7350_v11 = vld [vmem:[#allocation63_spill] sm:$0xff] }
 0x249   : > { %v3433_v22 = vadd.f32 %v3431_v42, %v3425_v58  ;;  %v3434_v29 = vadd.f32 %v3432_v36, %v3426_v34  ;;  %v3440_v54 = vmul.f32 %v3438_v35, %v7307_v57  ;;  %v3399_v46 = vmul.f32 %v3397_v9, %v7338_v45  ;;  %v7348_v42 = vld [vmem:[#allocation102_spill] sm:$0xff]  ;;  %v7351_v55 = vld [vmem:[#allocation103_spill] sm:$0xff]  ;;  %v7352_v24 = vld [vmem:[#allocation112_spill] sm:$0xff] }
 0x24a   : > { %v3376_v6 = vadd.f32 %v7339_v4, %v3368_v27  ;;  %v3377_v33 = vadd.f32 %v7340_v21, %v3369_v62  ;;  %v3447_v23 = vmul.f32 %v3446_v28, %v7308_v7  ;;  %v3448_v37 = vmul.f32 %v3446_v28, %v7309_v43  ;;  %v7354_v21 = vld [vmem:[#allocation55_spill] sm:$0xff] }
 0x24b   : > { %v3441_v16 = vadd.f32 %v3439_v32, %v3433_v22  ;;  %v3442_v12 = vadd.f32 %v3440_v54, %v3434_v29  ;;  %v3462_v1 = vrot.slane %v6323_v26, %v7327_v56  ;;  %v3470_v47 = vrot.slane %v7338_v45, %v7296_v10  ;;  %v7353_v54 = vld [vmem:[#allocation104_spill] sm:$0xff] }
 0x24c   : > { %v3384_v57 = vadd.f32 %v7341_v38, %v3376_v6  ;;  %v3385_v53 = vadd.f32 %v3383_v48, %v3377_v33  ;;  %v3390_v63 = vmul.f32 %v7333_v49, %v7342_v3  ;;  %v3455_v7 = vmul.f32 %v3454_v8, %v7310_v2  ;;  %v7349_v49 = vld [vmem:[#allocation86_spill] sm:$0xff] }
 0x24d   : > { %v3449_v25 = vadd.f32 %v3447_v23, %v3441_v16  ;;  %v3450_v59 = vadd.f32 %v3448_v37, %v3442_v12  ;;  %v3456_v60 = vmul.f32 %v3454_v8, %v7343_v13  ;;  %v3478_v43 = vrot.slane %v7338_v45, %v4348_v50  ;;  %v7347_v50 = vld [vmem:[#allocation74_spill] sm:$0xff]  ;;  %v7356_v37 = vld [vmem:[#allocation80_spill] sm:$0xff] }
 0x24e   : > { %v3392_v19 = vadd.f32 %v3390_v63, %v3384_v57  ;;  %v3393_v17 = vadd.f32 %v3391_v52, %v3385_v53  ;;  %v3398_v10 = vmul.f32 %v3397_v9, %v6323_v26  ;;  %v3463_v35 = vmul.f32 %v3462_v1, %v7344_v20  ;;  %v7357_v53 = vld [vmem:[#allocation43_spill] sm:$0xff] }
 0x24f   : > { %v3457_v61 = vadd.f32 %v3455_v7, %v3449_v25  ;;  %v3458_v48 = vadd.f32 %v3456_v60, %v3450_v59  ;;  %v3464_v41 = vmul.f32 %v3462_v1, %v7345_v44  ;;  %v3486_v2 = vrot.slane %v7338_v45, %v4350_v51 }
 0x250   : > { %v3401_v18 = vadd.f32 %v3399_v46, %v3393_v17  ;;  %v3400_v14 = vadd.f32 %v3398_v10, %v3392_v19  ;;  %v3471_v28 = vmul.f32 %v3470_v47, %v7346_v31  ;;  %v3472_v58 = vmul.f32 %v3470_v47, %v7347_v50 }
 0x251   : > { %v3465_v34 = vadd.f32 %v3463_v35, %v3457_v61  ;;  %v3466_v15 = vadd.f32 %v3464_v41, %v3458_v48  ;;  %v3494_v9 = vrot.slane %v7338_v45, %v7325_v0  ;;  %v3479_v36 = vmul.f32 %v3478_v43, %v7348_v42 }
 0x252   : > { %3747 = vst [vmem:[%s6208_s26 + $0xe8] sm:$0xff] %v3401_v18  ;;  %3746 = vst [vmem:[%s6208_s26 + $0xe0] sm:$0xff] %v3400_v14  ;;  %v3480_v52 = vmul.f32 %v3478_v43, %v7349_v49  ;;  %v3502_v51 = vrot.slane %v7338_v45, %v7326_v40  ;;  %v3487_v62 = vmul.f32 %v3486_v2, %v7350_v11  ;;  %v7355_v40 = vld [vmem:[#allocation113_spill] sm:$0xff] }
 0x253   : > { %v3473_v30 = vadd.f32 %v3471_v28, %v3465_v34  ;;  %v3474_v27 = vadd.f32 %v3472_v58, %v3466_v15  ;;  %v3488_v8 = vmul.f32 %v3486_v2, %v7351_v55  ;;  %v3510_v0 = vrot.slane %v7338_v45, %v7331_v39 }
 0x254   : > { %v3495_v32 = vmul.f32 %v3494_v9, %v7352_v24  ;;  %v3496_v46 = vmul.f32 %v3494_v9, %v7353_v54  ;;  %v3503_v33 = vmul.f32 %v3502_v51, %v7354_v21  ;;  %v3504_v23 = vmul.f32 %v3502_v51, %v7355_v40 }
 0x255   : > { %v3481_v22 = vadd.f32 %v3479_v36, %v3473_v30  ;;  %v3482_v29 = vadd.f32 %v3480_v52, %v3474_v27  ;;  %v3511_v1 = vmul.f32 %v3510_v0, %v7356_v37  ;;  %v3512_v47 = vmul.f32 %v3510_v0, %v7318_v5  ;;  %v7358_v5 = vld [vmem:[#allocation54_spill] sm:$0xff] }
 0x256   : > { %v3526_v39 = vrot.slane %v7338_v45, %v7327_v56  ;;  %v3519_v63 = vmul.f32 %v7357_v53, %v7342_v3 }
 0x257   : > { %v3489_v4 = vadd.f32 %v3487_v62, %v3481_v22  ;;  %v3490_v6 = vadd.f32 %v3488_v8, %v3482_v29 }
 0x258   : > { %v3528_v7 = vmul.f32 %v3526_v39, %v7338_v45  ;;  %v3527_v56 = vmul.f32 %v3526_v39, %v6323_v26 }
 0x259   : > { %v3497_v16 = vadd.f32 %v3495_v32, %v3489_v4  ;;  %v3498_v12 = vadd.f32 %v3496_v46, %v3490_v6 }
 0x25b   : > { %v3505_v38 = vadd.f32 %v3503_v33, %v3497_v16  ;;  %v3506_v57 = vadd.f32 %v3504_v23, %v3498_v12 }
 0x25d   : > { %v3513_v25 = vadd.f32 %v3511_v1, %v3505_v38  ;;  %v3514_v59 = vadd.f32 %v3512_v47, %v3506_v57 }
 0x25f   : > { %v3521_v13 = vadd.f32 %v3519_v63, %v3513_v25  ;;  %v3522_v60 = vadd.f32 %v7358_v5, %v3514_v59 }
 0x261   : > { %v3529_v3 = vadd.f32 %v3527_v56, %v3521_v13  ;;  %v3530_v43 = vadd.f32 %v3528_v7, %v3522_v60 }
 0x263   : > { %3748 = vst [vmem:[%s6208_s26 + $0xf0] sm:$0xff] %v3529_v3  ;;  %3749 = vst [vmem:[%s6208_s26 + $0xf8] sm:$0xff] %v3530_v43 }
 0x264   : > { %4025 = shalt.err (!%p4022_p10)
}
 0x265   : > { %s4026_s6 = scalar_lea.hbm %s6542_s5, 4096  ;;  %s4030_s8 = scalar_lea.hbm %s6592_s3, 8192 }
 0x266   : > { %p4027_p1 = scmp.ne.s32.totalorder %s6542_s5, %s4026_s6  ;;  %p4031_p0 = scmp.lt.s32.totalorder %s6542_s5, %s6592_s3 }
 0x267   : > { %p4032_p2 = scmp.lt.s32.totalorder %s4030_s8, %s4026_s6 }
 0x268   : > { %p4028_p3 = pnand %p4027_p1, %p7359_p12 }
 0x269   : > { %p4033_p6 = por %p4032_p2, %p4031_p0 }
 0x26a   : > { %p4029_p9 = pneg %p4028_p3 }
 0x26c   : > { %p4034_p11 = pnand %p4033_p6, %p4029_p9 }
 0x26e   : > { %4037 = shalt.err (!%p4034_p11)
}
 0x26f   : > { %s4084_s22 = smov 128   ;;  %s4085_s26 = smov 256  }
 0x270   : > { %s4086_s27 = smov 8  }
 0x271   : > { %3932 = dma.vmem_to_hbm [thread:$0]  (%p7359_p12), %s6544_s28, 4096, %s6542_s5, %s3535_s16, %s4084_s22, %s4085_s26, %s4086_s27  }
 0x272 PF: > { %s3562_s29 = sand.u32 1, %s4064_s12   ;;  %p7360_p13 = scmp.ne.s32.totalorder %s6809_s25, 0 }
 0x273   : > { %p7361_p4 = scmp.ge.s32.totalorder %s4076_s15, 2  ;;  %s3563_s30 = scalar_lea.sflag [#allocation4], %s3562_s29 }
 0x275   : > { %p3939_p5 = pnand %p7361_p4, %p7360_p13 }
 0x277   : > { %p3940_p7 = pneg %p3939_p5 }
 0x279   : > { %4059 = dma.done.wait (%p3940_p7), %s3563_s30, 4096  }
 0x27a   : > { %4061 = vsyncadd (%p3940_p7), %s3563_s30, 4294963200  ;;  %p16_p8 = scmp.ge.s32.totalorder %s4132_s18, 4   ;;  %s7362_s12 = smov %s4068_s13 }
 0x27b   : > { %s7363_s13 = smov %s4072_s14  ;;  %s7364_s14 = smov %s4144_s21 }
 0x27c   : > { %s7365_s15 = smov %s4132_s18  ;;  %18 = sbr.rel (!%p16_p8) target bundleno = 5 (0x5), region = 107 }
 0x281   :  { %3568 = vsyncpa [#allocation3], 1 }
 0x282   :  { %3570 = vsyncpa [#allocation3 + $0x1], 1 }
 0x283   :  { %3571 = vsyncpa [#allocation4], 1 }
 0x284   :  { %3573 = vsyncpa [#allocation4 + $0x1], 1 }

</bundles_post_ra>
